<compile_context>
chip_gen: v7x
topology: tpu7x:2x2x1
jax: 0.10.0
libtpu: 0.0.40
codegen_flags: <defaults>
</compile_context>

<pallas_src>
import functools

import jax
import jax.numpy as jnp
from jax import lax
from jax.experimental import pallas as pl
from jax.experimental.pallas import tpu as pltpu


def _pick_vmem_limit():
    """~0.75 * physical VMEM, capped at 100 MiB; safe fallback = 48 MiB (v7x)."""
    default = 48 * 1024 * 1024
    try:
        info = pltpu.get_tpu_info()
        cap = getattr(info, "vmem_capacity_bytes", None)
        if not cap:
            return default
        return int(min(cap * 3 // 4, 100 * 1024 * 1024))
    except Exception:
        return default


VMEM_LIMIT = _pick_vmem_limit()


def _round_up(x, m):
    return (x + m - 1) // m * m


def _choose_th(h):
    """Largest divisor of h that is <= 8 (row-tile height for the SA kernel)."""
    for th in range(min(h, 8), 0, -1):
        if h % th == 0:
            return th
    return 1


# ----------------------------------------------------------------------------
# Fused q/k/v 1x1-conv matmul: (M, C) x (C, 3C) + bias, bf16 MXU, f32 accumulate,
# bf16 output (halves HBM traffic of the largest inter-kernel tensor).
# ----------------------------------------------------------------------------
def _matmul_bias_kernel(a_ref, w_ref, b_ref, o_ref):
    a = a_ref[...].astype(jnp.bfloat16)            # bf16 feeds the MXU single-pass
    acc = jnp.dot(a, w_ref[...], preferred_element_type=jnp.float32)
    o_ref[...] = (acc + b_ref[...]).astype(o_ref.dtype)


def matmul_bias(a, w_bf16, b2):
    """a: (M, K) f32, w_bf16: (K, N) bf16, b2: (1, N) f32 -> (M, N) bf16."""
    M, K = a.shape
    N = w_bf16.shape[1]
    if M >= 512:
        TM = 256                                   # MXU-aligned M tile (v6e/v7x 256-wide)
    else:
        TM = max(8, _round_up((M + 1) // 2, 8))    # still >= 2 grid points when possible
    grid = (pl.cdiv(M, TM),)
    cost = pl.CostEstimate(
        flops=2 * M * K * N,
        transcendentals=0,
        bytes_accessed=M * K * 4 + K * N * 2 + M * N * 2 + N * 4,
    )
    return pl.pallas_call(
        _matmul_bias_kernel,
        out_shape=jax.ShapeDtypeStruct((M, N), jnp.bfloat16),
        grid=grid,
        in_specs=[
            pl.BlockSpec((TM, K), lambda i: (i, 0)),
            pl.BlockSpec((K, N), lambda i: (0, 0)),
            pl.BlockSpec((1, N), lambda i: (0, 0)),
        ],
        out_specs=pl.BlockSpec((TM, N), lambda i: (i, 0)),
        compiler_params=pltpu.CompilerParams(
            dimension_semantics=("parallel",),
            vmem_limit_bytes=VMEM_LIMIT,
        ),
        cost_estimate=cost,
    )(a, w_bf16, b2)


# ----------------------------------------------------------------------------
# Window self-attention kernel: per-row two-pass softmax over the 9 taps,
# fused partial BatchNorm statistics.
# ----------------------------------------------------------------------------
def _sa_attn_kernel(qkv_ref, rel_ref, out_ref, psum_ref, psumsq_ref, *, ksz):
    # qkv_ref : (1, Hp, Wp, 3C) bf16 padded q/k/v map of the current image
    # rel_ref : (ksz*ksz, C) f32 relative-position embedding per tap
    # out_ref : (1, TH, W, C) f32 attention output tile
    # psum/psumsq : (1, 1, 8, C) f32; only sublane row 0 carries data
    TH = out_ref.shape[1]
    W = out_ref.shape[2]
    C = out_ref.shape[3]
    Wp = qkv_ref.shape[2]
    pad = ksz // 2
    ntap = ksz * ksz
    row0 = pl.program_id(1) * TH

    # rel rows hoisted out of the row loop (9 loop-invariant (1, C) values)
    rel_f = rel_ref[...]
    rel_rows = [rel_f[t:t + 1, :] for t in range(ntap)]

    def load_row(r_pad, lo, hi):
        # one padded qkv row, channels [lo:hi) (128-aligned), upcast to f32
        r = qkv_ref[0, pl.ds(r_pad, 1), :, lo:hi]          # (1, Wp, hi-lo) bf16
        return r.astype(jnp.float32).reshape(Wp, hi - lo)

    def row_body(ri, carry):
        psum, psumsq = carry
        r = row0 + ri                                      # top padded row of this window band

        qrow = load_row(r + pad, 0, C)                     # (Wp, C) query (interior row)
        q = qrow[pad:pad + W, :]                           # (W, C)

        # ---- pass 1: the 9 logits + their max (no exp, no rescaling) ----
        logits = []
        for kh in range(ksz):
            krow = load_row(r + kh, C, 2 * C)              # (Wp, C) key row, loaded once per kh
            for kw in range(ksz):
                t = kh * ksz + kw
                logits.append(q * (krow[kw:kw + W, :] + rel_rows[t]))
        m = logits[0]
        for t in range(1, ntap):
            m = jnp.maximum(m, logits[t])

        # ---- pass 2: exp / sum / weighted-value accumulation (9 EUP exps) ----
        s = jnp.zeros((W, C), jnp.float32)
        acc = jnp.zeros((W, C), jnp.float32)
        for kh in range(ksz):
            vrow = load_row(r + kh, 2 * C, 3 * C)          # (Wp, C) value row, loaded once per kh
            for kw in range(ksz):
                t = kh * ksz + kw
                p = jnp.exp(logits[t] - m)
                s = s + p
                acc = acc + p * vrow[kw:kw + W, :]

        o = acc / s                                        # exact softmax normalization
        out_ref[0, pl.ds(ri, 1), :, :] = o.reshape(1, W, C).astype(out_ref.dtype)

        psum = psum + jnp.sum(o, axis=0, keepdims=True)
        psumsq = psumsq + jnp.sum(o * o, axis=0, keepdims=True)
        return psum, psumsq

    zero = jnp.zeros((1, C), jnp.float32)
    psum, psumsq = lax.fori_loop(0, TH, row_body, (zero, zero))

    zpad = jnp.zeros((psum_ref.shape[2] - 1, C), jnp.float32)
    psum_ref[...] = jnp.concatenate([psum, zpad], axis=0).reshape(psum_ref.shape)
    psumsq_ref[...] = jnp.concatenate([psumsq, zpad], axis=0).reshape(psumsq_ref.shape)


def sa_attention(qkv4, rel9, H, W, C, ksz):
    B, Hp, Wp, C3 = qkv4.shape
    TH = _choose_th(H)
    nH = H // TH
    kernel = functools.partial(_sa_attn_kernel, ksz=ksz)
    n_exp = B * H * W * C * ksz * ksz
    cost = pl.CostEstimate(
        flops=10 * n_exp,
        transcendentals=n_exp,
        bytes_accessed=B * Hp * Wp * C3 * qkv4.dtype.itemsize
        + B * H * W * C * 4 + 2 * B * nH * 8 * C * 4,
    )
    out, psum, psumsq = pl.pallas_call(
        kernel,
        out_shape=(
            jax.ShapeDtypeStruct((B, H, W, C), jnp.float32),
            jax.ShapeDtypeStruct((B, nH, 8, C), jnp.float32),
            jax.ShapeDtypeStruct((B, nH, 8, C), jnp.float32),
        ),
        grid=(B, nH),
        in_specs=[
            # full padded image per step; block index constant across h -> fetched once per image
            pl.BlockSpec((1, Hp, Wp, C3), lambda b, h: (b, 0, 0, 0)),
            pl.BlockSpec((ksz * ksz, C), lambda b, h: (0, 0)),
        ],
        out_specs=(
            pl.BlockSpec((1, TH, W, C), lambda b, h: (b, h, 0, 0)),
            pl.BlockSpec((1, 1, 8, C), lambda b, h: (b, h, 0, 0)),
            pl.BlockSpec((1, 1, 8, C), lambda b, h: (b, h, 0, 0)),
        ),
        compiler_params=pltpu.CompilerParams(
            # batch axis parallel (megacore split), h arbitrary -> same core revisits
            # the resident qkv block without re-DMA.
            dimension_semantics=("parallel", "arbitrary"),
            vmem_limit_bytes=VMEM_LIMIT,
        ),
        cost_estimate=cost,
    )(qkv4, rel9)
    return out, psum, psumsq


# ----------------------------------------------------------------------------
# BatchNorm-apply + residual + ReLU (M-tiled, lane-dense, parallel)
# ----------------------------------------------------------------------------
def _bn_apply_kernel(a_ref, r_ref, sc_ref, sh_ref, o_ref):
    o_ref[...] = jnp.maximum(a_ref[...] * sc_ref[...] + sh_ref[...] + r_ref[...], 0.0)


def bn_residual_relu(a, res, scale, shift):
    """a, res: (M, C) f32; scale, shift: (1, C) f32 -> relu(a*scale + shift + res)."""
    M, C = a.shape
    TM = max(8, min(512, _round_up((M + 1) // 2, 8)))
    grid = (pl.cdiv(M, TM),)
    cost = pl.CostEstimate(
        flops=4 * M * C,
        transcendentals=0,
        bytes_accessed=3 * M * C * 4 + 2 * C * 4,
    )
    return pl.pallas_call(
        _bn_apply_kernel,
        out_shape=jax.ShapeDtypeStruct((M, C), jnp.float32),
        grid=grid,
        in_specs=[
            pl.BlockSpec((TM, C), lambda i: (i, 0)),
            pl.BlockSpec((TM, C), lambda i: (i, 0)),
            pl.BlockSpec((1, C), lambda i: (0, 0)),
            pl.BlockSpec((1, C), lambda i: (0, 0)),
        ],
        out_specs=pl.BlockSpec((TM, C), lambda i: (i, 0)),
        compiler_params=pltpu.CompilerParams(
            dimension_semantics=("parallel",),
            vmem_limit_bytes=VMEM_LIMIT,
        ),
        cost_estimate=cost,
    )(a, res, scale, shift)


# ----------------------------------------------------------------------------
# SA sub-block / SABlock forwards
# ----------------------------------------------------------------------------
def sa_sub_forward(x4, p, ksz):
    """x4: (B, H, W, C) f32 NHWC -> (B, H, W, C) f32."""
    B, H, W, C = x4.shape
    pad = ksz // 2
    Hp, Wp = H + 2 * pad, W + 2 * pad
    M = B * H * W

    # spatial zero-padding (reference pads x before key/value conv), then ONE
    # fused q/k/v 1x1-conv matmul over the padded activation; bf16 qkv output.
    xp = jnp.pad(x4, ((0, 0), (pad, pad), (pad, pad), (0, 0)))
    qkv = matmul_bias(xp.reshape(B * Hp * Wp, C), p['w_qkv'], p['b_qkv'])
    qkv4 = qkv.reshape(B, Hp, Wp, 3 * C)

    # windowed attention + partial BatchNorm statistics in one kernel
    attn, psum, psumsq = sa_attention(qkv4, p['rel9'], H=H, W=W, C=C, ksz=ksz)

    # finalize training-mode BatchNorm2d statistics (tiny reduction over <= B*nH rows)
    tot = jnp.sum(psum[:, :, 0, :], axis=(0, 1))
    totsq = jnp.sum(psumsq[:, :, 0, :], axis=(0, 1))
    mean = tot / M
    var = jnp.maximum(totsq / M - mean * mean, 0.0)       # biased variance
    inv = lax.rsqrt(var + 1e-5)
    scale = (p['gamma'] * inv).reshape(1, C)
    shift = (p['beta'] - mean * p['gamma'] * inv).reshape(1, C)

    out = bn_residual_relu(attn.reshape(M, C), x4.reshape(M, C), scale, shift)
    return out.reshape(B, H, W, C)


@functools.partial(jax.jit, static_argnames=("kernel_size",))
def sablock_forward(params, x_nchw, kernel_size=3):
    x = jnp.transpose(x_nchw, (0, 2, 3, 1))               # NCHW -> NHWC (channels on lanes)
    for p in params:
        x = sa_sub_forward(x, p, kernel_size)
    return jnp.transpose(x, (0, 3, 1, 2))                 # back to NCHW


# ----------------------------------------------------------------------------
# Deterministic parameter initialization (shapes mirror the PyTorch __init__)
# ----------------------------------------------------------------------------
def init_params(key, channels, num_sub_blocks, kernel_size=3):
    C = channels
    ksz = kernel_size
    bound = float(C) ** -0.5
    params = []
    for sk in jax.random.split(key, num_sub_blocks):
        kq, kk, kv, kbq, kbk, kbv, krh, krw = jax.random.split(sk, 8)

        def conv_w(k):  # torch layout (C_out, C_in, 1, 1)
            return jax.random.uniform(k, (C, C, 1, 1), jnp.float32, -bound, bound)

        def conv_b(k):
            return jax.random.uniform(k, (C,), jnp.float32, -bound, bound)

        wq, wk_, wv = conv_w(kq), conv_w(kk), conv_w(kv)
        bq, bk_, bv = conv_b(kbq), conv_b(kbk), conv_b(kbv)
        rel_h = jax.random.normal(krh, (C // 2, 1, 1, ksz, ksz), jnp.float32)
        rel_w = jax.random.normal(krw, (C // 2, 1, 1, ksz, ksz), jnp.float32)

        # kernel-ready layouts:
        #   1x1 conv y = x @ W.T + b  ->  fused (C, 3C) weight, bf16 for the MXU
        w_qkv = jnp.concatenate(
            [wq.reshape(C, C).T, wk_.reshape(C, C).T, wv.reshape(C, C).T], axis=1)
        b_qkv = jnp.concatenate([bq, bk_, bv]).reshape(1, 3 * C)
        #   rel = cat(rel_h, rel_w) : (C,1,1,3,3) -> (9, C) with tap index kh*3+kw
        rel = jnp.concatenate([rel_h, rel_w], axis=0)[:, 0, 0, :, :]   # (C, 3, 3)
        rel9 = rel.reshape(C, ksz * ksz).T                              # (9, C)

        params.append({
            'w_qkv': w_qkv.astype(jnp.bfloat16),
            'b_qkv': b_qkv,
            'rel9': rel9,
            'gamma': jnp.ones((C,), jnp.float32),
            'beta': jnp.zeros((C,), jnp.float32),
        })
    return params


if __name__ == "__main__":
    key = jax.random.PRNGKey(0)
    B, C, H, W = 2, 128, 16, 16          # small, lane-dense shapes (C % 128 == 0)
    num_sub_blocks, kernel_size = 2, 3
    pkey, xkey = jax.random.split(key)
    params = init_params(pkey, C, num_sub_blocks, kernel_size)
    x = jax.random.normal(xkey, (B, C, H, W), dtype=jnp.float32)
    out = sablock_forward(params, x, kernel_size=kernel_size)
    out = jax.block_until_ready(out)
    assert out.shape == (B, C, H, W), out.shape
    assert bool(jnp.all(jnp.isfinite(out)))
    print("KERNEL_OK")
</pallas_src>

<mosaic_0001>
module attributes {stable_mosaic.version = 11 : i64} {
  func.func @_matmul_bias_kernel(%arg0: i32, %arg1: memref<256x128xf32, #tpu.memory_space<vmem>>, %arg2: memref<128x384xbf16, #tpu.memory_space<vmem>>, %arg3: memref<1x384xf32, #tpu.memory_space<vmem>>, %arg4: memref<256x384xbf16, #tpu.memory_space<vmem>>) attributes {dimension_semantics = [#tpu.dimension_semantics<parallel>], iteration_bounds = array<i64: 3>, scalar_prefetch = 0 : i64, scratch_operands = 0 : i64, tpu.core_type = #tpu.core_type<tc>, window_params = [{transform_indices = @transform_0, window_bounds = array<i64: 256, 128>}, {pipeline_mode = #tpu.pipeline_mode<synchronous>, transform_indices = @transform_1, window_bounds = array<i64: 128, 384>}, {pipeline_mode = #tpu.pipeline_mode<synchronous>, transform_indices = @transform_2, window_bounds = array<i64: 1, 384>}, {transform_indices = @transform_3, window_bounds = array<i64: 256, 384>}]} {
    %c0 = arith.constant 0 : index
    %c0_0 = arith.constant 0 : index
    %0 = vector.load %arg1[%c0, %c0_0] : memref<256x128xf32, #tpu.memory_space<vmem>>, vector<256x128xf32>
    %1 = arith.truncf %0 : vector<256x128xf32> to vector<256x128xbf16>
    %c0_1 = arith.constant 0 : index
    %c0_2 = arith.constant 0 : index
    %2 = vector.load %arg2[%c0_1, %c0_2] : memref<128x384xbf16, #tpu.memory_space<vmem>>, vector<128x384xbf16>
    %cst = arith.constant dense<0.000000e+00> : vector<256x384xf32>
    %3 = tpu.matmul %1, %2, %cst {dimension_numbers = #tpu.dot_dimension_numbers<[1], [0], [0], [1], [0, 0, 1, 1], [], []>} : vector<256x128xbf16>, vector<128x384xbf16>, vector<256x384xf32> -> vector<256x384xf32>
    %c0_3 = arith.constant 0 : index
    %c0_4 = arith.constant 0 : index
    %4 = vector.load %arg3[%c0_3, %c0_4] : memref<1x384xf32, #tpu.memory_space<vmem>>, vector<1x384xf32>
    %5 = vector.broadcast %4 : vector<1x384xf32> to vector<256x384xf32>
    %6 = arith.addf %3, %5 : vector<256x384xf32>
    %7 = arith.truncf %6 : vector<256x384xf32> to vector<256x384xbf16>
    %c0_5 = arith.constant 0 : index
    %c0_6 = arith.constant 0 : index
    %8 = vector.load %arg4[%c0_5, %c0_6] : memref<256x384xbf16, #tpu.memory_space<vmem>>, vector<256x384xbf16>
    tpu.vector_store %arg4[%c0_5, %c0_6], %7 {strides = array<i32>} : memref<256x384xbf16, #tpu.memory_space<vmem>>, vector<256x384xbf16>,
    return
  }
  func.func @transform_0(%arg0: i32) -> (i32, i32) {
    %c0_i32 = arith.constant 0 : i32
    %c0_i32_0 = arith.constant 0 : i32
    return %arg0, %c0_i32 : i32, i32
  }
  func.func @transform_1(%arg0: i32) -> (i32, i32) {
    %c0_i32 = arith.constant 0 : i32
    %c0_i32_0 = arith.constant 0 : i32
    %c0_i32_1 = arith.constant 0 : i32
    return %c0_i32, %c0_i32_0 : i32, i32
  }
  func.func @transform_2(%arg0: i32) -> (i32, i32) {
    %c0_i32 = arith.constant 0 : i32
    %c0_i32_0 = arith.constant 0 : i32
    %c0_i32_1 = arith.constant 0 : i32
    return %c0_i32, %c0_i32_0 : i32, i32
  }
  func.func @transform_3(%arg0: i32) -> (i32, i32) {
    %c0_i32 = arith.constant 0 : i32
    %c0_i32_0 = arith.constant 0 : i32
    return %arg0, %c0_i32 : i32, i32
  }
}

module attributes {stable_mosaic.version = 11 : i64} {
  func.func @_bn_apply_kernel(%arg0: i32, %arg1: memref<256x128xf32, #tpu.memory_space<vmem>>, %arg2: memref<256x128xf32, #tpu.memory_space<vmem>>, %arg3: memref<1x128xf32, #tpu.memory_space<vmem>>, %arg4: memref<1x128xf32, #tpu.memory_space<vmem>>, %arg5: memref<256x128xf32, #tpu.memory_space<vmem>>) attributes {dimension_semantics = [#tpu.dimension_semantics<parallel>], iteration_bounds = array<i64: 2>, scalar_prefetch = 0 : i64, scratch_operands = 0 : i64, tpu.core_type = #tpu.core_type<tc>, window_params = [{transform_indices = @transform_0, window_bounds = array<i64: 256, 128>}, {transform_indices = @transform_1, window_bounds = array<i64: 256, 128>}, {pipeline_mode = #tpu.pipeline_mode<synchronous>, transform_indices = @transform_2, window_bounds = array<i64: 1, 128>}, {pipeline_mode = #tpu.pipeline_mode<synchronous>, transform_indices = @transform_3, window_bounds = array<i64: 1, 128>}, {transform_indices = @transform_4, window_bounds = array<i64: 256, 128>}]} {
    %c0 = arith.constant 0 : index
    %c0_0 = arith.constant 0 : index
    %0 = vector.load %arg1[%c0, %c0_0] : memref<256x128xf32, #tpu.memory_space<vmem>>, vector<256x128xf32>
    %c0_1 = arith.constant 0 : index
    %c0_2 = arith.constant 0 : index
    %1 = vector.load %arg3[%c0_1, %c0_2] : memref<1x128xf32, #tpu.memory_space<vmem>>, vector<1x128xf32>
    %2 = vector.broadcast %1 : vector<1x128xf32> to vector<256x128xf32>
    %3 = arith.mulf %0, %2 : vector<256x128xf32>
    %c0_3 = arith.constant 0 : index
    %c0_4 = arith.constant 0 : index
    %4 = vector.load %arg4[%c0_3, %c0_4] : memref<1x128xf32, #tpu.memory_space<vmem>>, vector<1x128xf32>
    %5 = vector.broadcast %4 : vector<1x128xf32> to vector<256x128xf32>
    %6 = arith.addf %3, %5 : vector<256x128xf32>
    %c0_5 = arith.constant 0 : index
    %c0_6 = arith.constant 0 : index
    %7 = vector.load %arg2[%c0_5, %c0_6] : memref<256x128xf32, #tpu.memory_space<vmem>>, vector<256x128xf32>
    %8 = arith.addf %6, %7 : vector<256x128xf32>
    %cst = arith.constant 0.000000e+00 : f32
    %9 = vector.broadcast %cst : f32 to vector<256x128xf32>
    %10 = arith.maximumf %8, %9 : vector<256x128xf32>
    %c0_7 = arith.constant 0 : index
    %c0_8 = arith.constant 0 : index
    %11 = vector.load %arg5[%c0_7, %c0_8] : memref<256x128xf32, #tpu.memory_space<vmem>>, vector<256x128xf32>
    tpu.vector_store %arg5[%c0_7, %c0_8], %10 {strides = array<i32>} : memref<256x128xf32, #tpu.memory_space<vmem>>, vector<256x128xf32>,
    return
  }
  func.func @transform_0(%arg0: i32) -> (i32, i32) {
    %c0_i32 = arith.constant 0 : i32
    %c0_i32_0 = arith.constant 0 : i32
    return %arg0, %c0_i32 : i32, i32
  }
  func.func @transform_1(%arg0: i32) -> (i32, i32) {
    %c0_i32 = arith.constant 0 : i32
    %c0_i32_0 = arith.constant 0 : i32
    return %arg0, %c0_i32 : i32, i32
  }
  func.func @transform_2(%arg0: i32) -> (i32, i32) {
    %c0_i32 = arith.constant 0 : i32
    %c0_i32_0 = arith.constant 0 : i32
    %c0_i32_1 = arith.constant 0 : i32
    return %c0_i32, %c0_i32_0 : i32, i32
  }
  func.func @transform_3(%arg0: i32) -> (i32, i32) {
    %c0_i32 = arith.constant 0 : i32
    %c0_i32_0 = arith.constant 0 : i32
    %c0_i32_1 = arith.constant 0 : i32
    return %c0_i32, %c0_i32_0 : i32, i32
  }
  func.func @transform_4(%arg0: i32) -> (i32, i32) {
    %c0_i32 = arith.constant 0 : i32
    %c0_i32_0 = arith.constant 0 : i32
    return %arg0, %c0_i32 : i32, i32
  }
}

module attributes {stable_mosaic.version = 11 : i64} {
  func.func @_sa_attn_kernel(%arg0: i32, %arg1: i32, %arg2: memref<1x18x18x384xbf16, #tpu.memory_space<vmem>>, %arg3: memref<9x128xf32, #tpu.memory_space<vmem>>, %arg4: memref<1x8x16x128xf32, #tpu.memory_space<vmem>>, %arg5: memref<1x1x8x128xf32, #tpu.memory_space<vmem>>, %arg6: memref<1x1x8x128xf32, #tpu.memory_space<vmem>>) attributes {dimension_semantics = [#tpu.dimension_semantics<parallel>, #tpu.dimension_semantics<arbitrary>], iteration_bounds = array<i64: 2, 2>, scalar_prefetch = 0 : i64, scratch_operands = 0 : i64, tpu.core_type = #tpu.core_type<tc>, window_params = [{transform_indices = @transform_0, window_bounds = array<i64: 1, 18, 18, 384>}, {pipeline_mode = #tpu.pipeline_mode<synchronous>, transform_indices = @transform_1, window_bounds = array<i64: 9, 128>}, {transform_indices = @transform_2, window_bounds = array<i64: 1, 8, 16, 128>}, {transform_indices = @transform_3, window_bounds = array<i64: 1, 1, 8, 128>}, {transform_indices = @transform_4, window_bounds = array<i64: 1, 1, 8, 128>}]} {
    %c8_i32 = arith.constant 8 : i32
    %0 = arith.muli %arg1, %c8_i32 : i32
    %c0 = arith.constant 0 : index
    %c0_0 = arith.constant 0 : index
    %1 = vector.load %arg3[%c0, %c0_0] : memref<9x128xf32, #tpu.memory_space<vmem>>, vector<9x128xf32>
    %2 = vector.extract_strided_slice %1 {offsets = [0, 0], sizes = [1, 128], strides = [1, 1]} : vector<9x128xf32> to vector<1x128xf32>
    %3 = vector.extract_strided_slice %1 {offsets = [1, 0], sizes = [1, 128], strides = [1, 1]} : vector<9x128xf32> to vector<1x128xf32>
    %4 = vector.extract_strided_slice %1 {offsets = [2, 0], sizes = [1, 128], strides = [1, 1]} : vector<9x128xf32> to vector<1x128xf32>
    %5 = vector.extract_strided_slice %1 {offsets = [3, 0], sizes = [1, 128], strides = [1, 1]} : vector<9x128xf32> to vector<1x128xf32>
    %6 = vector.extract_strided_slice %1 {offsets = [4, 0], sizes = [1, 128], strides = [1, 1]} : vector<9x128xf32> to vector<1x128xf32>
    %7 = vector.extract_strided_slice %1 {offsets = [5, 0], sizes = [1, 128], strides = [1, 1]} : vector<9x128xf32> to vector<1x128xf32>
    %8 = vector.extract_strided_slice %1 {offsets = [6, 0], sizes = [1, 128], strides = [1, 1]} : vector<9x128xf32> to vector<1x128xf32>
    %9 = vector.extract_strided_slice %1 {offsets = [7, 0], sizes = [1, 128], strides = [1, 1]} : vector<9x128xf32> to vector<1x128xf32>
    %10 = vector.extract_strided_slice %1 {offsets = [8, 0], sizes = [1, 128], strides = [1, 1]} : vector<9x128xf32> to vector<1x128xf32>
    %cst = arith.constant 0.000000e+00 : f32
    %11 = vector.broadcast %cst : f32 to vector<1x128xf32>
    %c0_i32 = arith.constant 0 : i32
    %c8_i32_1 = arith.constant 8 : i32
    %12 = arith.addi %c0_i32, %c8_i32_1 : i32
    %c1_i32 = arith.constant 1 : i32
    %13:2 = scf.for %arg7 = %c0_i32 to %12 step %c1_i32 iter_args(%arg8 = %11, %arg9 = %11) -> (vector<1x128xf32>, vector<1x128xf32>)  : i32 {
      %21 = arith.addi %0, %arg7 : i32
      %c1_i32_12 = arith.constant 1 : i32
      %22 = arith.addi %21, %c1_i32_12 : i32
      %c0_13 = arith.constant 0 : index
      %23 = arith.index_cast %22 : i32 to index
      %c0_14 = arith.constant 0 : index
      %c0_15 = arith.constant 0 : index
      %24 = vector.load %arg2[%c0_13, %23, %c0_14, %c0_15] : memref<1x18x18x384xbf16, #tpu.memory_space<vmem>>, vector<1x1x18x128xbf16>
      %25 = vector.shape_cast %24 : vector<1x1x18x128xbf16> to vector<1x18x128xbf16>
      %26 = arith.extf %25 : vector<1x18x128xbf16> to vector<1x18x128xf32>
      %27 = vector.shape_cast %26 : vector<1x18x128xf32> to vector<18x128xf32>
      %28 = vector.extract_strided_slice %27 {offsets = [1, 0], sizes = [16, 128], strides = [1, 1]} : vector<18x128xf32> to vector<16x128xf32>
      %c0_i32_16 = arith.constant 0 : i32
      %29 = arith.addi %21, %c0_i32_16 : i32
      %c0_17 = arith.constant 0 : index
      %30 = arith.index_cast %29 : i32 to index
      %c0_18 = arith.constant 0 : index
      %c128 = arith.constant 128 : index
      %31 = vector.load %arg2[%c0_17, %30, %c0_18, %c128] : memref<1x18x18x384xbf16, #tpu.memory_space<vmem>>, vector<1x1x18x128xbf16>
      %32 = vector.shape_cast %31 : vector<1x1x18x128xbf16> to vector<1x18x128xbf16>
      %33 = arith.extf %32 : vector<1x18x128xbf16> to vector<1x18x128xf32>
      %34 = vector.shape_cast %33 : vector<1x18x128xf32> to vector<18x128xf32>
      %35 = vector.extract_strided_slice %34 {offsets = [0, 0], sizes = [16, 128], strides = [1, 1]} : vector<18x128xf32> to vector<16x128xf32>
      %36 = vector.broadcast %2 : vector<1x128xf32> to vector<16x128xf32>
      %37 = arith.addf %35, %36 : vector<16x128xf32>
      %38 = arith.mulf %28, %37 : vector<16x128xf32>
      %39 = vector.extract_strided_slice %34 {offsets = [1, 0], sizes = [16, 128], strides = [1, 1]} : vector<18x128xf32> to vector<16x128xf32>
      %40 = vector.broadcast %3 : vector<1x128xf32> to vector<16x128xf32>
      %41 = arith.addf %39, %40 : vector<16x128xf32>
      %42 = arith.mulf %28, %41 : vector<16x128xf32>
      %43 = vector.extract_strided_slice %34 {offsets = [2, 0], sizes = [16, 128], strides = [1, 1]} : vector<18x128xf32> to vector<16x128xf32>
      %44 = vector.broadcast %4 : vector<1x128xf32> to vector<16x128xf32>
      %45 = arith.addf %43, %44 : vector<16x128xf32>
      %46 = arith.mulf %28, %45 : vector<16x128xf32>
      %c1_i32_19 = arith.constant 1 : i32
      %47 = arith.addi %21, %c1_i32_19 : i32
      %c0_20 = arith.constant 0 : index
      %48 = arith.index_cast %47 : i32 to index
      %c0_21 = arith.constant 0 : index
      %c128_22 = arith.constant 128 : index
      %49 = vector.load %arg2[%c0_20, %48, %c0_21, %c128_22] : memref<1x18x18x384xbf16, #tpu.memory_space<vmem>>, vector<1x1x18x128xbf16>
      %50 = vector.shape_cast %49 : vector<1x1x18x128xbf16> to vector<1x18x128xbf16>
      %51 = arith.extf %50 : vector<1x18x128xbf16> to vector<1x18x128xf32>
      %52 = vector.shape_cast %51 : vector<1x18x128xf32> to vector<18x128xf32>
      %53 = vector.extract_strided_slice %52 {offsets = [0, 0], sizes = [16, 128], strides = [1, 1]} : vector<18x128xf32> to vector<16x128xf32>
      %54 = vector.broadcast %5 : vector<1x128xf32> to vector<16x128xf32>
      %55 = arith.addf %53, %54 : vector<16x128xf32>
      %56 = arith.mulf %28, %55 : vector<16x128xf32>
      %57 = vector.extract_strided_slice %52 {offsets = [1, 0], sizes = [16, 128], strides = [1, 1]} : vector<18x128xf32> to vector<16x128xf32>
      %58 = vector.broadcast %6 : vector<1x128xf32> to vector<16x128xf32>
      %59 = arith.addf %57, %58 : vector<16x128xf32>
      %60 = arith.mulf %28, %59 : vector<16x128xf32>
      %61 = vector.extract_strided_slice %52 {offsets = [2, 0], sizes = [16, 128], strides = [1, 1]} : vector<18x128xf32> to vector<16x128xf32>
      %62 = vector.broadcast %7 : vector<1x128xf32> to vector<16x128xf32>
      %63 = arith.addf %61, %62 : vector<16x128xf32>
      %64 = arith.mulf %28, %63 : vector<16x128xf32>
      %c2_i32 = arith.constant 2 : i32
      %65 = arith.addi %21, %c2_i32 : i32
      %c0_23 = arith.constant 0 : index
      %66 = arith.index_cast %65 : i32 to index
      %c0_24 = arith.constant 0 : index
      %c128_25 = arith.constant 128 : index
      %67 = vector.load %arg2[%c0_23, %66, %c0_24, %c128_25] : memref<1x18x18x384xbf16, #tpu.memory_space<vmem>>, vector<1x1x18x128xbf16>
      %68 = vector.shape_cast %67 : vector<1x1x18x128xbf16> to vector<1x18x128xbf16>
      %69 = arith.extf %68 : vector<1x18x128xbf16> to vector<1x18x128xf32>
      %70 = vector.shape_cast %69 : vector<1x18x128xf32> to vector<18x128xf32>
      %71 = vector.extract_strided_slice %70 {offsets = [0, 0], sizes = [16, 128], strides = [1, 1]} : vector<18x128xf32> to vector<16x128xf32>
      %72 = vector.broadcast %8 : vector<1x128xf32> to vector<16x128xf32>
      %73 = arith.addf %71, %72 : vector<16x128xf32>
      %74 = arith.mulf %28, %73 : vector<16x128xf32>
      %75 = vector.extract_strided_slice %70 {offsets = [1, 0], sizes = [16, 128], strides = [1, 1]} : vector<18x128xf32> to vector<16x128xf32>
      %76 = vector.broadcast %9 : vector<1x128xf32> to vector<16x128xf32>
      %77 = arith.addf %75, %76 : vector<16x128xf32>
      %78 = arith.mulf %28, %77 : vector<16x128xf32>
      %79 = vector.extract_strided_slice %70 {offsets = [2, 0], sizes = [16, 128], strides = [1, 1]} : vector<18x128xf32> to vector<16x128xf32>
      %80 = vector.broadcast %10 : vector<1x128xf32> to vector<16x128xf32>
      %81 = arith.addf %79, %80 : vector<16x128xf32>
      %82 = arith.mulf %28, %81 : vector<16x128xf32>
      %83 = arith.maximumf %38, %42 : vector<16x128xf32>
      %84 = arith.maximumf %83, %46 : vector<16x128xf32>
      %85 = arith.maximumf %84, %56 : vector<16x128xf32>
      %86 = arith.maximumf %85, %60 : vector<16x128xf32>
      %87 = arith.maximumf %86, %64 : vector<16x128xf32>
      %88 = arith.maximumf %87, %74 : vector<16x128xf32>
      %89 = arith.maximumf %88, %78 : vector<16x128xf32>
      %90 = arith.maximumf %89, %82 : vector<16x128xf32>
      %cst_26 = arith.constant 0.000000e+00 : f32
      %91 = vector.broadcast %cst_26 : f32 to vector<16x128xf32>
      %cst_27 = arith.constant 0.000000e+00 : f32
      %92 = vector.broadcast %cst_27 : f32 to vector<16x128xf32>
      %c0_i32_28 = arith.constant 0 : i32
      %93 = arith.addi %21, %c0_i32_28 : i32
      %c0_29 = arith.constant 0 : index
      %94 = arith.index_cast %93 : i32 to index
      %c0_30 = arith.constant 0 : index
      %c256 = arith.constant 256 : index
      %95 = vector.load %arg2[%c0_29, %94, %c0_30, %c256] : memref<1x18x18x384xbf16, #tpu.memory_space<vmem>>, vector<1x1x18x128xbf16>
      %96 = vector.shape_cast %95 : vector<1x1x18x128xbf16> to vector<1x18x128xbf16>
      %97 = arith.extf %96 : vector<1x18x128xbf16> to vector<1x18x128xf32>
      %98 = vector.shape_cast %97 : vector<1x18x128xf32> to vector<18x128xf32>
      %99 = arith.subf %38, %90 : vector<16x128xf32>
      %100 = math.exp %99 : vector<16x128xf32>
      %101 = arith.addf %91, %100 : vector<16x128xf32>
      %102 = vector.extract_strided_slice %98 {offsets = [0, 0], sizes = [16, 128], strides = [1, 1]} : vector<18x128xf32> to vector<16x128xf32>
      %103 = arith.mulf %100, %102 : vector<16x128xf32>
      %104 = arith.addf %92, %103 : vector<16x128xf32>
      %105 = arith.subf %42, %90 : vector<16x128xf32>
      %106 = math.exp %105 : vector<16x128xf32>
      %107 = arith.addf %101, %106 : vector<16x128xf32>
      %108 = vector.extract_strided_slice %98 {offsets = [1, 0], sizes = [16, 128], strides = [1, 1]} : vector<18x128xf32> to vector<16x128xf32>
      %109 = arith.mulf %106, %108 : vector<16x128xf32>
      %110 = arith.addf %104, %109 : vector<16x128xf32>
      %111 = arith.subf %46, %90 : vector<16x128xf32>
      %112 = math.exp %111 : vector<16x128xf32>
      %113 = arith.addf %107, %112 : vector<16x128xf32>
      %114 = vector.extract_strided_slice %98 {offsets = [2, 0], sizes = [16, 128], strides = [1, 1]} : vector<18x128xf32> to vector<16x128xf32>
      %115 = arith.mulf %112, %114 : vector<16x128xf32>
      %116 = arith.addf %110, %115 : vector<16x128xf32>
      %c1_i32_31 = arith.constant 1 : i32
      %117 = arith.addi %21, %c1_i32_31 : i32
      %c0_32 = arith.constant 0 : index
      %118 = arith.index_cast %117 : i32 to index
      %c0_33 = arith.constant 0 : index
      %c256_34 = arith.constant 256 : index
      %119 = vector.load %arg2[%c0_32, %118, %c0_33, %c256_34] : memref<1x18x18x384xbf16, #tpu.memory_space<vmem>>, vector<1x1x18x128xbf16>
      %120 = vector.shape_cast %119 : vector<1x1x18x128xbf16> to vector<1x18x128xbf16>
      %121 = arith.extf %120 : vector<1x18x128xbf16> to vector<1x18x128xf32>
      %122 = vector.shape_cast %121 : vector<1x18x128xf32> to vector<18x128xf32>
      %123 = arith.subf %56, %90 : vector<16x128xf32>
      %124 = math.exp %123 : vector<16x128xf32>
      %125 = arith.addf %113, %124 : vector<16x128xf32>
      %126 = vector.extract_strided_slice %122 {offsets = [0, 0], sizes = [16, 128], strides = [1, 1]} : vector<18x128xf32> to vector<16x128xf32>
      %127 = arith.mulf %124, %126 : vector<16x128xf32>
      %128 = arith.addf %116, %127 : vector<16x128xf32>
      %129 = arith.subf %60, %90 : vector<16x128xf32>
      %130 = math.exp %129 : vector<16x128xf32>
      %131 = arith.addf %125, %130 : vector<16x128xf32>
      %132 = vector.extract_strided_slice %122 {offsets = [1, 0], sizes = [16, 128], strides = [1, 1]} : vector<18x128xf32> to vector<16x128xf32>
      %133 = arith.mulf %130, %132 : vector<16x128xf32>
      %134 = arith.addf %128, %133 : vector<16x128xf32>
      %135 = arith.subf %64, %90 : vector<16x128xf32>
      %136 = math.exp %135 : vector<16x128xf32>
      %137 = arith.addf %131, %136 : vector<16x128xf32>
      %138 = vector.extract_strided_slice %122 {offsets = [2, 0], sizes = [16, 128], strides = [1, 1]} : vector<18x128xf32> to vector<16x128xf32>
      %139 = arith.mulf %136, %138 : vector<16x128xf32>
      %140 = arith.addf %134, %139 : vector<16x128xf32>
      %c2_i32_35 = arith.constant 2 : i32
      %141 = arith.addi %21, %c2_i32_35 : i32
      %c0_36 = arith.constant 0 : index
      %142 = arith.index_cast %141 : i32 to index
      %c0_37 = arith.constant 0 : index
      %c256_38 = arith.constant 256 : index
      %143 = vector.load %arg2[%c0_36, %142, %c0_37, %c256_38] : memref<1x18x18x384xbf16, #tpu.memory_space<vmem>>, vector<1x1x18x128xbf16>
      %144 = vector.shape_cast %143 : vector<1x1x18x128xbf16> to vector<1x18x128xbf16>
      %145 = arith.extf %144 : vector<1x18x128xbf16> to vector<1x18x128xf32>
      %146 = vector.shape_cast %145 : vector<1x18x128xf32> to vector<18x128xf32>
      %147 = arith.subf %74, %90 : vector<16x128xf32>
      %148 = math.exp %147 : vector<16x128xf32>
      %149 = arith.addf %137, %148 : vector<16x128xf32>
      %150 = vector.extract_strided_slice %146 {offsets = [0, 0], sizes = [16, 128], strides = [1, 1]} : vector<18x128xf32> to vector<16x128xf32>
      %151 = arith.mulf %148, %150 : vector<16x128xf32>
      %152 = arith.addf %140, %151 : vector<16x128xf32>
      %153 = arith.subf %78, %90 : vector<16x128xf32>
      %154 = math.exp %153 : vector<16x128xf32>
      %155 = arith.addf %149, %154 : vector<16x128xf32>
      %156 = vector.extract_strided_slice %146 {offsets = [1, 0], sizes = [16, 128], strides = [1, 1]} : vector<18x128xf32> to vector<16x128xf32>
      %157 = arith.mulf %154, %156 : vector<16x128xf32>
      %158 = arith.addf %152, %157 : vector<16x128xf32>
      %159 = arith.subf %82, %90 : vector<16x128xf32>
      %160 = math.exp %159 : vector<16x128xf32>
      %161 = arith.addf %155, %160 : vector<16x128xf32>
      %162 = vector.extract_strided_slice %146 {offsets = [2, 0], sizes = [16, 128], strides = [1, 1]} : vector<18x128xf32> to vector<16x128xf32>
      %163 = arith.mulf %160, %162 : vector<16x128xf32>
      %164 = arith.addf %158, %163 : vector<16x128xf32>
      %165 = arith.divf %164, %161 : vector<16x128xf32>
      %166 = vector.shape_cast %165 : vector<16x128xf32> to vector<1x16x128xf32>
      %c0_39 = arith.constant 0 : index
      %167 = arith.index_cast %arg7 : i32 to index
      %c0_40 = arith.constant 0 : index
      %c0_41 = arith.constant 0 : index
      %168 = vector.load %arg4[%c0_39, %167, %c0_40, %c0_41] : memref<1x8x16x128xf32, #tpu.memory_space<vmem>>, vector<1x1x16x128xf32>
      %169 = vector.shape_cast %168 : vector<1x1x16x128xf32> to vector<1x16x128xf32>
      %170 = vector.shape_cast %166 : vector<1x16x128xf32> to vector<1x1x16x128xf32>
      tpu.vector_store %arg4[%c0_39, %167, %c0_40, %c0_41], %170 {strides = array<i32>} : memref<1x8x16x128xf32, #tpu.memory_space<vmem>>, vector<1x1x16x128xf32>,
      %cst_42 = arith.constant dense<0.000000e+00> : vector<128xf32>
      %171 = vector.multi_reduction <add>, %165, %cst_42 [0] : vector<16x128xf32> to vector<128xf32>
      %172 = vector.shape_cast %171 : vector<128xf32> to vector<1x128xf32>
      %173 = arith.addf %arg8, %172 : vector<1x128xf32>
      %174 = arith.mulf %165, %165 : vector<16x128xf32>
      %cst_43 = arith.constant dense<0.000000e+00> : vector<128xf32>
      %175 = vector.multi_reduction <add>, %174, %cst_43 [0] : vector<16x128xf32> to vector<128xf32>
      %176 = vector.shape_cast %175 : vector<128xf32> to vector<1x128xf32>
      %177 = arith.addf %arg9, %176 : vector<1x128xf32>
      scf.yield %173, %177 : vector<1x128xf32>, vector<1x128xf32>
    }
    %c8_i32_2 = arith.constant 8 : i32
    %cst_3 = arith.constant 0.000000e+00 : f32
    %14 = vector.broadcast %cst_3 : f32 to vector<7x128xf32>
    %15 = tpu.concatenate %13#0, %14 in 0 : vector<1x128xf32>, vector<7x128xf32> -> vector<8x128xf32>
    %16 = vector.shape_cast %15 : vector<8x128xf32> to vector<1x1x8x128xf32>
    %c0_4 = arith.constant 0 : index
    %c0_5 = arith.constant 0 : index
    %c0_6 = arith.constant 0 : index
    %c0_7 = arith.constant 0 : index
    %17 = vector.load %arg5[%c0_4, %c0_5, %c0_6, %c0_7] : memref<1x1x8x128xf32, #tpu.memory_space<vmem>>, vector<1x1x8x128xf32>
    tpu.vector_store %arg5[%c0_4, %c0_5, %c0_6, %c0_7], %16 {strides = array<i32>} : memref<1x1x8x128xf32, #tpu.memory_space<vmem>>, vector<1x1x8x128xf32>,
    %18 = tpu.concatenate %13#1, %14 in 0 : vector<1x128xf32>, vector<7x128xf32> -> vector<8x128xf32>
    %19 = vector.shape_cast %18 : vector<8x128xf32> to vector<1x1x8x128xf32>
    %c0_8 = arith.constant 0 : index
    %c0_9 = arith.constant 0 : index
    %c0_10 = arith.constant 0 : index
    %c0_11 = arith.constant 0 : index
    %20 = vector.load %arg6[%c0_8, %c0_9, %c0_10, %c0_11] : memref<1x1x8x128xf32, #tpu.memory_space<vmem>>, vector<1x1x8x128xf32>
    tpu.vector_store %arg6[%c0_8, %c0_9, %c0_10, %c0_11], %19 {strides = array<i32>} : memref<1x1x8x128xf32, #tpu.memory_space<vmem>>, vector<1x1x8x128xf32>,
    return
  }
  func.func @transform_0(%arg0: i32, %arg1: i32) -> (i32, i32, i32, i32) {
    %c0_i32 = arith.constant 0 : i32
    %c0_i32_0 = arith.constant 0 : i32
    %c0_i32_1 = arith.constant 0 : i32
    %c0_i32_2 = arith.constant 0 : i32
    return %arg0, %c0_i32, %c0_i32_0, %c0_i32_1 : i32, i32, i32, i32
  }
  func.func @transform_1(%arg0: i32, %arg1: i32) -> (i32, i32) {
    %c0_i32 = arith.constant 0 : i32
    %c0_i32_0 = arith.constant 0 : i32
    %c0_i32_1 = arith.constant 0 : i32
    return %c0_i32, %c0_i32_0 : i32, i32
  }
  func.func @transform_2(%arg0: i32, %arg1: i32) -> (i32, i32, i32, i32) {
    %c0_i32 = arith.constant 0 : i32
    %c0_i32_0 = arith.constant 0 : i32
    %c0_i32_1 = arith.constant 0 : i32
    return %arg0, %arg1, %c0_i32, %c0_i32_0 : i32, i32, i32, i32
  }
  func.func @transform_3(%arg0: i32, %arg1: i32) -> (i32, i32, i32, i32) {
    %c0_i32 = arith.constant 0 : i32
    %c0_i32_0 = arith.constant 0 : i32
    %c0_i32_1 = arith.constant 0 : i32
    return %arg0, %arg1, %c0_i32, %c0_i32_0 : i32, i32, i32, i32
  }
  func.func @transform_4(%arg0: i32, %arg1: i32) -> (i32, i32, i32, i32) {
    %c0_i32 = arith.constant 0 : i32
    %c0_i32_0 = arith.constant 0 : i32
    %c0_i32_1 = arith.constant 0 : i32
    return %arg0, %arg1, %c0_i32, %c0_i32_0 : i32, i32, i32, i32
  }
}

module attributes {stable_mosaic.version = 11 : i64} {
  func.func @_bn_apply_kernel(%arg0: i32, %arg1: memref<256x128xf32, #tpu.memory_space<vmem>>, %arg2: memref<256x128xf32, #tpu.memory_space<vmem>>, %arg3: memref<1x128xf32, #tpu.memory_space<vmem>>, %arg4: memref<1x128xf32, #tpu.memory_space<vmem>>, %arg5: memref<256x128xf32, #tpu.memory_space<vmem>>) attributes {dimension_semantics = [#tpu.dimension_semantics<parallel>], iteration_bounds = array<i64: 2>, scalar_prefetch = 0 : i64, scratch_operands = 0 : i64, tpu.core_type = #tpu.core_type<tc>, window_params = [{transform_indices = @transform_0, window_bounds = array<i64: 256, 128>}, {transform_indices = @transform_1, window_bounds = array<i64: 256, 128>}, {pipeline_mode = #tpu.pipeline_mode<synchronous>, transform_indices = @transform_2, window_bounds = array<i64: 1, 128>}, {pipeline_mode = #tpu.pipeline_mode<synchronous>, transform_indices = @transform_3, window_bounds = array<i64: 1, 128>}, {transform_indices = @transform_4, window_bounds = array<i64: 256, 128>}]} {
    %c0 = arith.constant 0 : index
    %c0_0 = arith.constant 0 : index
    %0 = vector.load %arg1[%c0, %c0_0] : memref<256x128xf32, #tpu.memory_space<vmem>>, vector<256x128xf32>
    %c0_1 = arith.constant 0 : index
    %c0_2 = arith.constant 0 : index
    %1 = vector.load %arg3[%c0_1, %c0_2] : memref<1x128xf32, #tpu.memory_space<vmem>>, vector<1x128xf32>
    %2 = vector.broadcast %1 : vector<1x128xf32> to vector<256x128xf32>
    %3 = arith.mulf %0, %2 : vector<256x128xf32>
    %c0_3 = arith.constant 0 : index
    %c0_4 = arith.constant 0 : index
    %4 = vector.load %arg4[%c0_3, %c0_4] : memref<1x128xf32, #tpu.memory_space<vmem>>, vector<1x128xf32>
    %5 = vector.broadcast %4 : vector<1x128xf32> to vector<256x128xf32>
    %6 = arith.addf %3, %5 : vector<256x128xf32>
    %c0_5 = arith.constant 0 : index
    %c0_6 = arith.constant 0 : index
    %7 = vector.load %arg2[%c0_5, %c0_6] : memref<256x128xf32, #tpu.memory_space<vmem>>, vector<256x128xf32>
    %8 = arith.addf %6, %7 : vector<256x128xf32>
    %cst = arith.constant 0.000000e+00 : f32
    %9 = vector.broadcast %cst : f32 to vector<256x128xf32>
    %10 = arith.maximumf %8, %9 : vector<256x128xf32>
    %c0_7 = arith.constant 0 : index
    %c0_8 = arith.constant 0 : index
    %11 = vector.load %arg5[%c0_7, %c0_8] : memref<256x128xf32, #tpu.memory_space<vmem>>, vector<256x128xf32>
    tpu.vector_store %arg5[%c0_7, %c0_8], %10 {strides = array<i32>} : memref<256x128xf32, #tpu.memory_space<vmem>>, vector<256x128xf32>,
    return
  }
  func.func @transform_0(%arg0: i32) -> (i32, i32) {
    %c0_i32 = arith.constant 0 : i32
    %c0_i32_0 = arith.constant 0 : i32
    return %arg0, %c0_i32 : i32, i32
  }
  func.func @transform_1(%arg0: i32) -> (i32, i32) {
    %c0_i32 = arith.constant 0 : i32
    %c0_i32_0 = arith.constant 0 : i32
    return %arg0, %c0_i32 : i32, i32
  }
  func.func @transform_2(%arg0: i32) -> (i32, i32) {
    %c0_i32 = arith.constant 0 : i32
    %c0_i32_0 = arith.constant 0 : i32
    %c0_i32_1 = arith.constant 0 : i32
    return %c0_i32, %c0_i32_0 : i32, i32
  }
  func.func @transform_3(%arg0: i32) -> (i32, i32) {
    %c0_i32 = arith.constant 0 : i32
    %c0_i32_0 = arith.constant 0 : i32
    %c0_i32_1 = arith.constant 0 : i32
    return %c0_i32, %c0_i32_0 : i32, i32
  }
  func.func @transform_4(%arg0: i32) -> (i32, i32) {
    %c0_i32 = arith.constant 0 : i32
    %c0_i32_0 = arith.constant 0 : i32
    return %arg0, %c0_i32 : i32, i32
  }
}

</mosaic_0001>

<bundles_post_ra>
// kernel: sablock_forward.6
= control target key start
LH: loop header
LB: loop body
LE: loop exit
PB: predicated region body
PF: predicated region fallthrough
CT: control target
= control target key end

     0   :  { %s2150_s12 = smov 0   ;;  %s2152_s13 = smov 0   ;;  %s2769_s0 = inlined_call_operand.vmem [shape: f32[648,128], index: 0, kind: input, shape index: {}]   ;;  %s2770_s1 = inlined_call_operand.vmem [shape: bf16[128,384], index: 1, kind: input, shape index: {}]   ;;  %s2771_s2 = inlined_call_operand.vmem [shape: f32[1,384], index: 2, kind: input, shape index: {}]   ;;  %s2772_s3 = inlined_call_operand.vmem [shape: bf16[648,384], index: 3, kind: output, shape index: {}]  }
   0x1   :  { %s2154_s14 = smov 0  }
   0x2 LB: > { %s2163_s15 = sadd.s32 4294967295, %s2063_s14   ;;  %s2165_s16 = sadd.s32 1, %s2063_s14   ;;  %s2063_s14 = sphi %s2154_s14, %s2782_s14   ;;  %s2059_s13 = sphi %s2152_s13, %s2781_s13   ;;  %s2055_s12 = sphi %s2150_s12, %s2780_s12  }
   0x3   : > { %s85_s17 = ssub.s32 %s2063_s14, %s2165_s16  ;;  %s88_s18 = sadd.s32 1, %s2059_s13 }
   0x4   : > { %p86_p0 = scmp.eq.s32.totalorder %s85_s17, 0  ;;  %p98_p1 = scmp.ne.s32.totalorder %s2059_s13, %s2055_s12 }
   0x5   : > { %p99_p2 = scmp.eq.s32.totalorder %s2163_s15, 2  ;;  %p1531_p3 = scmp.ge.s32.totalorder %s2063_s14, 1 }
   0x6   : > { %s2173_s19 = scalar_select %p86_p0, %s2059_s13, %s88_s18  }
   0x7   : > { %p2175_p4 = por %p99_p2, %p98_p1  ;;  %p146_p5 = scmp.lt.s32.totalorder %s2063_s14, 4 }
   0x9   : > { %p147_p6 = pnand %p1531_p3, %p146_p5 }
   0xa   : > { %v1945_v0 = vld [vmem:[%s2770_s1 + $0x4] ss:$12 sps:$4 sm:$0xff] (!%p147_p6)   ;;  %v1947_v1 = vld [vmem:[%s2770_s1] ss:$12 sps:$4 sm:$0xff] (!%p147_p6)   ;;  %v2129_v2 = vmov (!%p147_p6), 0   ;;  %s2200_s6 = sshll.u32 (!%p147_p6), %s2163_s15, 5 }
   0xb   : > { %150 = sbr.rel (%p147_p6) target bundleno = 466 (0x1d2), region = 32  ;;  %451 = vmatprep.mubr.bf16.mxu0 (!%p147_p6), %v2129_v2  ;;  %571 = vmatprep.mubr.bf16.mxu1 (!%p147_p6), %v2129_v2  ;;  %v1948_v3 = vld [vmem:[%s2770_s1 + $0x1c] ss:$12 sps:$4 sm:$0xff] (!%p147_p6)   ;;  %v1950_v4 = vld [vmem:[%s2770_s1 + $0x18] ss:$12 sps:$4 sm:$0xff] (!%p147_p6)   ;;  %p178_p7 = scmp.lt.s32.totalorder (!%p147_p6), %s2200_s6, 80 }
   0xc   : > { %419 = vmatprep.subr.bf16.mxu0 (!%p147_p6), %v1945_v0  ;;  %1774 = vmatprep.subr.bf16.mxu1 (!%p147_p6), %v1945_v0  ;;  %v1951_v5 = vld [vmem:[%s2770_s1 + $0x34] ss:$12 sps:$4 sm:$0xff] (!%p147_p6)   ;;  %v1953_v6 = vld [vmem:[%s2770_s1 + $0x30] ss:$12 sps:$4 sm:$0xff] (!%p147_p6)   ;;  %v1954_v7 = vld [vmem:[%s2770_s1 + $0x4c] ss:$12 sps:$4 sm:$0xff] (!%p147_p6)  }
   0xd   : > { %420 = vmatpush1.bf16.msra.mxu0 (!%p147_p6), %v1947_v1  ;;  %1782 = vmatpush1.bf16.msra.mxu1 (!%p147_p6), %v1947_v1  ;;  %v1956_v8 = vld [vmem:[%s2770_s1 + $0x48] ss:$12 sps:$4 sm:$0xff] (!%p147_p6)   ;;  %v1957_v9 = vld [vmem:[%s2770_s1 + $0x64] ss:$12 sps:$4 sm:$0xff] (!%p147_p6)   ;;  %v1959_v10 = vld [vmem:[%s2770_s1 + $0x60] ss:$12 sps:$4 sm:$0xff] (!%p147_p6)  }
   0xe   : > { %421 = vmatprep.subr.bf16.mxu0 (!%p147_p6), %v1948_v3  ;;  %1775 = vmatprep.subr.bf16.mxu1 (!%p147_p6), %v1948_v3  ;;  %v1960_v11 = vld [vmem:[%s2770_s1 + $0x7c] ss:$12 sps:$4 sm:$0xff] (!%p147_p6)   ;;  %v1962_v12 = vld [vmem:[%s2770_s1 + $0x78] ss:$12 sps:$4 sm:$0xff] (!%p147_p6)   ;;  %v1963_v13 = vld [vmem:[%s2770_s1 + $0x94] ss:$12 sps:$4 sm:$0xff] (!%p147_p6)  }
   0xf   : > { %v1965_v14 = vld [vmem:[%s2770_s1 + $0x90] ss:$12 sps:$4 sm:$0xff] (!%p147_p6)   ;;  %v1966_v15 = vld [vmem:[%s2770_s1 + $0xac] ss:$12 sps:$4 sm:$0xff] (!%p147_p6)   ;;  %v1968_v16 = vld [vmem:[%s2770_s1 + $0xa8] ss:$12 sps:$4 sm:$0xff] (!%p147_p6)  }
  0x10   : > { %v1969_v21 = vld [vmem:[%s2770_s1 + $0x8] ss:$12 sps:$4 sm:$0xff] (!%p147_p6)   ;;  %v1970_v24 = vld [vmem:[%s2770_s1 + $0x20] ss:$12 sps:$4 sm:$0xff] (!%p147_p6)   ;;  %v1971_v29 = vld [vmem:[%s2770_s1 + $0x38] ss:$12 sps:$4 sm:$0xff] (!%p147_p6)  }
  0x11   : > { %422 = vmatpush1.bf16.msra.mxu0 (!%p147_p6), %v1950_v4  ;;  %1783 = vmatpush1.bf16.msra.mxu1 (!%p147_p6), %v1950_v4  ;;  %v1972_v32 = vld [vmem:[%s2770_s1 + $0x50] ss:$12 sps:$4 sm:$0xff] (!%p147_p6)   ;;  %v1973_v37 = vld [vmem:[%s2770_s1 + $0x68] ss:$12 sps:$4 sm:$0xff] (!%p147_p6)   ;;  %v1974_v40 = vld [vmem:[%s2770_s1 + $0x80] ss:$12 sps:$4 sm:$0xff] (!%p147_p6)  }
  0x12   : > { %423 = vmatprep.subr.bf16.mxu0 %v1951_v5  ;;  %1776 = vmatprep.subr.bf16.mxu1 %v1951_v5  ;;  %s179_s17 = scalar_select %p178_p7, %s2200_s6, 80  ;;  %v1975_v45 = vld [vmem:[%s2770_s1 + $0x98] ss:$12 sps:$4 sm:$0xff]   ;;  %v1976_v48 = vld [vmem:[%s2770_s1 + $0xb0] ss:$12 sps:$4 sm:$0xff]  }
  0x13   : > { %s170_s10 = sand.u32 1, %s2055_s12   ;;  %s1165_s14 = ssub.s32 (%p2175_p4), 81, %s2200_s6 }
  0x14   : > { %s1533_s28 = sshll.u32 %s179_s17, 3  ;;  %s1790_s11 = smul.u32 384, %s170_s10 }
  0x15   : > { %424 = vmatpush1.bf16.msra.mxu0 %v1953_v6  ;;  %1784 = vmatpush1.bf16.msra.mxu1 %v1953_v6  ;;  %s2231_s7 = scalar_lea.vmem %s2769_s0, %s1533_s28  ;;  %s1791_s17 = smul.u32 (%p2175_p4), 384, %s2163_s15 }
  0x16   : > { %425 = vmatprep.subr.bf16.mxu0 %v1954_v7  ;;  %1777 = vmatprep.subr.bf16.mxu1 %v1954_v7  ;;  %v194_v17 = vld [vmem:[%s2231_s7] sm:$0xff]  ;;  %v195_v18 = vld [vmem:[%s2231_s7 + $0x8] sm:$0xff]  ;;  %v196_v25 = vld [vmem:[%s2231_s7 + $0x10] sm:$0xff]  ;;  %s2349_s12 = scalar_lea.vmem [#allocation2], %s1790_s11   ;;  %p1166_p8 = scmp.lt.s32.totalorder (%p2175_p4), %s1165_s14, 32 }
  0x17   : > { %v218_v19 = vld [vmem:[%s2231_s7 + $0xc0] sm:$0xff]  ;;  %v219_v20 = vld [vmem:[%s2231_s7 + $0xc8] sm:$0xff]  ;;  %v226_v22 = vpack.c.bf16 %v195_v18, %v194_v17  ;;  %v197_v26 = vld [vmem:[%s2231_s7 + $0x18] sm:$0xff]  ;;  %s2514_s22 = scalar_lea.vmem (%p2175_p4), %s2772_s3, %s1791_s17  }
  0x18   : > { %v2246_v23 = vpack.c.bf16 %v219_v20, %v218_v19  ;;  %v220_v27 = vld [vmem:[%s2231_s7 + $0xd0] sm:$0xff]  ;;  %v221_v28 = vld [vmem:[%s2231_s7 + $0xd8] sm:$0xff]  ;;  %v227_v30 = vpack.c.bf16 %v197_v26, %v196_v25  ;;  %v198_v33 = vld [vmem:[%s2231_s7 + $0x20] sm:$0xff] }
  0x19   : > { %426 = vmatpush1.bf16.msra.mxu0 %v1956_v8  ;;  %1785 = vmatpush1.bf16.msra.mxu1 %v1956_v8  ;;  %v2261_v31 = vpack.c.bf16 %v221_v28, %v220_v27  ;;  %v199_v34 = vld [vmem:[%s2231_s7 + $0x28] sm:$0xff]  ;;  %v222_v35 = vld [vmem:[%s2231_s7 + $0xe0] sm:$0xff]  ;;  %v200_v41 = vld [vmem:[%s2231_s7 + $0x30] sm:$0xff] }
  0x1a   : > { %427 = vmatprep.subr.bf16.mxu0 %v1957_v9  ;;  %1778 = vmatprep.subr.bf16.mxu1 %v1957_v9  ;;  %v223_v36 = vld [vmem:[%s2231_s7 + $0xe8] sm:$0xff]  ;;  %v228_v38 = vpack.c.bf16 %v199_v34, %v198_v33  ;;  %v201_v42 = vld [vmem:[%s2231_s7 + $0x38] sm:$0xff]  ;;  %v224_v43 = vld [vmem:[%s2231_s7 + $0xf0] sm:$0xff] }
  0x1b   : > { %v2276_v39 = vpack.c.bf16 %v223_v36, %v222_v35  ;;  %v225_v44 = vld [vmem:[%s2231_s7 + $0xf8] sm:$0xff]  ;;  %v229_v46 = vpack.c.bf16 %v201_v42, %v200_v41  ;;  %v202_v49 = vld [vmem:[%s2231_s7 + $0x40] sm:$0xff]  ;;  %v203_v50 = vld [vmem:[%s2231_s7 + $0x48] sm:$0xff] }
  0x1c   : > { %v2291_v47 = vpack.c.bf16 %v225_v44, %v224_v43  ;;  %v230_v51 = vpack.c.bf16 %v203_v50, %v202_v49  ;;  %v204_v52 = vld [vmem:[%s2231_s7 + $0x50] sm:$0xff]  ;;  %v205_v53 = vld [vmem:[%s2231_s7 + $0x58] sm:$0xff]  ;;  %v206_v55 = vld [vmem:[%s2231_s7 + $0x60] sm:$0xff] }
  0x1d   : > { %428 = vmatpush1.bf16.msra.mxu0 %v1959_v10  ;;  %1786 = vmatpush1.bf16.msra.mxu1 %v1959_v10  ;;  %v231_v54 = vpack.c.bf16 %v205_v53, %v204_v52  ;;  %v207_v56 = vld [vmem:[%s2231_s7 + $0x68] sm:$0xff]  ;;  %v208_v58 = vld [vmem:[%s2231_s7 + $0x70] sm:$0xff]  ;;  %v209_v59 = vld [vmem:[%s2231_s7 + $0x78] sm:$0xff]  ;;  %v276_v10 = vlaneseq }
  0x1e   : > { %429 = vmatprep.subr.bf16.mxu0 %v1960_v11  ;;  %1779 = vmatprep.subr.bf16.mxu1 %v1960_v11  ;;  %v232_v57 = vpack.c.bf16 %v207_v56, %v206_v55  ;;  %v210_v60 = vld [vmem:[%s2231_s7 + $0x80] sm:$0xff]  ;;  %v211_v61 = vld [vmem:[%s2231_s7 + $0x88] sm:$0xff]  ;;  %v233_v62 = vpack.c.bf16 %v209_v59, %v208_v58  ;;  %v212_v0 = vld [vmem:[%s2231_s7 + $0x90] sm:$0xff] }
  0x1f   : > { %v234_v63 = vpack.c.bf16 %v211_v61, %v210_v60  ;;  %v213_v1 = vld [vmem:[%s2231_s7 + $0x98] sm:$0xff]  ;;  %v214_v3 = vld [vmem:[%s2231_s7 + $0xa0] sm:$0xff]  ;;  %v215_v4 = vld [vmem:[%s2231_s7 + $0xa8] sm:$0xff]  ;;  %v2325_v11 = vshrl.u32 %v276_v10, 7 }
  0x20   : > { %v235_v5 = vpack.c.bf16 %v213_v1, %v212_v0  ;;  %v236_v6 = vpack.c.bf16 %v215_v4, %v214_v3  ;;  %v216_v7 = vld [vmem:[%s2231_s7 + $0xb0] sm:$0xff]  ;;  %v217_v8 = vld [vmem:[%s2231_s7 + $0xb8] sm:$0xff] }
  0x21   : > { %430 = vmatpush1.bf16.msra.mxu0 %v1962_v12  ;;  %1787 = vmatpush1.bf16.msra.mxu1 %v1962_v12  ;;  %v237_v9 = vpack.c.bf16 %v217_v8, %v216_v7  ;;  %v278_v12 = vsub.s32 0, %v2325_v11 }
  0x22   : > { %431 = vmatprep.subr.bf16.mxu0 %v1963_v13  ;;  %1780 = vmatprep.subr.bf16.mxu1 %v1963_v13  ;;  %v2331_v13 = vld [vmem:[%s2771_s2] sm:$0x7] }
  0x25   : > { %432 = vmatpush1.bf16.msra.mxu0 %v1965_v14  ;;  %1788 = vmatpush1.bf16.msra.mxu1 %v1965_v14  ;;  %v282_v14 = vsub.s32 1, %v2325_v11 }
  0x26   : > { %433 = vmatprep.subr.bf16.mxu0 %v1966_v15  ;;  %1781 = vmatprep.subr.bf16.mxu1 %v1966_v15 }
  0x27   : > { %v2339_v15 = vrot.slane %v2331_v13, %v282_v14 }
  0x29   : > { %434 = vmatpush1.bf16.msra.mxu0 %v1968_v16  ;;  %1789 = vmatpush1.bf16.msra.mxu1 %v1968_v16 }
  0x2a   : > { %1726 = vmatprep.subr.bf16.mxu1 %v1969_v21 }
  0x2c   : > { %452 = vmatmul.mubr.bf16.vlgmr.msra.gmra.mrb[0].mxu0 %v226_v22  ;;  %572 = vmatmul.mubr.bf16.vlgmr.msra.gmra.mrb[0].mxu1 %v2246_v23 }
  0x2d   : > { %1727 = vmatpush3.bf16.msra.mxu1 %v1969_v21  ;;  %461 = vmatprep.mubr.bf16.mxu0 %v2129_v2 }
  0x2e   : > { %1728 = vmatprep.subr.bf16.mxu1 %v1970_v24  ;;  %581 = vmatprep.mubr.bf16.mxu1 %v2129_v2 }
  0x31   : > { %1729 = vmatpush3.bf16.msra.mxu1 %v1970_v24 }
  0x32   : > { %1730 = vmatprep.subr.bf16.mxu1 %v1971_v29 }
  0x34   : > { %462 = vmatmul.mubr.bf16.gmra.mrb[4].mxu0 %v227_v30  ;;  %582 = vmatmul.mubr.bf16.gmra.mrb[4].mxu1 %v2261_v31 }
  0x35   : > { %1731 = vmatpush3.bf16.msra.mxu1 %v1971_v29  ;;  %471 = vmatprep.mubr.bf16.mxu0 %v2129_v2 }
  0x36   : > { %1732 = vmatprep.subr.bf16.mxu1 %v1972_v32  ;;  %591 = vmatprep.mubr.bf16.mxu1 %v2129_v2 }
  0x39   : > { %1733 = vmatpush3.bf16.msra.mxu1 %v1972_v32 }
  0x3a   : > { %1734 = vmatprep.subr.bf16.mxu1 %v1973_v37 }
  0x3c   : > { %472 = vmatmul.mubr.bf16.gmra.mrb[8].mxu0 %v228_v38  ;;  %592 = vmatmul.mubr.bf16.gmra.mrb[8].mxu1 %v2276_v39 }
  0x3d   : > { %1735 = vmatpush3.bf16.msra.mxu1 %v1973_v37  ;;  %481 = vmatprep.mubr.bf16.mxu0 %v2129_v2 }
  0x3e   : > { %1736 = vmatprep.subr.bf16.mxu1 %v1974_v40  ;;  %601 = vmatprep.mubr.bf16.mxu1 %v2129_v2 }
  0x41   : > { %1737 = vmatpush3.bf16.msra.mxu1 %v1974_v40 }
  0x42   : > { %1738 = vmatprep.subr.bf16.mxu1 %v1975_v45 }
  0x44   : > { %482 = vmatmul.mubr.bf16.gmra.mrb[12].mxu0 %v229_v46  ;;  %602 = vmatmul.mubr.bf16.gmra.mrb[12].mxu1 %v2291_v47 }
  0x45   : > { %1739 = vmatpush3.bf16.msra.mxu1 %v1975_v45  ;;  %491 = vmatprep.mubr.bf16.mxu0 %v2129_v2 }
  0x46   : > { %1740 = vmatprep.subr.bf16.mxu1 %v1976_v48  ;;  %1742 = vmatprep.mubr.bf16.mxu1 %v226_v22 }
  0x49   : > { %1741 = vmatpush3.bf16.msra.mxu1 %v1976_v48 }
  0x4c   : > { %492 = vmatmul.mubr.bf16.gmra.mrb[16].mxu0 %v230_v51  ;;  %1743 = vmatmul.mubr.bf16.vlgmr.msra.gmra.mrb[16].mxu1 %v227_v30 }
  0x4d   : > { %501 = vmatprep.mubr.bf16.mxu0 %v2129_v2  ;;  %1746 = vmatprep.mubr.bf16.mxu1 %v228_v38 }
  0x54   : > { %502 = vmatmul.mubr.bf16.gmra.mrb[20].mxu0 %v231_v54  ;;  %1747 = vmatmul.mubr.bf16.gmra.mrb[20].mxu1 %v229_v46 }
  0x55   : > { %511 = vmatprep.mubr.bf16.mxu0 %v2129_v2  ;;  %1750 = vmatprep.mubr.bf16.mxu1 %v230_v51 }
  0x5c   : > { %512 = vmatmul.mubr.bf16.gmra.mrb[24].mxu0 %v232_v57  ;;  %1751 = vmatmul.mubr.bf16.gmra.mrb[24].mxu1 %v231_v54 }
  0x5d   : > { %521 = vmatprep.mubr.bf16.mxu0 %v2129_v2  ;;  %1754 = vmatprep.mubr.bf16.mxu1 %v232_v57 }
  0x64   : > { %522 = vmatmul.mubr.bf16.gmra.mrb[28].mxu0 %v233_v62  ;;  %1755 = vmatmul.mubr.bf16.gmra.mrb[28].mxu1 %v233_v62 }
  0x65   : > { %531 = vmatprep.mubr.bf16.mxu0 %v2129_v2  ;;  %1758 = vmatprep.mubr.bf16.mxu1 %v234_v63 }
  0x6c   : > { %532 = vmatmul.mubr.bf16.gmra.mrb[32].mxu0 %v234_v63  ;;  %1759 = vmatmul.mubr.bf16.gmra.mrb[32].mxu1 %v235_v5 }
  0x6d   : > { %541 = vmatprep.mubr.bf16.mxu0 %v2129_v2  ;;  %1762 = vmatprep.mubr.bf16.mxu1 %v236_v6 }
  0x74   : > { %542 = vmatmul.mubr.bf16.gmra.mrb[36].mxu0 %v235_v5  ;;  %1763 = vmatmul.mubr.bf16.gmra.mrb[36].mxu1 %v237_v9 }
  0x75   : > { %551 = vmatprep.mubr.bf16.mxu0 %v2129_v2  ;;  %1766 = vmatprep.mubr.bf16.mxu1 %v2246_v23 }
  0x7c   : > { %552 = vmatmul.mubr.bf16.gmra.mrb[40].mxu0 %v236_v6  ;;  %1767 = vmatmul.mubr.bf16.gmra.mrb[40].mxu1 %v2261_v31 }
  0x7d   : > { %561 = vmatprep.mubr.bf16.mxu0 %v2129_v2  ;;  %1770 = vmatprep.mubr.bf16.mxu1 %v2276_v39  ;;  %v2336_v2 = vrot.slane %v2331_v13, %v278_v12 }
  0x84   : > { %562 = vmatmul.mubr.bf16.gmra.mrb[44].mxu0 %v237_v9  ;;  %1771 = vmatmul.mubr.bf16.gmra.mrb[44].mxu1 %v2291_v47 }
  0xff   : > { %v453_v16 = vpop.f32.mrb[0].mxu0  ;;  %v573_v17 = vpop.f32.mrb[0].mxu1 }
 0x100   : > { %v454_v18 = vadd.f32 %v453_v16, %v2336_v2  ;;  %v574_v19 = vadd.f32 %v573_v17, %v2336_v2  ;;  %v455_v20 = vpop.f32.mrb[1].mxu0  ;;  %v575_v21 = vpop.f32.mrb[1].mxu1 }
 0x101   : > { %v456_v22 = vadd.f32 %v455_v20, %v2339_v15  ;;  %v576_v23 = vadd.f32 %v575_v21, %v2339_v15  ;;  %v457_v24 = vpop.f32.mrb[2].mxu0  ;;  %v577_v25 = vpop.f32.mrb[2].mxu1 }
 0x102   : > { %v458_v26 = vadd.f32 %v457_v24, %v2336_v2  ;;  %v578_v27 = vadd.f32 %v577_v25, %v2336_v2  ;;  %v459_v28 = vpop.f32.mrb[3].mxu0  ;;  %v579_v29 = vpop.f32.mrb[3].mxu1 }
 0x103   : > { %v1638_v30 = vpack.c.bf16 %v456_v22, %v454_v18  ;;  %v1686_v31 = vpack.c.bf16 %v576_v23, %v574_v19  ;;  %v460_v32 = vadd.f32 %v459_v28, %v2339_v15  ;;  %v580_v33 = vadd.f32 %v579_v29, %v2339_v15 }
 0x104   : > { %v286_v22 = vsub.s32 2, %v2325_v11 }
 0x105   : > { %1093 = vst [vmem:[%s2349_s12] sm:$0xff] %v1638_v30  ;;  %1141 = vst [vmem:[%s2349_s12 + $0x120] sm:$0xff] %v1686_v31  ;;  %v1640_v34 = vpack.c.bf16 %v460_v32, %v458_v26  ;;  %v1688_v35 = vpack.c.bf16 %v580_v33, %v578_v27 }
 0x107   : > { %1095 = vst [vmem:[%s2349_s12 + $0xc] sm:$0xff] %v1640_v34  ;;  %1143 = vst [vmem:[%s2349_s12 + $0x12c] sm:$0xff] %v1688_v35  ;;  %v463_v36 = vpop.f32.mrb[4].mxu0  ;;  %v583_v37 = vpop.f32.mrb[4].mxu1  ;;  %v2389_v34 = vrot.slane %v2331_v13, %v286_v22 }
 0x108   : > { %v464_v38 = vadd.f32 %v463_v36, %v2336_v2  ;;  %v584_v39 = vadd.f32 %v583_v37, %v2336_v2  ;;  %v465_v40 = vpop.f32.mrb[5].mxu0  ;;  %v585_v41 = vpop.f32.mrb[5].mxu1 }
 0x109   : > { %v466_v42 = vadd.f32 %v465_v40, %v2339_v15  ;;  %v586_v43 = vadd.f32 %v585_v41, %v2339_v15  ;;  %v467_v44 = vpop.f32.mrb[6].mxu0  ;;  %v587_v45 = vpop.f32.mrb[6].mxu1 }
 0x10a   : > { %v468_v46 = vadd.f32 %v467_v44, %v2336_v2  ;;  %v588_v47 = vadd.f32 %v587_v45, %v2336_v2  ;;  %v469_v48 = vpop.f32.mrb[7].mxu0  ;;  %v589_v49 = vpop.f32.mrb[7].mxu1 }
 0x10b   : > { %v1642_v50 = vpack.c.bf16 %v466_v42, %v464_v38  ;;  %v1690_v51 = vpack.c.bf16 %v586_v43, %v584_v39  ;;  %v470_v52 = vadd.f32 %v469_v48, %v2339_v15  ;;  %v590_v53 = vadd.f32 %v589_v49, %v2339_v15 }
 0x10d   : > { %1097 = vst [vmem:[%s2349_s12 + $0x18] sm:$0xff] %v1642_v50  ;;  %1145 = vst [vmem:[%s2349_s12 + $0x138] sm:$0xff] %v1690_v51  ;;  %v1644_v54 = vpack.c.bf16 %v470_v52, %v468_v46  ;;  %v1692_v55 = vpack.c.bf16 %v590_v53, %v588_v47 }
 0x10f   : > { %1099 = vst [vmem:[%s2349_s12 + $0x24] sm:$0xff] %v1644_v54  ;;  %1147 = vst [vmem:[%s2349_s12 + $0x144] sm:$0xff] %v1692_v55  ;;  %v473_v56 = vpop.f32.mrb[8].mxu0  ;;  %v593_v57 = vpop.f32.mrb[8].mxu1 }
 0x110   : > { %v474_v58 = vadd.f32 %v473_v56, %v2336_v2  ;;  %v594_v59 = vadd.f32 %v593_v57, %v2336_v2  ;;  %v475_v60 = vpop.f32.mrb[9].mxu0  ;;  %v595_v61 = vpop.f32.mrb[9].mxu1 }
 0x111   : > { %v476_v62 = vadd.f32 %v475_v60, %v2339_v15  ;;  %v596_v63 = vadd.f32 %v595_v61, %v2339_v15  ;;  %v477_v0 = vpop.f32.mrb[10].mxu0  ;;  %v597_v1 = vpop.f32.mrb[10].mxu1 }
 0x112   : > { %v478_v3 = vadd.f32 %v477_v0, %v2336_v2  ;;  %v598_v4 = vadd.f32 %v597_v1, %v2336_v2  ;;  %v479_v5 = vpop.f32.mrb[11].mxu0  ;;  %v599_v6 = vpop.f32.mrb[11].mxu1 }
 0x113   : > { %v1646_v7 = vpack.c.bf16 %v476_v62, %v474_v58  ;;  %v1694_v8 = vpack.c.bf16 %v596_v63, %v594_v59  ;;  %v480_v9 = vadd.f32 %v479_v5, %v2339_v15  ;;  %v600_v10 = vadd.f32 %v599_v6, %v2339_v15 }
 0x115   : > { %1101 = vst [vmem:[%s2349_s12 + $0x30] sm:$0xff] %v1646_v7  ;;  %1149 = vst [vmem:[%s2349_s12 + $0x150] sm:$0xff] %v1694_v8  ;;  %v1648_v12 = vpack.c.bf16 %v480_v9, %v478_v3  ;;  %v1696_v14 = vpack.c.bf16 %v600_v10, %v598_v4 }
 0x117   : > { %1103 = vst [vmem:[%s2349_s12 + $0x3c] sm:$0xff] %v1648_v12  ;;  %1151 = vst [vmem:[%s2349_s12 + $0x15c] sm:$0xff] %v1696_v14  ;;  %v483_v16 = vpop.f32.mrb[12].mxu0  ;;  %v603_v17 = vpop.f32.mrb[12].mxu1 }
 0x118   : > { %v484_v18 = vadd.f32 %v483_v16, %v2336_v2  ;;  %v604_v19 = vadd.f32 %v603_v17, %v2336_v2  ;;  %v485_v20 = vpop.f32.mrb[13].mxu0  ;;  %v605_v21 = vpop.f32.mrb[13].mxu1 }
 0x119   : > { %v486_v23 = vadd.f32 %v485_v20, %v2339_v15  ;;  %v606_v24 = vadd.f32 %v605_v21, %v2339_v15  ;;  %v487_v25 = vpop.f32.mrb[14].mxu0  ;;  %v607_v26 = vpop.f32.mrb[14].mxu1 }
 0x11a   : > { %v488_v27 = vadd.f32 %v487_v25, %v2336_v2  ;;  %v608_v28 = vadd.f32 %v607_v26, %v2336_v2  ;;  %v489_v29 = vpop.f32.mrb[15].mxu0  ;;  %v609_v30 = vpop.f32.mrb[15].mxu1 }
 0x11b   : > { %v1650_v31 = vpack.c.bf16 %v486_v23, %v484_v18  ;;  %v1698_v32 = vpack.c.bf16 %v606_v24, %v604_v19  ;;  %v490_v33 = vadd.f32 %v489_v29, %v2339_v15  ;;  %v610_v11 = vadd.f32 %v609_v30, %v2339_v15 }
 0x11d   : > { %1105 = vst [vmem:[%s2349_s12 + $0x48] sm:$0xff] %v1650_v31  ;;  %1153 = vst [vmem:[%s2349_s12 + $0x168] sm:$0xff] %v1698_v32  ;;  %v1652_v35 = vpack.c.bf16 %v490_v33, %v488_v27  ;;  %v1700_v36 = vpack.c.bf16 %v610_v11, %v608_v28 }
 0x11f   : > { %1107 = vst [vmem:[%s2349_s12 + $0x54] sm:$0xff] %v1652_v35  ;;  %1155 = vst [vmem:[%s2349_s12 + $0x174] sm:$0xff] %v1700_v36  ;;  %v493_v37 = vpop.f32.mrb[16].mxu0  ;;  %v1744_v38 = vpop.f32.mrb[16].mxu1 }
 0x120   : > { %v494_v39 = vadd.f32 %v493_v37, %v2336_v2  ;;  %v655_v40 = vadd.f32 %v1744_v38, %v2389_v34  ;;  %v495_v41 = vpop.f32.mrb[17].mxu0  ;;  %v646_v42 = vpop.f32.mrb[17].mxu1 }
 0x121   : > { %v496_v43 = vadd.f32 %v495_v41, %v2339_v15  ;;  %v647_v13 = vadd.f32 %v646_v42, %v2389_v34  ;;  %v497_v44 = vpop.f32.mrb[18].mxu0  ;;  %v1745_v45 = vpop.f32.mrb[18].mxu1 }
 0x122   : > { %v1643_v46 = vpack.c.bf16 %v655_v40, %v655_v40  ;;  %v498_v47 = vadd.f32 %v497_v44, %v2336_v2  ;;  %v658_v48 = vadd.f32 %v1745_v45, %v2389_v34  ;;  %v499_v49 = vpop.f32.mrb[19].mxu0  ;;  %v649_v50 = vpop.f32.mrb[19].mxu1 }
 0x123   : > { %v1654_v51 = vpack.c.bf16 %v496_v43, %v494_v39  ;;  %v1639_v52 = vpack.c.bf16 %v647_v13, %v647_v13  ;;  %v500_v53 = vadd.f32 %v499_v49, %v2339_v15  ;;  %v650_v54 = vadd.f32 %v649_v50, %v2389_v34 }
 0x124   : > { %1098 = vst [vmem:[%s2349_s12 + $0x20] sm:$0xf] %v1643_v46  ;;  %v1645_v55 = vpack.c.bf16 %v658_v48, %v658_v48 }
 0x125   : > { %1109 = vst [vmem:[%s2349_s12 + $0x60] sm:$0xff] %v1654_v51  ;;  %1094 = vst [vmem:[%s2349_s12 + $0x8] sm:$0xf] %v1639_v52  ;;  %v1656_v56 = vpack.c.bf16 %v500_v53, %v498_v47  ;;  %v1641_v57 = vpack.c.bf16 %v650_v54, %v650_v54 }
 0x126   : > { %1100 = vst [vmem:[%s2349_s12 + $0x2c] sm:$0xf] %v1645_v55 }
 0x127   : > { %1111 = vst [vmem:[%s2349_s12 + $0x6c] sm:$0xff] %v1656_v56  ;;  %1096 = vst [vmem:[%s2349_s12 + $0x14] sm:$0xf] %v1641_v57  ;;  %v503_v58 = vpop.f32.mrb[20].mxu0  ;;  %v1748_v59 = vpop.f32.mrb[20].mxu1 }
 0x128   : > { %v504_v60 = vadd.f32 %v503_v58, %v2336_v2  ;;  %v671_v61 = vadd.f32 %v1748_v59, %v2389_v34  ;;  %v505_v62 = vpop.f32.mrb[21].mxu0  ;;  %v662_v63 = vpop.f32.mrb[21].mxu1 }
 0x129   : > { %v506_v0 = vadd.f32 %v505_v62, %v2339_v15  ;;  %v663_v1 = vadd.f32 %v662_v63, %v2389_v34  ;;  %v507_v3 = vpop.f32.mrb[22].mxu0  ;;  %v1749_v4 = vpop.f32.mrb[22].mxu1 }
 0x12a   : > { %v1651_v5 = vpack.c.bf16 %v671_v61, %v671_v61  ;;  %v508_v6 = vadd.f32 %v507_v3, %v2336_v2  ;;  %v674_v7 = vadd.f32 %v1749_v4, %v2389_v34  ;;  %v509_v8 = vpop.f32.mrb[23].mxu0  ;;  %v665_v9 = vpop.f32.mrb[23].mxu1 }
 0x12b   : > { %v1658_v10 = vpack.c.bf16 %v506_v0, %v504_v60  ;;  %v1647_v12 = vpack.c.bf16 %v663_v1, %v663_v1  ;;  %v510_v14 = vadd.f32 %v509_v8, %v2339_v15  ;;  %v666_v16 = vadd.f32 %v665_v9, %v2389_v34 }
 0x12c   : > { %1106 = vst [vmem:[%s2349_s12 + $0x50] sm:$0xf] %v1651_v5  ;;  %v1653_v17 = vpack.c.bf16 %v674_v7, %v674_v7 }
 0x12d   : > { %1113 = vst [vmem:[%s2349_s12 + $0x78] sm:$0xff] %v1658_v10  ;;  %1102 = vst [vmem:[%s2349_s12 + $0x38] sm:$0xf] %v1647_v12  ;;  %v1660_v18 = vpack.c.bf16 %v510_v14, %v508_v6  ;;  %v1649_v19 = vpack.c.bf16 %v666_v16, %v666_v16 }
 0x12e   : > { %1108 = vst [vmem:[%s2349_s12 + $0x5c] sm:$0xf] %v1653_v17 }
 0x12f   : > { %1115 = vst [vmem:[%s2349_s12 + $0x84] sm:$0xff] %v1660_v18  ;;  %1104 = vst [vmem:[%s2349_s12 + $0x44] sm:$0xf] %v1649_v19  ;;  %v513_v20 = vpop.f32.mrb[24].mxu0  ;;  %v1752_v21 = vpop.f32.mrb[24].mxu1 }
 0x130   : > { %v514_v22 = vadd.f32 %v513_v20, %v2336_v2  ;;  %v687_v23 = vadd.f32 %v1752_v21, %v2389_v34  ;;  %v515_v24 = vpop.f32.mrb[25].mxu0  ;;  %v678_v25 = vpop.f32.mrb[25].mxu1 }
 0x131   : > { %v516_v26 = vadd.f32 %v515_v24, %v2339_v15  ;;  %v679_v27 = vadd.f32 %v678_v25, %v2389_v34  ;;  %v517_v28 = vpop.f32.mrb[26].mxu0  ;;  %v1753_v29 = vpop.f32.mrb[26].mxu1 }
 0x132   : > { %v1659_v30 = vpack.c.bf16 %v687_v23, %v687_v23  ;;  %v518_v31 = vadd.f32 %v517_v28, %v2336_v2  ;;  %v690_v32 = vadd.f32 %v1753_v29, %v2389_v34  ;;  %v519_v33 = vpop.f32.mrb[27].mxu0  ;;  %v681_v11 = vpop.f32.mrb[27].mxu1 }
 0x133   : > { %v1662_v35 = vpack.c.bf16 %v516_v26, %v514_v22  ;;  %v1655_v36 = vpack.c.bf16 %v679_v27, %v679_v27  ;;  %v520_v37 = vadd.f32 %v519_v33, %v2339_v15  ;;  %v682_v38 = vadd.f32 %v681_v11, %v2389_v34 }
 0x134   : > { %1114 = vst [vmem:[%s2349_s12 + $0x80] sm:$0xf] %v1659_v30  ;;  %v1661_v39 = vpack.c.bf16 %v690_v32, %v690_v32 }
 0x135   : > { %1117 = vst [vmem:[%s2349_s12 + $0x90] sm:$0xff] %v1662_v35  ;;  %1110 = vst [vmem:[%s2349_s12 + $0x68] sm:$0xf] %v1655_v36  ;;  %v1664_v40 = vpack.c.bf16 %v520_v37, %v518_v31  ;;  %v1657_v41 = vpack.c.bf16 %v682_v38, %v682_v38 }
 0x136   : > { %1116 = vst [vmem:[%s2349_s12 + $0x8c] sm:$0xf] %v1661_v39 }
 0x137   : > { %1119 = vst [vmem:[%s2349_s12 + $0x9c] sm:$0xff] %v1664_v40  ;;  %1112 = vst [vmem:[%s2349_s12 + $0x74] sm:$0xf] %v1657_v41  ;;  %v523_v42 = vpop.f32.mrb[28].mxu0  ;;  %v1756_v43 = vpop.f32.mrb[28].mxu1 }
 0x138   : > { %v524_v13 = vadd.f32 %v523_v42, %v2336_v2  ;;  %v703_v44 = vadd.f32 %v1756_v43, %v2389_v34  ;;  %v525_v45 = vpop.f32.mrb[29].mxu0  ;;  %v694_v46 = vpop.f32.mrb[29].mxu1 }
 0x139   : > { %v526_v47 = vadd.f32 %v525_v45, %v2339_v15  ;;  %v695_v48 = vadd.f32 %v694_v46, %v2389_v34  ;;  %v527_v49 = vpop.f32.mrb[30].mxu0  ;;  %v1757_v50 = vpop.f32.mrb[30].mxu1 }
 0x13a   : > { %v1667_v51 = vpack.c.bf16 %v703_v44, %v703_v44  ;;  %v528_v52 = vadd.f32 %v527_v49, %v2336_v2  ;;  %v706_v53 = vadd.f32 %v1757_v50, %v2389_v34  ;;  %v529_v54 = vpop.f32.mrb[31].mxu0  ;;  %v697_v55 = vpop.f32.mrb[31].mxu1 }
 0x13b   : > { %v1666_v56 = vpack.c.bf16 %v526_v47, %v524_v13  ;;  %v1663_v57 = vpack.c.bf16 %v695_v48, %v695_v48  ;;  %v530_v58 = vadd.f32 %v529_v54, %v2339_v15  ;;  %v698_v59 = vadd.f32 %v697_v55, %v2389_v34 }
 0x13c   : > { %1122 = vst [vmem:[%s2349_s12 + $0xb0] sm:$0xf] %v1667_v51  ;;  %v1669_v60 = vpack.c.bf16 %v706_v53, %v706_v53 }
 0x13d   : > { %1121 = vst [vmem:[%s2349_s12 + $0xa8] sm:$0xff] %v1666_v56  ;;  %1118 = vst [vmem:[%s2349_s12 + $0x98] sm:$0xf] %v1663_v57  ;;  %v1668_v61 = vpack.c.bf16 %v530_v58, %v528_v52  ;;  %v1665_v62 = vpack.c.bf16 %v698_v59, %v698_v59 }
 0x13e   : > { %1124 = vst [vmem:[%s2349_s12 + $0xbc] sm:$0xf] %v1669_v60 }
 0x13f   : > { %1123 = vst [vmem:[%s2349_s12 + $0xb4] sm:$0xff] %v1668_v61  ;;  %1120 = vst [vmem:[%s2349_s12 + $0xa4] sm:$0xf] %v1665_v62  ;;  %v533_v63 = vpop.f32.mrb[32].mxu0  ;;  %v1760_v0 = vpop.f32.mrb[32].mxu1 }
 0x140   : > { %v534_v1 = vadd.f32 %v533_v63, %v2336_v2  ;;  %v719_v3 = vadd.f32 %v1760_v0, %v2389_v34  ;;  %v535_v4 = vpop.f32.mrb[33].mxu0  ;;  %v710_v5 = vpop.f32.mrb[33].mxu1 }
 0x141   : > { %v536_v6 = vadd.f32 %v535_v4, %v2339_v15  ;;  %v711_v7 = vadd.f32 %v710_v5, %v2389_v34  ;;  %v537_v8 = vpop.f32.mrb[34].mxu0  ;;  %v1761_v9 = vpop.f32.mrb[34].mxu1 }
 0x142   : > { %v1675_v10 = vpack.c.bf16 %v719_v3, %v719_v3  ;;  %v538_v12 = vadd.f32 %v537_v8, %v2336_v2  ;;  %v722_v14 = vadd.f32 %v1761_v9, %v2389_v34  ;;  %v539_v16 = vpop.f32.mrb[35].mxu0  ;;  %v713_v17 = vpop.f32.mrb[35].mxu1 }
 0x143   : > { %v1670_v18 = vpack.c.bf16 %v536_v6, %v534_v1  ;;  %v1671_v19 = vpack.c.bf16 %v711_v7, %v711_v7  ;;  %v540_v20 = vadd.f32 %v539_v16, %v2339_v15  ;;  %v714_v21 = vadd.f32 %v713_v17, %v2389_v34 }
 0x144   : > { %1130 = vst [vmem:[%s2349_s12 + $0xe0] sm:$0xf] %v1675_v10  ;;  %v1677_v22 = vpack.c.bf16 %v722_v14, %v722_v14 }
 0x145   : > { %1125 = vst [vmem:[%s2349_s12 + $0xc0] sm:$0xff] %v1670_v18  ;;  %1126 = vst [vmem:[%s2349_s12 + $0xc8] sm:$0xf] %v1671_v19  ;;  %v1672_v23 = vpack.c.bf16 %v540_v20, %v538_v12  ;;  %v1673_v24 = vpack.c.bf16 %v714_v21, %v714_v21 }
 0x146   : > { %1132 = vst [vmem:[%s2349_s12 + $0xec] sm:$0xf] %v1677_v22 }
 0x147   : > { %1127 = vst [vmem:[%s2349_s12 + $0xcc] sm:$0xff] %v1672_v23  ;;  %1128 = vst [vmem:[%s2349_s12 + $0xd4] sm:$0xf] %v1673_v24  ;;  %v543_v25 = vpop.f32.mrb[36].mxu0  ;;  %v1764_v26 = vpop.f32.mrb[36].mxu1 }
 0x148   : > { %v544_v27 = vadd.f32 %v543_v25, %v2336_v2  ;;  %v735_v28 = vadd.f32 %v1764_v26, %v2389_v34  ;;  %v545_v29 = vpop.f32.mrb[37].mxu0  ;;  %v726_v30 = vpop.f32.mrb[37].mxu1 }
 0x149   : > { %v546_v31 = vadd.f32 %v545_v29, %v2339_v15  ;;  %v727_v32 = vadd.f32 %v726_v30, %v2389_v34  ;;  %v547_v33 = vpop.f32.mrb[38].mxu0  ;;  %v1765_v11 = vpop.f32.mrb[38].mxu1 }
 0x14a   : > { %v1683_v35 = vpack.c.bf16 %v735_v28, %v735_v28  ;;  %v548_v36 = vadd.f32 %v547_v33, %v2336_v2  ;;  %v738_v37 = vadd.f32 %v1765_v11, %v2389_v34  ;;  %v549_v38 = vpop.f32.mrb[39].mxu0  ;;  %v729_v39 = vpop.f32.mrb[39].mxu1 }
 0x14b   : > { %v1674_v40 = vpack.c.bf16 %v546_v31, %v544_v27  ;;  %v1679_v41 = vpack.c.bf16 %v727_v32, %v727_v32  ;;  %v550_v42 = vadd.f32 %v549_v38, %v2339_v15  ;;  %v730_v43 = vadd.f32 %v729_v39, %v2389_v34 }
 0x14c   : > { %1138 = vst [vmem:[%s2349_s12 + $0x110] sm:$0xf] %v1683_v35  ;;  %v1685_v13 = vpack.c.bf16 %v738_v37, %v738_v37 }
 0x14d   : > { %1129 = vst [vmem:[%s2349_s12 + $0xd8] sm:$0xff] %v1674_v40  ;;  %1134 = vst [vmem:[%s2349_s12 + $0xf8] sm:$0xf] %v1679_v41  ;;  %v1676_v44 = vpack.c.bf16 %v550_v42, %v548_v36  ;;  %v1681_v45 = vpack.c.bf16 %v730_v43, %v730_v43 }
 0x14e   : > { %1140 = vst [vmem:[%s2349_s12 + $0x11c] sm:$0xf] %v1685_v13 }
 0x14f   : > { %1131 = vst [vmem:[%s2349_s12 + $0xe4] sm:$0xff] %v1676_v44  ;;  %1136 = vst [vmem:[%s2349_s12 + $0x104] sm:$0xf] %v1681_v45  ;;  %v553_v46 = vpop.f32.mrb[40].mxu0  ;;  %v1768_v47 = vpop.f32.mrb[40].mxu1 }
 0x150   : > { %v554_v48 = vadd.f32 %v553_v46, %v2336_v2  ;;  %v751_v49 = vadd.f32 %v1768_v47, %v2389_v34  ;;  %v555_v50 = vpop.f32.mrb[41].mxu0  ;;  %v742_v51 = vpop.f32.mrb[41].mxu1 }
 0x151   : > { %v556_v52 = vadd.f32 %v555_v50, %v2339_v15  ;;  %v743_v53 = vadd.f32 %v742_v51, %v2389_v34  ;;  %v557_v54 = vpop.f32.mrb[42].mxu0  ;;  %v1769_v55 = vpop.f32.mrb[42].mxu1 }
 0x152   : > { %v1691_v56 = vpack.c.bf16 %v751_v49, %v751_v49  ;;  %v558_v57 = vadd.f32 %v557_v54, %v2336_v2  ;;  %v754_v58 = vadd.f32 %v1769_v55, %v2389_v34  ;;  %v559_v59 = vpop.f32.mrb[43].mxu0  ;;  %v745_v60 = vpop.f32.mrb[43].mxu1 }
 0x153   : > { %v1678_v61 = vpack.c.bf16 %v556_v52, %v554_v48  ;;  %v1687_v62 = vpack.c.bf16 %v743_v53, %v743_v53  ;;  %v560_v63 = vadd.f32 %v559_v59, %v2339_v15  ;;  %v746_v0 = vadd.f32 %v745_v60, %v2389_v34 }
 0x154   : > { %1146 = vst [vmem:[%s2349_s12 + $0x140] sm:$0xf] %v1691_v56  ;;  %v1693_v1 = vpack.c.bf16 %v754_v58, %v754_v58 }
 0x155   : > { %1133 = vst [vmem:[%s2349_s12 + $0xf0] sm:$0xff] %v1678_v61  ;;  %1142 = vst [vmem:[%s2349_s12 + $0x128] sm:$0xf] %v1687_v62  ;;  %v1680_v3 = vpack.c.bf16 %v560_v63, %v558_v57  ;;  %v1689_v4 = vpack.c.bf16 %v746_v0, %v746_v0 }
 0x156   : > { %1148 = vst [vmem:[%s2349_s12 + $0x14c] sm:$0xf] %v1693_v1 }
 0x157   : > { %1135 = vst [vmem:[%s2349_s12 + $0xfc] sm:$0xff] %v1680_v3  ;;  %1144 = vst [vmem:[%s2349_s12 + $0x134] sm:$0xf] %v1689_v4  ;;  %v563_v5 = vpop.f32.mrb[44].mxu0  ;;  %v1772_v6 = vpop.f32.mrb[44].mxu1 }
 0x158   : > { %v564_v7 = vadd.f32 %v563_v5, %v2336_v2  ;;  %v767_v8 = vadd.f32 %v1772_v6, %v2389_v34  ;;  %v565_v9 = vpop.f32.mrb[45].mxu0  ;;  %v758_v10 = vpop.f32.mrb[45].mxu1 }
 0x159   : > { %v566_v12 = vadd.f32 %v565_v9, %v2339_v15  ;;  %v759_v14 = vadd.f32 %v758_v10, %v2389_v34  ;;  %v567_v16 = vpop.f32.mrb[46].mxu0  ;;  %v1773_v17 = vpop.f32.mrb[46].mxu1  ;;  %1163 = sbr.rel (!%p2175_p4) target bundleno = 466 (0x1d2), region = 36 }
 0x15a   : > { %v1699_v18 = vpack.c.bf16 %v767_v8, %v767_v8  ;;  %v568_v19 = vadd.f32 %v567_v16, %v2336_v2  ;;  %v770_v20 = vadd.f32 %v1773_v17, %v2389_v34  ;;  %v569_v21 = vpop.f32.mrb[47].mxu0  ;;  %v761_v22 = vpop.f32.mrb[47].mxu1 }
 0x15b   : > { %v1682_v23 = vpack.c.bf16 %v566_v12, %v564_v7  ;;  %v1695_v24 = vpack.c.bf16 %v759_v14, %v759_v14  ;;  %v570_v25 = vadd.f32 %v569_v21, %v2339_v15  ;;  %v762_v26 = vadd.f32 %v761_v22, %v2389_v34 }
 0x15c   : > { %1154 = vst [vmem:[%s2349_s12 + $0x170] sm:$0xf] %v1699_v18  ;;  %v1701_v27 = vpack.c.bf16 %v770_v20, %v770_v20 }
 0x15d   : > { %1137 = vst [vmem:[%s2349_s12 + $0x108] sm:$0xff] %v1682_v23  ;;  %1150 = vst [vmem:[%s2349_s12 + $0x158] sm:$0xf] %v1695_v24  ;;  %v1684_v28 = vpack.c.bf16 %v570_v25, %v568_v19  ;;  %v1697_v29 = vpack.c.bf16 %v762_v26, %v762_v26 }
 0x15e   : > { %1156 = vst [vmem:[%s2349_s12 + $0x17c] sm:$0xf] %v1701_v27 }
 0x15f   : > { %1139 = vst [vmem:[%s2349_s12 + $0x114] sm:$0xff] %v1684_v28  ;;  %1152 = vst [vmem:[%s2349_s12 + $0x164] sm:$0xf] %v1697_v29 }
 0x160   : > { %s2784_s14 = smov (!%p1166_p8, %s1165_s14), 32 }
 0x161   : > { %s1624_s23 = smul.u32 192, %s2784_s14 }
 0x163   : > { %p1628_p9 = scmp.eq.s32.totalorder %s1624_s23, 0 }
 0x164   : > { %s1179_s20 = scalar_lea.vmem (!%p1628_p9), %s2349_s12, 8 [#allocation2]   ;;  %s1180_s24 = scalar_lea.vmem (!%p1628_p9), %s2514_s22, 8  }
 0x165   : > { %1176 = sbr.rel (%p1628_p9) target bundleno = 466 (0x1d2), region = 40  ;;  %s2522_s25 = sshrl.u32 (!%p1628_p9), %s2784_s14, 5 }
 0x166   : > { %p1629_p10 = scmp.le.s32.totalorder (!%p1628_p9), %s2522_s25, 0 }
 0x16c   : > { %1456 = sbr.rel (%p1629_p10) target bundleno = 388 (0x184), region = 106  ;;  %s2774_s15 = smov (!%p1629_p10), %s2514_s22 }
 0x16d   : > { %s2775_s6 = smov (!%p1629_p10), %s2349_s12  ;;  %s2533_s26 = smov (!%p1629_p10), 0  }
 0x16e   : > { %s2535_s27 = smov (!%p1629_p10), 0  }
 0x173 LB: >> { %v1191_v2 = vld [vmem:[%s2071_s6] sm:$0xff]  ;;  %v1193_v15 = vld [vmem:[%s2071_s6 + $0xc] sm:$0xff]  ;;  %v1195_v34 = vld [vmem:[%s2071_s6 + $0x18] sm:$0xff]  ;;  %s1255_s28 = sadd.s32 1, %s2075_s26  ;;  %s1185_s27 = sadd.s32 1, %s2079_s27   ;;  %s2079_s27 = sphi %s2535_s27, %s1185_s27   ;;  %s2075_s26 = sphi %s2533_s26, %s2778_s26   ;;  %s2071_s6 = sphi %s2775_s6, %s2777_s6   ;;  %s2067_s15 = sphi %s2774_s15, %s2776_s15  }
 0x174   : >> { %1192 = vst [vmem:[%s2067_s15] sm:$0xff] %v1191_v2  ;;  %1194 = vst [vmem:[%s2067_s15 + $0xc] sm:$0xff] %v1193_v15  ;;  %v1197_v30 = vld [vmem:[%s2071_s6 + $0x24] sm:$0xff]  ;;  %v1199_v31 = vld [vmem:[%s2071_s6 + $0x30] sm:$0xff]  ;;  %p1256_p11 = scmp.ge.s32.totalorder %s1255_s28, %s2522_s25  ;;  %p1184_p12 = scmp.ge.s32.totalorder %s1185_s27, %s2522_s25 }
 0x175   : >> { %1196 = vst [vmem:[%s2067_s15 + $0x18] sm:$0xff] %v1195_v34  ;;  %v1201_v32 = vld [vmem:[%s2071_s6 + $0x3c] sm:$0xff]  ;;  %1198 = vst [vmem:[%s2067_s15 + $0x24] sm:$0xff] %v1197_v30  ;;  %v1203_v33 = vld [vmem:[%s2071_s6 + $0x48] sm:$0xff] }
 0x176   : >> { %1200 = vst [vmem:[%s2067_s15 + $0x30] sm:$0xff] %v1199_v31  ;;  %1202 = vst [vmem:[%s2067_s15 + $0x3c] sm:$0xff] %v1201_v32  ;;  %v1205_v11 = vld [vmem:[%s2071_s6 + $0x54] sm:$0xff]  ;;  %v1207_v35 = vld [vmem:[%s2071_s6 + $0x60] sm:$0xff]  ;;  %s2786_s28 = smov (%p1256_p11, %s1255_s28), 0 }
 0x177   : >> { %1204 = vst [vmem:[%s2067_s15 + $0x48] sm:$0xff] %v1203_v33  ;;  %1206 = vst [vmem:[%s2067_s15 + $0x54] sm:$0xff] %v1205_v11  ;;  %v1209_v36 = vld [vmem:[%s2071_s6 + $0x6c] sm:$0xff]  ;;  %v1211_v37 = vld [vmem:[%s2071_s6 + $0x78] sm:$0xff]  ;;  %s1258_s29 = smul.u32 384, %s2786_s28  ;;  %s2778_s26 = smov %s2786_s28 }
 0x178   : >> { %1208 = vst [vmem:[%s2067_s15 + $0x60] sm:$0xff] %v1207_v35  ;;  %v1213_v38 = vld [vmem:[%s2071_s6 + $0x84] sm:$0xff]  ;;  %1210 = vst [vmem:[%s2067_s15 + $0x6c] sm:$0xff] %v1209_v36  ;;  %v1215_v39 = vld [vmem:[%s2071_s6 + $0x90] sm:$0xff] }
 0x179   : >> { %1212 = vst [vmem:[%s2067_s15 + $0x78] sm:$0xff] %v1211_v37  ;;  %1214 = vst [vmem:[%s2067_s15 + $0x84] sm:$0xff] %v1213_v38  ;;  %v1217_v40 = vld [vmem:[%s2071_s6 + $0x9c] sm:$0xff]  ;;  %v1219_v41 = vld [vmem:[%s2071_s6 + $0xa8] sm:$0xff]  ;;  %s1260_s30 = scalar_lea.vmem %s2349_s12, %s1258_s29 [#allocation2]   ;;  %s1261_s4 = scalar_lea.vmem %s2514_s22, %s1258_s29  }
 0x17a   : >> { %1216 = vst [vmem:[%s2067_s15 + $0x90] sm:$0xff] %v1215_v39  ;;  %1218 = vst [vmem:[%s2067_s15 + $0x9c] sm:$0xff] %v1217_v40  ;;  %v1221_v42 = vld [vmem:[%s2071_s6 + $0xb4] sm:$0xff]  ;;  %v1223_v43 = vld [vmem:[%s2071_s6 + $0xc0] sm:$0xff] }
 0x17b   : >> { %1220 = vst [vmem:[%s2067_s15 + $0xa8] sm:$0xff] %v1219_v41  ;;  %v1225_v13 = vld [vmem:[%s2071_s6 + $0xcc] sm:$0xff]  ;;  %1222 = vst [vmem:[%s2067_s15 + $0xb4] sm:$0xff] %v1221_v42  ;;  %v1227_v44 = vld [vmem:[%s2071_s6 + $0xd8] sm:$0xff] }
 0x17c   : >> { %1224 = vst [vmem:[%s2067_s15 + $0xc0] sm:$0xff] %v1223_v43  ;;  %1226 = vst [vmem:[%s2067_s15 + $0xcc] sm:$0xff] %v1225_v13  ;;  %v1229_v45 = vld [vmem:[%s2071_s6 + $0xe4] sm:$0xff]  ;;  %v1231_v46 = vld [vmem:[%s2071_s6 + $0xf0] sm:$0xff] }
 0x17d   : >> { %1228 = vst [vmem:[%s2067_s15 + $0xd8] sm:$0xff] %v1227_v44  ;;  %1230 = vst [vmem:[%s2067_s15 + $0xe4] sm:$0xff] %v1229_v45  ;;  %v1233_v47 = vld [vmem:[%s2071_s6 + $0xfc] sm:$0xff]  ;;  %v1235_v48 = vld [vmem:[%s2071_s6 + $0x108] sm:$0xff]  ;;  %1187 = sbr.rel (!%p1184_p12) target bundleno = 371 (0x173), region = 112 }
 0x17e   : >> { %1232 = vst [vmem:[%s2067_s15 + $0xf0] sm:$0xff] %v1231_v46  ;;  %v1237_v49 = vld [vmem:[%s2071_s6 + $0x114] sm:$0xff]  ;;  %1234 = vst [vmem:[%s2067_s15 + $0xfc] sm:$0xff] %v1233_v47  ;;  %v1239_v50 = vld [vmem:[%s2071_s6 + $0x120] sm:$0xff] }
 0x17f   : >> { %1236 = vst [vmem:[%s2067_s15 + $0x108] sm:$0xff] %v1235_v48  ;;  %1238 = vst [vmem:[%s2067_s15 + $0x114] sm:$0xff] %v1237_v49  ;;  %v1241_v51 = vld [vmem:[%s2071_s6 + $0x12c] sm:$0xff]  ;;  %v1243_v52 = vld [vmem:[%s2071_s6 + $0x138] sm:$0xff] }
 0x180   : >> { %1240 = vst [vmem:[%s2067_s15 + $0x120] sm:$0xff] %v1239_v50  ;;  %1242 = vst [vmem:[%s2067_s15 + $0x12c] sm:$0xff] %v1241_v51  ;;  %v1245_v53 = vld [vmem:[%s2071_s6 + $0x144] sm:$0xff]  ;;  %v1247_v54 = vld [vmem:[%s2071_s6 + $0x150] sm:$0xff] }
 0x181   : >> { %1244 = vst [vmem:[%s2067_s15 + $0x138] sm:$0xff] %v1243_v52  ;;  %v1249_v55 = vld [vmem:[%s2071_s6 + $0x15c] sm:$0xff]  ;;  %1246 = vst [vmem:[%s2067_s15 + $0x144] sm:$0xff] %v1245_v53  ;;  %v1251_v56 = vld [vmem:[%s2071_s6 + $0x168] sm:$0xff] }
 0x182   : >> { %1248 = vst [vmem:[%s2067_s15 + $0x150] sm:$0xff] %v1247_v54  ;;  %1250 = vst [vmem:[%s2067_s15 + $0x15c] sm:$0xff] %v1249_v55  ;;  %v1253_v57 = vld [vmem:[%s2071_s6 + $0x174] sm:$0xff]  ;;  %s2777_s6 = smov %s1260_s30 }
 0x183   : >> { %1252 = vst [vmem:[%s2067_s15 + $0x168] sm:$0xff] %v1251_v56  ;;  %1254 = vst [vmem:[%s2067_s15 + $0x174] sm:$0xff] %v1253_v57  ;;  %s2776_s15 = smov %s1261_s4 }
 0x184 PF: > { %s2629_s5 = sand.u32 31, %s2784_s14   ;;  %s1631_s8 = smul.u32 384, %s2522_s25 }
 0x185   : > { %p1633_p13 = scmp.le.s32.totalorder %s2629_s5, 0 }
 0x186   : > { %s2633_s7 = scalar_lea.vmem %s2349_s12, %s1631_s8 [#allocation2]   ;;  %s2636_s9 = scalar_lea.vmem %s2514_s22, %s1631_s8  }
 0x187   : > { %1470 = sbr.rel (%p1633_p13) target bundleno = 408 (0x198), region = 117  ;;  %s2081_s10 = smov (!%p1633_p13), %s2636_s9  }
 0x188   : > { %s2085_s11 = smov (!%p1633_p13), %s2633_s7   ;;  %s2089_s17 = smov (!%p1633_p13), 0  }
 0x189   : > { %s2093_s18 = smov (!%p1633_p13), 0  }
 0x18e LB: >> { %v1278_v58 = vld [vmem:[%s2087_s11] sm:$0xff]  ;;  %s1280_s14 = sadd.s32 1, %s2091_s17  ;;  %s1272_s18 = sadd.s32 1, %s2095_s18   ;;  %s2095_s18 = sphi %s2093_s18, %s1272_s18   ;;  %s2091_s17 = sphi %s2089_s17, %s2090_s17   ;;  %s2087_s11 = sphi %s2085_s11, %s1285_s11   ;;  %s2083_s10 = sphi %s2081_s10, %s1286_s10  }
 0x18f   : >> { %1279 = vst [vmem:[%s2083_s10] sm:$0xff] %v1278_v58  ;;  %p1281_p0 = scmp.ge.s32.totalorder %s1280_s14, %s2629_s5  ;;  %p1271_p1 = scmp.ge.s32.totalorder %s1272_s18, %s2629_s5 }
 0x191   : >> { %s2788_s14 = smov (%p1281_p0, %s1280_s14), 0  ;;  %1274 = sbr.rel (!%p1271_p1) target bundleno = 398 (0x18e), region = 123 }
 0x192   : >> { %s1283_s21 = smul.u32 12, %s2788_s14  ;;  %s2090_s17 = smov %s2788_s14  }
 0x194   : >> { %s1285_s11 = scalar_lea.vmem %s2633_s7, %s1283_s21 [#allocation2]   ;;  %s1286_s10 = scalar_lea.vmem %s2636_s9, %s1283_s21  }
 0x198 PF: > { %1484 = sbr.rel (%p1629_p10) target bundleno = 448 (0x1c0), region = 128  ;;  %s2657_s23 = smov (!%p1629_p10), 0  }
 0x199   : > { %s2659_s15 = smov (!%p1629_p10), 0  }
 0x19f LB: >> { %v1298_v59 = vld [vmem:[%s2103_s20] sm:$0xf]  ;;  %v1300_v60 = vld [vmem:[%s2103_s20 + $0xc] sm:$0xf]  ;;  %v1302_v61 = vld [vmem:[%s2103_s20 + $0x18] sm:$0xf]  ;;  %s2111_s15 = sphi %s2659_s15, %s1292_s15   ;;  %s2107_s23 = sphi %s2657_s23, %s2779_s23   ;;  %s2103_s20 = sphi %s1179_s20, %s1433_s20   ;;  %s2099_s24 = sphi %s1180_s24, %s1436_s24  }
 0x1a0   : >> { %1299 = vst [vmem:[%s2099_s24] sm:$0xf] %v1298_v59  ;;  %1301 = vst [vmem:[%s2099_s24 + $0xc] sm:$0xf] %v1300_v60  ;;  %v1304_v62 = vld [vmem:[%s2103_s20 + $0x24] sm:$0xf]  ;;  %s1362_s6 = sadd.s32 1, %s2107_s23 }
 0x1a1   : >> { %1303 = vst [vmem:[%s2099_s24 + $0x18] sm:$0xf] %v1302_v61  ;;  %v1306_v63 = vld [vmem:[%s2103_s20 + $0x30] sm:$0xf]  ;;  %v1308_v0 = vld [vmem:[%s2103_s20 + $0x3c] sm:$0xf]  ;;  %p1363_p2 = scmp.ge.s32.totalorder %s1362_s6, %s2522_s25 }
 0x1a2   : >> { %1305 = vst [vmem:[%s2099_s24 + $0x24] sm:$0xf] %v1304_v62  ;;  %1307 = vst [vmem:[%s2099_s24 + $0x30] sm:$0xf] %v1306_v63  ;;  %v1310_v1 = vld [vmem:[%s2103_s20 + $0x48] sm:$0xf] }
 0x1a3   : >> { %1309 = vst [vmem:[%s2099_s24 + $0x3c] sm:$0xf] %v1308_v0  ;;  %v1312_v3 = vld [vmem:[%s2103_s20 + $0x54] sm:$0xf]  ;;  %v1314_v4 = vld [vmem:[%s2103_s20 + $0x60] sm:$0xf] }
 0x1a4   : >> { %1311 = vst [vmem:[%s2099_s24 + $0x48] sm:$0xf] %v1310_v1  ;;  %1313 = vst [vmem:[%s2099_s24 + $0x54] sm:$0xf] %v1312_v3  ;;  %v1316_v5 = vld [vmem:[%s2103_s20 + $0x6c] sm:$0xf] }
 0x1a5   : >> { %1315 = vst [vmem:[%s2099_s24 + $0x60] sm:$0xf] %v1314_v4  ;;  %v1318_v6 = vld [vmem:[%s2103_s20 + $0x78] sm:$0xf]  ;;  %v1320_v7 = vld [vmem:[%s2103_s20 + $0x84] sm:$0xf] }
 0x1a6   : >> { %1317 = vst [vmem:[%s2099_s24 + $0x6c] sm:$0xf] %v1316_v5  ;;  %1319 = vst [vmem:[%s2099_s24 + $0x78] sm:$0xf] %v1318_v6  ;;  %v1322_v8 = vld [vmem:[%s2103_s20 + $0x90] sm:$0xf] }
 0x1a7   : >> { %1321 = vst [vmem:[%s2099_s24 + $0x84] sm:$0xf] %v1320_v7  ;;  %v1324_v9 = vld [vmem:[%s2103_s20 + $0x9c] sm:$0xf]  ;;  %v1326_v10 = vld [vmem:[%s2103_s20 + $0xa8] sm:$0xf] }
 0x1a8   : >> { %1323 = vst [vmem:[%s2099_s24 + $0x90] sm:$0xf] %v1322_v8  ;;  %1325 = vst [vmem:[%s2099_s24 + $0x9c] sm:$0xf] %v1324_v9  ;;  %v1328_v12 = vld [vmem:[%s2103_s20 + $0xb4] sm:$0xf] }
 0x1a9   : >> { %1327 = vst [vmem:[%s2099_s24 + $0xa8] sm:$0xf] %v1326_v10  ;;  %v1330_v14 = vld [vmem:[%s2103_s20 + $0xc0] sm:$0xf]  ;;  %v1332_v16 = vld [vmem:[%s2103_s20 + $0xcc] sm:$0xf] }
 0x1aa   : >> { %1329 = vst [vmem:[%s2099_s24 + $0xb4] sm:$0xf] %v1328_v12  ;;  %1331 = vst [vmem:[%s2099_s24 + $0xc0] sm:$0xf] %v1330_v14  ;;  %v1334_v17 = vld [vmem:[%s2103_s20 + $0xd8] sm:$0xf] }
 0x1ab   : >> { %1333 = vst [vmem:[%s2099_s24 + $0xcc] sm:$0xf] %v1332_v16  ;;  %v1336_v18 = vld [vmem:[%s2103_s20 + $0xe4] sm:$0xf]  ;;  %v1338_v19 = vld [vmem:[%s2103_s20 + $0xf0] sm:$0xf] }
 0x1ac   : >> { %1335 = vst [vmem:[%s2099_s24 + $0xd8] sm:$0xf] %v1334_v17  ;;  %1337 = vst [vmem:[%s2099_s24 + $0xe4] sm:$0xf] %v1336_v18  ;;  %v1340_v20 = vld [vmem:[%s2103_s20 + $0xfc] sm:$0xf] }
 0x1ad   : >> { %1339 = vst [vmem:[%s2099_s24 + $0xf0] sm:$0xf] %v1338_v19  ;;  %v1342_v21 = vld [vmem:[%s2103_s20 + $0x108] sm:$0xf]  ;;  %v1344_v22 = vld [vmem:[%s2103_s20 + $0x114] sm:$0xf] }
 0x1ae   : >> { %1341 = vst [vmem:[%s2099_s24 + $0xfc] sm:$0xf] %v1340_v20  ;;  %1343 = vst [vmem:[%s2099_s24 + $0x108] sm:$0xf] %v1342_v21  ;;  %v1346_v23 = vld [vmem:[%s2103_s20 + $0x120] sm:$0xf] }
 0x1af   : >> { %1345 = vst [vmem:[%s2099_s24 + $0x114] sm:$0xf] %v1344_v22  ;;  %v1348_v24 = vld [vmem:[%s2103_s20 + $0x12c] sm:$0xf]  ;;  %v1350_v25 = vld [vmem:[%s2103_s20 + $0x138] sm:$0xf] }
 0x1b0   : >> { %1347 = vst [vmem:[%s2099_s24 + $0x120] sm:$0xf] %v1346_v23  ;;  %1349 = vst [vmem:[%s2099_s24 + $0x12c] sm:$0xf] %v1348_v24  ;;  %v1352_v26 = vld [vmem:[%s2103_s20 + $0x144] sm:$0xf] }
 0x1b1   : >> { %1351 = vst [vmem:[%s2099_s24 + $0x138] sm:$0xf] %v1350_v25  ;;  %v1354_v27 = vld [vmem:[%s2103_s20 + $0x150] sm:$0xf]  ;;  %v1356_v28 = vld [vmem:[%s2103_s20 + $0x15c] sm:$0xf] }
 0x1b2   : >> { %1353 = vst [vmem:[%s2099_s24 + $0x144] sm:$0xf] %v1352_v26  ;;  %1355 = vst [vmem:[%s2099_s24 + $0x150] sm:$0xf] %v1354_v27  ;;  %v1358_v29 = vld [vmem:[%s2103_s20 + $0x168] sm:$0xf] }
 0x1b3   : >> { %1357 = vst [vmem:[%s2099_s24 + $0x15c] sm:$0xf] %v1356_v28  ;;  %v1360_v2 = vld [vmem:[%s2103_s20 + $0x174] sm:$0xf]  ;;  %1359 = vst [vmem:[%s2099_s24 + $0x168] sm:$0xf] %v1358_v29 }
 0x1b4   : >> { %1361 = vst [vmem:[%s2099_s24 + $0x174] sm:$0xf] %v1360_v2  ;;  %s2790_s6 = smov (%p1363_p2, %s1362_s6), 0  ;;  %s1292_s15 = sadd.s32 1, %s2111_s15  }
 0x1b5   : >> { %s1431_s26 = smul.u32 384, %s2790_s6  ;;  %p1291_p3 = scmp.ge.s32.totalorder %s1292_s15, %s2522_s25 }
 0x1b6   : >> { %s2779_s23 = smov %s2790_s6 }
 0x1b7   : >> { %s1432_s27 = scalar_lea.vmem %s2349_s12, %s1431_s26 [#allocation2]  ;;  %s1435_s28 = scalar_lea.vmem %s2514_s22, %s1431_s26 }
 0x1b8   : >> { %s1433_s20 = scalar_lea.vmem %s1432_s27, 8 [#allocation2]   ;;  %s1436_s24 = scalar_lea.vmem %s1435_s28, 8  }
 0x1b9   : > { %1294 = sbr.rel (!%p1291_p3) target bundleno = 415 (0x19f), region = 134 }
 0x1c0 PF: > { %s1439_s29 = scalar_lea.vmem %s2633_s7, 8 [#allocation2]   ;;  %s1442_s30 = scalar_lea.vmem %s2636_s9, 8  }
 0x1c1   : > { %1498 = sbr.rel (%p1633_p13) target bundleno = 466 (0x1d2), region = 139  ;;  %s2113_s4 = smov (!%p1633_p13), %s1442_s30  }
 0x1c2   : > { %s2117_s8 = smov (!%p1633_p13), %s1439_s29   ;;  %s2121_s10 = smov (!%p1633_p13), 0  }
 0x1c3   : > { %s2125_s11 = smov (!%p1633_p13), 0  }
 0x1c8 LB: >> { %v1385_v15 = vld [vmem:[%s2119_s8] sm:$0xf]  ;;  %s1387_s12 = sadd.s32 1, %s2123_s10  ;;  %s1379_s11 = sadd.s32 1, %s2127_s11   ;;  %s2127_s11 = sphi %s2125_s11, %s1379_s11   ;;  %s2123_s10 = sphi %s2121_s10, %s2122_s10   ;;  %s2119_s8 = sphi %s2117_s8, %s1445_s8   ;;  %s2115_s4 = sphi %s2113_s4, %s1448_s4  }
 0x1c9   : >> { %1386 = vst [vmem:[%s2115_s4] sm:$0xf] %v1385_v15  ;;  %p1388_p4 = scmp.ge.s32.totalorder %s1387_s12, %s2629_s5  ;;  %p1378_p5 = scmp.ge.s32.totalorder %s1379_s11, %s2629_s5 }
 0x1cb   : >> { %s2792_s12 = smov (%p1388_p4, %s1387_s12), 0  ;;  %1381 = sbr.rel (!%p1378_p5) target bundleno = 456 (0x1c8), region = 145 }
 0x1cc   : >> { %s1443_s22 = smul.u32 12, %s2792_s12  ;;  %s2122_s10 = smov %s2792_s12  }
 0x1ce   : >> { %s1444_s20 = scalar_lea.vmem %s2633_s7, %s1443_s22 [#allocation2]  ;;  %s1447_s24 = scalar_lea.vmem %s2636_s9, %s1443_s22 }
 0x1cf   : >> { %s1445_s8 = scalar_lea.vmem %s1444_s20, 8 [#allocation2]   ;;  %s1448_s4 = scalar_lea.vmem %s1447_s24, 8  }
 0x1d2 PF: > { %p10_p6 = scmp.ge.s32.totalorder %s2165_s16, 5   ;;  %s2780_s12 = smov %s2059_s13 }
 0x1d3   : > { %s2781_s13 = smov %s2173_s19  ;;  %s2782_s14 = smov %s2165_s16 }
 0x1d4   :  { %12 = sbr.rel (!%p10_p6) target bundleno = 2 (0x2), region = 156 }

// kernel: sablock_forward.8
= control target key start
LH: loop header
LB: loop body
LE: loop exit
PB: predicated region body
PF: predicated region fallthrough
CT: control target
= control target key end

     0   :  { %s585_s15 = smov 0   ;;  %s786_s0 = inlined_call_operand.vmem [shape: f32[512,128], index: 0, kind: input, shape index: {}]   ;;  %s787_s1 = inlined_call_operand.vmem [shape: f32[512,128], index: 1, kind: input, shape index: {}]   ;;  %s788_s2 = inlined_call_operand.vmem [shape: f32[1,128], index: 2, kind: input, shape index: {}]   ;;  %s789_s3 = inlined_call_operand.vmem [shape: f32[1,128], index: 3, kind: input, shape index: {}]   ;;  %s790_s4 = inlined_call_operand.vmem [shape: f32[512,128], index: 4, kind: output, shape index: {}]  }
   0x1 LB: > { %s529_s16 = sadd.s32 4294967295, %s558_s15   ;;  %p533_p0 = scmp.ge.s32.totalorder %s558_s15, 1  ;;  %s558_s15 = sphi %s585_s15, %s14_s15  }
   0x2   : > { %p174_p1 = scmp.lt.s32.totalorder %s558_s15, 3 }
   0x4   : > { %p175_p2 = pnand %p533_p0, %p174_p1 }
   0x5   : > { %s534_s17 = sshll.u32 (!%p175_p2), %s529_s16, 5  ;;  %v598_v0 = vld [vmem:[%s788_s2] ss:$0 sm:$0xff] (!%p175_p2) }
   0x6   : > { %178 = sbr.rel (%p175_p2) target bundleno = 55 (0x37), region = 36  ;;  %p206_p3 = scmp.lt.s32.totalorder (!%p175_p2), %s534_s17, 63  ;;  %v616_v2 = vld [vmem:[%s789_s3] ss:$0 sm:$0xff] (!%p175_p2) }
   0xd   : > { %s792_s17 = smov (!%p206_p3, %s534_s17), 63 }
   0xe   : > { %s593_s18 = sshll.u32 %s792_s17, 3 }
   0xf   : > { %s604_s23 = scalar_lea.vmem %s786_s0, %s593_s18  ;;  %s610_s26 = scalar_lea.vmem %s787_s1, %s593_s18 }
  0x10   : > { %v223_v1 = vld [vmem:[%s604_s23] sm:$0xff]  ;;  %v224_v3 = vld [vmem:[%s604_s23 + $0x8] sm:$0xff]  ;;  %v225_v7 = vld [vmem:[%s604_s23 + $0x10] sm:$0xff]  ;;  %s646_s5 = scalar_lea.vmem %s790_s4, %s593_s18 }
  0x11   : > { %v262_v4 = vmul.f32 %v598_v0, %v223_v1  ;;  %v333_v5 = vld [vmem:[%s610_s26] sm:$0xff]  ;;  %v263_v6 = vmul.f32 %v598_v0, %v224_v3  ;;  %v334_v8 = vld [vmem:[%s610_s26 + $0x8] sm:$0xff]  ;;  %v264_v9 = vmul.f32 %v598_v0, %v225_v7  ;;  %v226_v10 = vld [vmem:[%s604_s23 + $0x18] sm:$0xff] }
  0x12   : > { %v227_v11 = vld [vmem:[%s604_s23 + $0x20] sm:$0xff]  ;;  %v335_v14 = vld [vmem:[%s610_s26 + $0x10] sm:$0xff]  ;;  %v265_v15 = vmul.f32 %v598_v0, %v226_v10  ;;  %v336_v16 = vld [vmem:[%s610_s26 + $0x18] sm:$0xff] }
  0x13   : > { %v301_v12 = vadd.f32 %v616_v2, %v262_v4  ;;  %v302_v13 = vadd.f32 %v616_v2, %v263_v6  ;;  %v266_v17 = vmul.f32 %v598_v0, %v227_v11  ;;  %v228_v18 = vld [vmem:[%s604_s23 + $0x28] sm:$0xff]  ;;  %v303_v19 = vadd.f32 %v616_v2, %v264_v9  ;;  %v337_v20 = vld [vmem:[%s610_s26 + $0x20] sm:$0xff]  ;;  %v229_v22 = vld [vmem:[%s604_s23 + $0x30] sm:$0xff] }
  0x14   : > { %v267_v21 = vmul.f32 %v598_v0, %v228_v18  ;;  %v230_v23 = vld [vmem:[%s604_s23 + $0x38] sm:$0xff]  ;;  %v304_v26 = vadd.f32 %v616_v2, %v265_v15  ;;  %v338_v28 = vld [vmem:[%s610_s26 + $0x28] sm:$0xff]  ;;  %v268_v31 = vmul.f32 %v598_v0, %v229_v22  ;;  %v231_v33 = vld [vmem:[%s604_s23 + $0x40] sm:$0xff] }
  0x15   : > { %v365_v24 = vadd.f32 %v333_v5, %v301_v12  ;;  %v366_v25 = vadd.f32 %v334_v8, %v302_v13  ;;  %v305_v27 = vadd.f32 %v616_v2, %v266_v17  ;;  %v367_v29 = vadd.f32 %v335_v14, %v303_v19  ;;  %v232_v34 = vld [vmem:[%s604_s23 + $0x48] sm:$0xff]  ;;  %v339_v39 = vld [vmem:[%s610_s26 + $0x30] sm:$0xff]  ;;  %v340_v40 = vld [vmem:[%s610_s26 + $0x38] sm:$0xff] }
  0x16   : > { %v306_v30 = vadd.f32 %v616_v2, %v267_v21  ;;  %v269_v32 = vmul.f32 %v598_v0, %v230_v23  ;;  %v368_v37 = vadd.f32 %v336_v16, %v304_v26  ;;  %v233_v41 = vld [vmem:[%s604_s23 + $0x50] sm:$0xff]  ;;  %v307_v44 = vadd.f32 %v616_v2, %v268_v31  ;;  %v234_v46 = vld [vmem:[%s604_s23 + $0x58] sm:$0xff]  ;;  %v235_v47 = vld [vmem:[%s604_s23 + $0x60] sm:$0xff] }
  0x17   : > { %v397_v35 = vmax.f32 %v365_v24, 0.0  ;;  %v398_v36 = vmax.f32 %v366_v25, 0.0  ;;  %v369_v38 = vadd.f32 %v337_v20, %v305_v27  ;;  %v399_v42 = vmax.f32 %v367_v29, 0.0  ;;  %v236_v52 = vld [vmem:[%s604_s23 + $0x68] sm:$0xff]  ;;  %v341_v56 = vld [vmem:[%s610_s26 + $0x40] sm:$0xff]  ;;  %v343_v61 = vld [vmem:[%s610_s26 + $0x50] sm:$0xff] }
  0x18   : > { %v370_v43 = vadd.f32 %v338_v28, %v306_v30  ;;  %v308_v45 = vadd.f32 %v616_v2, %v269_v32  ;;  %v400_v48 = vmax.f32 %v368_v37, 0.0  ;;  %v270_v50 = vmul.f32 %v598_v0, %v231_v33  ;;  %v342_v57 = vld [vmem:[%s610_s26 + $0x48] sm:$0xff]  ;;  %v237_v1 = vld [vmem:[%s604_s23 + $0x70] sm:$0xff]  ;;  %v238_v3 = vld [vmem:[%s604_s23 + $0x78] sm:$0xff] }
  0x19   : > { %429 = vst [vmem:[%s646_s5] sm:$0xff] %v397_v35  ;;  %430 = vst [vmem:[%s646_s5 + $0x8] sm:$0xff] %v398_v36  ;;  %v401_v49 = vmax.f32 %v369_v38, 0.0  ;;  %v271_v51 = vmul.f32 %v598_v0, %v232_v34  ;;  %v371_v54 = vadd.f32 %v339_v39, %v307_v44  ;;  %v272_v58 = vmul.f32 %v598_v0, %v233_v41  ;;  %v344_v7 = vld [vmem:[%s610_s26 + $0x58] sm:$0xff]  ;;  %v345_v8 = vld [vmem:[%s610_s26 + $0x60] sm:$0xff] }
  0x1a   : > { %431 = vst [vmem:[%s646_s5 + $0x10] sm:$0xff] %v399_v42  ;;  %v402_v53 = vmax.f32 %v370_v43, 0.0  ;;  %v372_v55 = vadd.f32 %v340_v40, %v308_v45  ;;  %432 = vst [vmem:[%s646_s5 + $0x18] sm:$0xff] %v400_v48  ;;  %v309_v59 = vadd.f32 %v616_v2, %v270_v50  ;;  %v273_v62 = vmul.f32 %v598_v0, %v234_v46  ;;  %v346_v14 = vld [vmem:[%s610_s26 + $0x68] sm:$0xff]  ;;  %v239_v19 = vld [vmem:[%s604_s23 + $0x80] sm:$0xff] }
  0x1b   : > { %433 = vst [vmem:[%s646_s5 + $0x20] sm:$0xff] %v401_v49  ;;  %v310_v60 = vadd.f32 %v616_v2, %v271_v51  ;;  %v274_v63 = vmul.f32 %v598_v0, %v235_v47  ;;  %v403_v4 = vmax.f32 %v371_v54, 0.0  ;;  %v311_v6 = vadd.f32 %v616_v2, %v272_v58  ;;  %v240_v20 = vld [vmem:[%s604_s23 + $0x88] sm:$0xff]  ;;  %v347_v25 = vld [vmem:[%s610_s26 + $0x70] sm:$0xff]  ;;  %v348_v26 = vld [vmem:[%s610_s26 + $0x78] sm:$0xff] }
  0x1c   : > { %434 = vst [vmem:[%s646_s5 + $0x28] sm:$0xff] %v402_v53  ;;  %v404_v5 = vmax.f32 %v372_v55, 0.0  ;;  %v275_v9 = vmul.f32 %v598_v0, %v236_v52  ;;  %v373_v10 = vadd.f32 %v341_v56, %v309_v59  ;;  %v312_v12 = vadd.f32 %v616_v2, %v273_v62  ;;  %v241_v27 = vld [vmem:[%s604_s23 + $0x90] sm:$0xff]  ;;  %v242_v32 = vld [vmem:[%s604_s23 + $0x98] sm:$0xff]  ;;  %v243_v33 = vld [vmem:[%s604_s23 + $0xa0] sm:$0xff] }
  0x1d   : > { %v374_v11 = vadd.f32 %v342_v57, %v310_v60  ;;  %v313_v13 = vadd.f32 %v616_v2, %v274_v63  ;;  %435 = vst [vmem:[%s646_s5 + $0x30] sm:$0xff] %v403_v4  ;;  %v375_v15 = vadd.f32 %v343_v61, %v311_v6  ;;  %v276_v17 = vmul.f32 %v598_v0, %v237_v1  ;;  %v244_v38 = vld [vmem:[%s604_s23 + $0xa8] sm:$0xff]  ;;  %v349_v42 = vld [vmem:[%s610_s26 + $0x80] sm:$0xff]  ;;  %v351_v47 = vld [vmem:[%s610_s26 + $0x90] sm:$0xff] }
  0x1e   : > { %436 = vst [vmem:[%s646_s5 + $0x38] sm:$0xff] %v404_v5  ;;  %v314_v16 = vadd.f32 %v616_v2, %v275_v9  ;;  %v277_v18 = vmul.f32 %v598_v0, %v238_v3  ;;  %v405_v21 = vmax.f32 %v373_v10, 0.0  ;;  %v376_v23 = vadd.f32 %v344_v7, %v312_v12  ;;  %v350_v43 = vld [vmem:[%s610_s26 + $0x88] sm:$0xff]  ;;  %v245_v50 = vld [vmem:[%s604_s23 + $0xb0] sm:$0xff]  ;;  %v246_v51 = vld [vmem:[%s604_s23 + $0xb8] sm:$0xff] }
  0x1f   : > { %v406_v22 = vmax.f32 %v374_v11, 0.0  ;;  %v377_v24 = vadd.f32 %v345_v8, %v313_v13  ;;  %v407_v28 = vmax.f32 %v375_v15, 0.0  ;;  %v315_v30 = vadd.f32 %v616_v2, %v276_v17  ;;  %v352_v55 = vld [vmem:[%s610_s26 + $0x98] sm:$0xff]  ;;  %v353_v56 = vld [vmem:[%s610_s26 + $0xa0] sm:$0xff]  ;;  %v354_v62 = vld [vmem:[%s610_s26 + $0xa8] sm:$0xff] }
  0x20   : > { %v378_v29 = vadd.f32 %v346_v14, %v314_v16  ;;  %v316_v31 = vadd.f32 %v616_v2, %v277_v18  ;;  %437 = vst [vmem:[%s646_s5 + $0x40] sm:$0xff] %v405_v21  ;;  %v408_v34 = vmax.f32 %v376_v23, 0.0  ;;  %v278_v36 = vmul.f32 %v598_v0, %v239_v19  ;;  %v247_v5 = vld [vmem:[%s604_s23 + $0xc0] sm:$0xff]  ;;  %v248_v6 = vld [vmem:[%s604_s23 + $0xc8] sm:$0xff]  ;;  %v355_v11 = vld [vmem:[%s610_s26 + $0xb0] sm:$0xff] }
  0x21   : > { %438 = vst [vmem:[%s646_s5 + $0x48] sm:$0xff] %v406_v22  ;;  %v409_v35 = vmax.f32 %v377_v24, 0.0  ;;  %v279_v37 = vmul.f32 %v598_v0, %v240_v20  ;;  %439 = vst [vmem:[%s646_s5 + $0x50] sm:$0xff] %v407_v28  ;;  %v379_v40 = vadd.f32 %v347_v25, %v315_v30  ;;  %v280_v44 = vmul.f32 %v598_v0, %v241_v27  ;;  %v356_v12 = vld [vmem:[%s610_s26 + $0xb8] sm:$0xff]  ;;  %v249_v13 = vld [vmem:[%s604_s23 + $0xd0] sm:$0xff] }
  0x22   : > { %v410_v39 = vmax.f32 %v378_v29, 0.0  ;;  %v380_v41 = vadd.f32 %v348_v26, %v316_v31  ;;  %440 = vst [vmem:[%s646_s5 + $0x58] sm:$0xff] %v408_v34  ;;  %v317_v45 = vadd.f32 %v616_v2, %v278_v36  ;;  %v281_v48 = vmul.f32 %v598_v0, %v242_v32  ;;  %v250_v18 = vld [vmem:[%s604_s23 + $0xd8] sm:$0xff]  ;;  %v251_v19 = vld [vmem:[%s604_s23 + $0xe0] sm:$0xff]  ;;  %v252_v24 = vld [vmem:[%s604_s23 + $0xe8] sm:$0xff] }
  0x23   : > { %441 = vst [vmem:[%s646_s5 + $0x60] sm:$0xff] %v409_v35  ;;  %v318_v46 = vadd.f32 %v616_v2, %v279_v37  ;;  %v282_v49 = vmul.f32 %v598_v0, %v243_v33  ;;  %v411_v52 = vmax.f32 %v379_v40, 0.0  ;;  %v319_v54 = vadd.f32 %v616_v2, %v280_v44  ;;  %v357_v28 = vld [vmem:[%s610_s26 + $0xc0] sm:$0xff]  ;;  %v358_v29 = vld [vmem:[%s610_s26 + $0xc8] sm:$0xff]  ;;  %v359_v33 = vld [vmem:[%s610_s26 + $0xd0] sm:$0xff] }
  0x24   : > { %442 = vst [vmem:[%s646_s5 + $0x68] sm:$0xff] %v410_v39  ;;  %v412_v53 = vmax.f32 %v380_v41, 0.0  ;;  %v283_v57 = vmul.f32 %v598_v0, %v244_v38  ;;  %v381_v58 = vadd.f32 %v349_v42, %v317_v45  ;;  %v320_v60 = vadd.f32 %v616_v2, %v281_v48  ;;  %v253_v36 = vld [vmem:[%s604_s23 + $0xf0] sm:$0xff]  ;;  %v254_v37 = vld [vmem:[%s604_s23 + $0xf8] sm:$0xff]  ;;  %v361_v42 = vld [vmem:[%s610_s26 + $0xe0] sm:$0xff] }
  0x25   : > { %v382_v59 = vadd.f32 %v350_v43, %v318_v46  ;;  %v321_v61 = vadd.f32 %v616_v2, %v282_v49  ;;  %443 = vst [vmem:[%s646_s5 + $0x70] sm:$0xff] %v411_v52  ;;  %v383_v63 = vadd.f32 %v351_v47, %v319_v54  ;;  %v284_v3 = vmul.f32 %v598_v0, %v245_v50  ;;  %v360_v41 = vld [vmem:[%s610_s26 + $0xd8] sm:$0xff]  ;;  %v362_v48 = vld [vmem:[%s610_s26 + $0xe8] sm:$0xff] }
  0x26   : > { %444 = vst [vmem:[%s646_s5 + $0x78] sm:$0xff] %v412_v53  ;;  %v322_v1 = vadd.f32 %v616_v2, %v283_v57  ;;  %v285_v4 = vmul.f32 %v598_v0, %v246_v51  ;;  %v413_v7 = vmax.f32 %v381_v58, 0.0  ;;  %v384_v9 = vadd.f32 %v352_v55, %v320_v60  ;;  %v363_v57 = vld [vmem:[%s610_s26 + $0xf0] sm:$0xff]  ;;  %v364_v58 = vld [vmem:[%s610_s26 + $0xf8] sm:$0xff] }
  0x27   : > { %v414_v8 = vmax.f32 %v382_v59, 0.0  ;;  %v385_v10 = vadd.f32 %v353_v56, %v321_v61  ;;  %v415_v14 = vmax.f32 %v383_v63, 0.0  ;;  %v323_v16 = vadd.f32 %v616_v2, %v284_v3 }
  0x28   : > { %v386_v15 = vadd.f32 %v354_v62, %v322_v1  ;;  %v324_v17 = vadd.f32 %v616_v2, %v285_v4  ;;  %445 = vst [vmem:[%s646_s5 + $0x80] sm:$0xff] %v413_v7  ;;  %v416_v20 = vmax.f32 %v384_v9, 0.0  ;;  %v286_v22 = vmul.f32 %v598_v0, %v247_v5 }
  0x29   : > { %446 = vst [vmem:[%s646_s5 + $0x88] sm:$0xff] %v414_v8  ;;  %v417_v21 = vmax.f32 %v385_v10, 0.0  ;;  %v287_v23 = vmul.f32 %v598_v0, %v248_v6  ;;  %447 = vst [vmem:[%s646_s5 + $0x90] sm:$0xff] %v415_v14  ;;  %v387_v26 = vadd.f32 %v355_v11, %v323_v16  ;;  %v288_v30 = vmul.f32 %v598_v0, %v249_v13 }
  0x2a   : > { %v418_v25 = vmax.f32 %v386_v15, 0.0  ;;  %v388_v27 = vadd.f32 %v356_v12, %v324_v17  ;;  %448 = vst [vmem:[%s646_s5 + $0x98] sm:$0xff] %v416_v20  ;;  %v325_v31 = vadd.f32 %v616_v2, %v286_v22  ;;  %v289_v34 = vmul.f32 %v598_v0, %v250_v18 }
  0x2b   : > { %449 = vst [vmem:[%s646_s5 + $0xa0] sm:$0xff] %v417_v21  ;;  %v326_v32 = vadd.f32 %v616_v2, %v287_v23  ;;  %v290_v35 = vmul.f32 %v598_v0, %v251_v19  ;;  %v419_v38 = vmax.f32 %v387_v26, 0.0  ;;  %v327_v40 = vadd.f32 %v616_v2, %v288_v30 }
  0x2c   : > { %450 = vst [vmem:[%s646_s5 + $0xa8] sm:$0xff] %v418_v25  ;;  %v420_v39 = vmax.f32 %v388_v27, 0.0  ;;  %v291_v43 = vmul.f32 %v598_v0, %v252_v24  ;;  %v389_v44 = vadd.f32 %v357_v28, %v325_v31  ;;  %v328_v46 = vadd.f32 %v616_v2, %v289_v34 }
  0x2d   : > { %v390_v45 = vadd.f32 %v358_v29, %v326_v32  ;;  %v329_v47 = vadd.f32 %v616_v2, %v290_v35  ;;  %451 = vst [vmem:[%s646_s5 + $0xb0] sm:$0xff] %v419_v38  ;;  %v391_v49 = vadd.f32 %v359_v33, %v327_v40  ;;  %v292_v51 = vmul.f32 %v598_v0, %v253_v36 }
  0x2e   : > { %452 = vst [vmem:[%s646_s5 + $0xb8] sm:$0xff] %v420_v39  ;;  %v330_v50 = vadd.f32 %v616_v2, %v291_v43  ;;  %v293_v52 = vmul.f32 %v598_v0, %v254_v37  ;;  %v421_v53 = vmax.f32 %v389_v44, 0.0  ;;  %v392_v55 = vadd.f32 %v360_v41, %v328_v46 }
  0x2f   : > { %v422_v54 = vmax.f32 %v390_v45, 0.0  ;;  %v393_v56 = vadd.f32 %v361_v42, %v329_v47  ;;  %v423_v59 = vmax.f32 %v391_v49, 0.0  ;;  %v331_v61 = vadd.f32 %v616_v2, %v292_v51 }
  0x30   : > { %v394_v60 = vadd.f32 %v362_v48, %v330_v50  ;;  %v332_v62 = vadd.f32 %v616_v2, %v293_v52  ;;  %453 = vst [vmem:[%s646_s5 + $0xc0] sm:$0xff] %v421_v53  ;;  %v424_v0 = vmax.f32 %v392_v55, 0.0 }
  0x31   : > { %454 = vst [vmem:[%s646_s5 + $0xc8] sm:$0xff] %v422_v54  ;;  %v425_v63 = vmax.f32 %v393_v56, 0.0  ;;  %455 = vst [vmem:[%s646_s5 + $0xd0] sm:$0xff] %v423_v59  ;;  %v395_v3 = vadd.f32 %v363_v57, %v331_v61 }
  0x32   : > { %v426_v1 = vmax.f32 %v394_v60, 0.0  ;;  %v396_v4 = vadd.f32 %v364_v58, %v332_v62  ;;  %456 = vst [vmem:[%s646_s5 + $0xd8] sm:$0xff] %v424_v0 }
  0x33   : > { %457 = vst [vmem:[%s646_s5 + $0xe0] sm:$0xff] %v425_v63  ;;  %v427_v5 = vmax.f32 %v395_v3, 0.0 }
  0x34   : > { %458 = vst [vmem:[%s646_s5 + $0xe8] sm:$0xff] %v426_v1  ;;  %v428_v6 = vmax.f32 %v396_v4, 0.0 }
  0x35   : > { %459 = vst [vmem:[%s646_s5 + $0xf0] sm:$0xff] %v427_v5 }
  0x36   : > { %460 = vst [vmem:[%s646_s5 + $0xf8] sm:$0xff] %v428_v6 }
  0x37 PF: > { %s14_s15 = sadd.s32 1, %s558_s15  }
  0x38   : > { %p11_p4 = scmp.ge.s32.totalorder %s14_s15, 4  }
  0x3a   :  { %13 = sbr.rel (!%p11_p4) target bundleno = 1 (0x1), region = 69 }

// kernel: sablock_forward.7
= control target key start
LH: loop header
LB: loop body
LE: loop exit
PB: predicated region body
PF: predicated region fallthrough
CT: control target
= control target key end

     0   :  { %s1230_s15 = smov 0   ;;  %s1232_s16 = smov 0   ;;  %s1682_s0 = inlined_call_operand.vmem [shape: bf16[2,18,18,384], index: 0, kind: input, shape index: {}]   ;;  %s1683_s1 = inlined_call_operand.vmem [shape: f32[9,128], index: 1, kind: input, shape index: {}]   ;;  %s1684_s2 = inlined_call_operand.vmem [shape: f32[2,16,16,128], index: 2, kind: output, shape index: {0}]   ;;  %s1685_s3 = inlined_call_operand.vmem [shape: f32[2,2,8,128], index: 3, kind: output, shape index: {1}]   ;;  %s1686_s4 = inlined_call_operand.vmem [shape: f32[2,2,8,128], index: 4, kind: output, shape index: {2}]  }
   0x1   :  { %s1234_s17 = smov 0   ;;  %s1236_s18 = smov 0  }
   0x2   :  { %s1238_s19 = smov 0  }
   0x3 LB: > { %s24_s20 = sadd.s32 1, %s1183_s17  ;;  %s27_s21 = sadd.s32 1, %s1187_s18  ;;  %s1191_s19 = sphi %s1238_s19, %s15_s19   ;;  %s1187_s18 = sphi %s1236_s18, %s1696_s18   ;;  %s1183_s17 = sphi %s1234_s17, %s1695_s17   ;;  %s1179_s16 = sphi %s1232_s16, %s1694_s16   ;;  %s1175_s15 = sphi %s1230_s15, %s1693_s15  }
   0x4   : > { %p25_p0 = scmp.ge.s32.totalorder %s24_s20, 2  ;;  %p982_p1 = scmp.ge.s32.totalorder %s1191_s19, 1 }
   0x5   : > { %p185_p2 = scmp.lt.s32.totalorder %s1191_s19, 5 }
   0x6   : > { %s1698_s20 = smov (%p25_p0, %s24_s20), 0  ;;  %s1700_s21 = smov (!%p25_p0, %s27_s21), %s1187_s18 }
   0x7   : > { %p186_p3 = pnand %p982_p1, %p185_p2  ;;  %p29_p4 = scmp.ge.s32.totalorder %s1700_s21, 2 }
   0x8   : > { %p232_p5 = scmp.lt.s32.totalorder (!%p186_p3), %s1179_s16, 1  ;;  %s1263_s22 = sshll.u32 (!%p186_p3), %s1175_s15, 3  ;;  %v1268_v0 = vld [vmem:[%s1683_s1] sm:$0xff] (!%p186_p3)  ;;  %v1273_v1 = vld [vmem:[%s1683_s1 + $0x8] ss:$0 sm:$0xff] (!%p186_p3)  ;;  %v1299_v2 = vmov (!%p186_p3), 0.0  }
   0x9   : > { %s1702_s21 = smov (%p29_p4, %s1700_s21), 0  ;;  %189 = sbr.rel (%p186_p3) target bundleno = 145 (0x91), region = 28 }
   0xa   : > { %p240_p6 = scmp.lt.s32.totalorder (!%p186_p3), %s1263_s22, 15  ;;  %p250_p7 = scmp.lt.s32.totalorder (!%p186_p3), %s1175_s15, 1  ;;  %v1301_v3 = vmov (!%p186_p3), 0.0  }
  0x10   : > { %s1704_s16 = smov (!%p232_p5, %s1179_s16), 1  ;;  %s1706_s15 = smov (!%p250_p7, %s1175_s15), 1 }
  0x11   : > { %s241_s27 = scalar_select %p240_p6, %s1263_s22, 15 }
  0x12   : > { %s1016_s28 = smul.u32 648, %s1704_s16  ;;  %s986_s29 = sshll.u32 %s1704_s16, 5 }
  0x13   : > { %s985_s30 = sshll.u32 %s241_s27, 1  ;;  %s988_s13 = sshll.u32 %s1704_s16, 1 }
  0x14   : > { %s1281_s7 = scalar_lea.vmem %s1682_s0, %s1016_s28  ;;  %s244_s8 = sadd.s32 %s986_s29, %s985_s30 }
  0x15   : > { %s987_s9 = sshll.u32 %s244_s8, 3  ;;  %s253_s14 = sadd.s32 %s988_s13, %s1706_s15 }
  0x16   : > { %s1286_s12 = scalar_lea.vmem %s1684_s2, %s987_s9  ;;  %s989_s23 = sshll.u32 %s253_s14, 3 }
  0x17   : > { %s1292_s26 = scalar_lea.vmem %s1685_s3, %s989_s23  ;;  %s1297_s28 = scalar_lea.vmem %s1686_s4, %s989_s23 }
  0x18   : > { %s1303_s29 = smov 0  }
  0x19 LB: >> { %v295_v4 = vlaneseq  ;;  %s275_s15 = sadd.s32 %s1203_s29, %s1263_s22  ;;  %vm303_vm0 = vcmask 1040384   ;;  %vm333_vm1 = vcmask 1046528   ;;  %s1012_s6 = sshll.u32 %s1203_s29, 4  ;;  %s1203_s29 = sphi %s1303_s29, %s272_s29   ;;  %v1199_v3 = vphi %v1301_v3, %v1692_v3   ;;  %v1195_v2 = vphi %v1299_v2, %v1691_v2  }
  0x1a   : >> { %s877_s16 = smul.u32 36, %s275_s15  ;;  %s719_s8 = scalar_lea.vmem %s1286_s12, %s1012_s6 }
  0x1b   : >> { %v1316_v5 = vshrl.u32 %v295_v4, 7  ;;  %s272_s29 = sadd.s32 1, %s1203_s29  }
  0x1c   : >> { %s1323_s30 = scalar_lea.vmem %s1281_s7, %s877_s16  ;;  %p269_p8 = scmp.ge.s32.totalorder %s272_s29, 8  }
  0x1d   : >> { %v297_v6 = vsub.s32 0, %v1316_v5  ;;  %v315_v7 = vsub.s32 1, %v1316_v5  ;;  %v325_v8 = vsub.s32 2, %v1316_v5  ;;  %v353_v9 = vsub.s32 3, %v1316_v5  ;;  %v994_v10 = vld [vmem:[%s1323_s30 + $0x24] sm:$0xff]   ;;  %v995_v11 = vld [vmem:[%s1323_s30 + $0x30] sm:$0xff]  }
  0x1e   : >> { %v996_v12 = vld [vmem:[%s1323_s30 + $0x3c] sm:$0x1]  ;;  %v1331_v15 = vld [vmem:[%s1323_s30 + $0x4] sm:$0xff]   ;;  %v1334_v16 = vld [vmem:[%s1323_s30 + $0x10] sm:$0xff]   ;;  %v348_v20 = vunpack.c.h.bf16 %v994_v10  ;;  %v380_v24 = vsub.s32 5, %v1316_v5  ;;  %v1342_v25 = vunpack.c.l.bf16 %v994_v10  ;;  %v1344_v26 = vunpack.c.l.bf16 %v995_v11 }
  0x1f   : >> { %v298_v13 = vrot.slane %v1268_v0, %v297_v6  ;;  %v354_v14 = vrot.slane %v1268_v0, %v353_v9  ;;  %v291_v17 = vld [vmem:[%s1323_s30 + $0x1c] sm:$0x1]  ;;  %v316_v18 = vrot.slane %v1268_v0, %v315_v7  ;;  %v326_v19 = vrot.slane %v1268_v0, %v325_v8  ;;  %v1000_v40 = vld [vmem:[%s1323_s30 + $0x40] sm:$0x1]  ;;  %v1370_v61 = vld [vmem:[%s1323_s30 + $0x4c] sm:$0xff]  }
  0x20   : >> { %v292_v21 = vunpack.c.l.bf16 %v1331_v15  ;;  %v293_v22 = vunpack.c.l.bf16 %v1334_v16  ;;  %v294_v23 = vunpack.c.l.bf16 %v291_v17  ;;  %v1346_v27 = vunpack.c.l.bf16 %v996_v12  ;;  %v1382_v6 = vld [vmem:[%s1323_s30 + $0x58] sm:$0xff]   ;;  %v1004_v7 = vld [vmem:[%s1323_s30 + $0x64] sm:$0x1] }
  0x21   : >> { %v370_v28 = vsub.s32 4, %v1316_v5  ;;  %v349_v31 = vunpack.c.h.bf16 %v995_v11  ;;  %v355_v32 = vadd.f32 %v354_v14, %v348_v20  ;;  %v381_v41 = vrot.slane %v1268_v0, %v380_v24 }
  0x22   : >> { %v299_v29 = vadd.f32 %v298_v13, %v292_v21  ;;  %v300_v30 = vadd.f32 %v298_v13, %v293_v22  ;;  %v317_v33 = vadd.f32 %v316_v18, %v292_v21  ;;  %v327_v34 = vadd.f32 %v326_v19, %v292_v21 }
  0x23   : >> { %v328_v35 = vadd.f32 %v326_v19, %v293_v22  ;;  %v329_v36 = vadd.f32 %v326_v19, %v294_v23  ;;  %v318_v39 = vadd.f32 %v316_v18, %v293_v22  ;;  %v319_v42 = vadd.f32 %v316_v18, %v294_v23 }
  0x24   : >> { %v304_v37 = vrot.slane %v299_v29, 7  ;;  %v305_v38 = vrot.slane %v300_v30, 7  ;;  %v334_v43 = vrot.slane %v327_v34, 1  ;;  %v356_v46 = vadd.f32 %v354_v14, %v349_v31 }
  0x25   : >> { %v335_v44 = vrot.slane %v328_v35, 1  ;;  %v337_v45 = vrot.slane %v329_v36, 1  ;;  %v411_v47 = vsub.s32 6, %v1316_v5  ;;  %v428_v48 = vsub.s32 7, %v1316_v5 }
  0x26   : >> { %v306_v49 = vsel %vm303_vm0, %v304_v37, %v305_v38  ;;  %v1355_v50 = vmul.f32 %v317_v33, %v1342_v25  ;;  %v350_v51 = vunpack.c.l.bf16 %v1000_v40  ;;  %v371_v52 = vrot.slane %v1268_v0, %v370_v28 }
  0x27   : >> { %v336_v53 = vsel %vm333_vm1, %v334_v43, %v335_v44  ;;  %v338_v54 = vsel %vm333_vm1, %v335_v44, %v337_v45  ;;  %v359_v55 = vrot.slane %v355_v32, 7  ;;  %v360_v56 = vrot.slane %v356_v46, 7 }
  0x28   : >> { %v1361_v57 = vmul.f32 %v304_v37, %v1342_v25  ;;  %v1364_v58 = vmul.f32 %v318_v39, %v1344_v26  ;;  %v1367_v59 = vmul.f32 %v319_v42, %v1346_v27  ;;  %v382_v60 = vadd.f32 %v381_v41, %v348_v20 }
  0x29   : >> { %v1373_v62 = vmul.f32 %v306_v49, %v1344_v26  ;;  %v1376_v63 = vmul.f32 %v305_v38, %v1346_v27  ;;  %v1379_v4 = vmul.f32 %v337_v45, %v1346_v27  ;;  %v383_v5 = vadd.f32 %v381_v41, %v349_v31 }
  0x2a   : >> { %v1386_v8 = vmul.f32 %v336_v53, %v1342_v25  ;;  %v1389_v9 = vmul.f32 %v338_v54, %v1344_v26  ;;  %v361_v10 = vsel %vm303_vm0, %v359_v55, %v360_v56  ;;  %v372_v11 = vadd.f32 %v371_v52, %v348_v20 }
  0x2b   : >> { %v384_v12 = vadd.f32 %v381_v41, %v350_v51  ;;  %v388_v13 = vrot.slane %v382_v60, 1  ;;  %v389_v14 = vrot.slane %v383_v5, 1  ;;  %v406_v17 = vunpack.c.l.bf16 %v1370_v61 }
  0x2c   : >> { %v407_v18 = vunpack.c.l.bf16 %v1382_v6  ;;  %v408_v19 = vunpack.c.l.bf16 %v1004_v7  ;;  %v412_v21 = vrot.slane %v1268_v0, %v411_v47  ;;  %v429_v22 = vrot.slane %v1268_v0, %v428_v48 }
  0x2d   : >> { %v1397_v23 = vmul.f32 %v359_v55, %v1342_v25  ;;  %v373_v24 = vadd.f32 %v371_v52, %v349_v31  ;;  %v374_v28 = vadd.f32 %v371_v52, %v350_v51  ;;  %v391_v29 = vrot.slane %v384_v12, 1  ;;  %v1447_v12 = vld [vmem:[%s1323_s30 + $0x20] sm:$0x1] }
  0x2e   : >> { %v1400_v20 = vmul.f32 %v360_v56, %v1346_v27  ;;  %v413_v30 = vadd.f32 %v412_v21, %v406_v17  ;;  %v414_v32 = vadd.f32 %v412_v21, %v407_v18  ;;  %v440_v33 = vadd.f32 %v1273_v1, %v406_v17 }
  0x2f   : >> { %v1404_v34 = vmul.f32 %v361_v10, %v1344_v26  ;;  %v1407_v35 = vmul.f32 %v372_v11, %v1342_v25  ;;  %v390_v36 = vsel %vm333_vm1, %v388_v13, %v389_v14  ;;  %v457_v31 = vmax.f32 %v1361_v57, %v1355_v50 }
  0x30   : >> { %v392_v37 = vsel %vm333_vm1, %v389_v14, %v391_v29  ;;  %v430_v38 = vadd.f32 %v429_v22, %v406_v17  ;;  %v431_v39 = vadd.f32 %v429_v22, %v407_v18  ;;  %v432_v40 = vadd.f32 %v429_v22, %v408_v19 }
  0x31   : >> { %v417_v41 = vrot.slane %v413_v30, 7  ;;  %v418_v42 = vrot.slane %v414_v32, 7  ;;  %v441_v43 = vadd.f32 %v1273_v1, %v407_v18  ;;  %v442_v44 = vadd.f32 %v1273_v1, %v408_v19  ;;  %v1006_v19 = vld [vmem:[%s1323_s30 + $0x2c] ss:$12 sps:$4 sm:$0xff]  }
  0x32   : >> { %v1416_v45 = vmul.f32 %v373_v24, %v1344_v26  ;;  %v1419_v46 = vmul.f32 %v374_v28, %v1346_v27  ;;  %v1422_v47 = vmul.f32 %v390_v36, %v1342_v25  ;;  %v446_v48 = vrot.slane %v440_v33, 1 }
  0x33   : >> { %v1425_v49 = vmul.f32 %v391_v29, %v1346_v27  ;;  %v447_v51 = vrot.slane %v441_v43, 1  ;;  %v449_v52 = vrot.slane %v442_v44, 1  ;;  %v458_v53 = vmax.f32 %v1373_v62, %v1364_v58 }
  0x34   : >> { %v1430_v54 = vmul.f32 %v392_v37, %v1344_v26  ;;  %v1433_v55 = vmul.f32 %v430_v38, %v1342_v25  ;;  %v459_v56 = vmax.f32 %v1376_v63, %v1367_v59  ;;  %v460_v60 = vmax.f32 %v457_v31, %v1386_v8 }
  0x35   : >> { %v419_v5 = vsel %vm303_vm0, %v417_v41, %v418_v42  ;;  %v1440_v7 = vmul.f32 %v431_v39, %v1344_v26  ;;  %v1443_v10 = vmul.f32 %v432_v40, %v1346_v27  ;;  %v461_v11 = vmax.f32 %v458_v53, %v1389_v9  ;;  %v1485_v40 = vld [vmem:[%s1323_s30 + $0x44] sm:$0x1] }
  0x36   : >> { %v1450_v13 = vmul.f32 %v417_v41, %v1342_v25  ;;  %v448_v14 = vsel %vm333_vm1, %v446_v48, %v447_v51  ;;  %v462_v17 = vmax.f32 %v459_v56, %v1379_v4  ;;  %v463_v18 = vmax.f32 %v460_v60, %v1397_v23 }
  0x37   : >> { %v450_v21 = vsel %vm333_vm1, %v447_v51, %v449_v52  ;;  %v464_v22 = vmax.f32 %v461_v11, %v1404_v34  ;;  %v1459_v24 = vunpack.c.h.bf16 %v1331_v15  ;;  %v1462_v28 = vunpack.c.h.bf16 %v1334_v16 }
  0x38   : >> { %v1465_v29 = vmul.f32 %v418_v42, %v1346_v27  ;;  %v465_v30 = vmax.f32 %v462_v17, %v1400_v20  ;;  %v466_v32 = vmax.f32 %v463_v18, %v1407_v35  ;;  %v486_v33 = vunpack.c.l.bf16 %v1447_v12 }
  0x39   : >> { %v1471_v36 = vmul.f32 %v419_v5, %v1344_v26  ;;  %v1474_v31 = vmul.f32 %v448_v14, %v1342_v25  ;;  %v467_v15 = vmax.f32 %v464_v22, %v1416_v45  ;;  %v1477_v37 = vunpack.c.l.bf16 %v1006_v19 }
  0x3a   : >> { %v1480_v16 = vmul.f32 %v450_v21, %v1344_v26  ;;  %v468_v38 = vmax.f32 %v465_v30, %v1419_v46  ;;  %v469_v39 = vmax.f32 %v466_v32, %v1422_v47  ;;  %v1487_v41 = vunpack.c.h.bf16 %v1006_v19 }
  0x3b   : >> { %v470_v42 = vmax.f32 %v467_v15, %v1430_v54  ;;  %v501_v25 = vrot.slane %v1459_v24, 7  ;;  %v502_v43 = vrot.slane %v1462_v28, 7  ;;  %v544_v44 = vrot.slane %v1459_v24, 1 }
  0x3c   : >> { %v471_v48 = vmax.f32 %v468_v38, %v1425_v49  ;;  %v472_v26 = vmax.f32 %v469_v39, %v1450_v13  ;;  %v545_v51 = vrot.slane %v1462_v28, 1  ;;  %v1498_v53 = vrot.slane %v486_v33, 1 }
  0x3d   : >> { %v473_v56 = vmax.f32 %v470_v42, %v1471_v36  ;;  %v1687_v60 = vunpack.c.l.bf16 %v1485_v40  ;;  %v578_v5 = vrot.slane %v1477_v37, 7  ;;  %v1688_v11 = vrot.slane %v1487_v41, 7 }
  0x3e   : >> { %v1505_v14 = vmul.f32 %v449_v52, %v1346_v27  ;;  %v474_v17 = vmax.f32 %v471_v48, %v1465_v29  ;;  %v475_v18 = vmax.f32 %v472_v26, %v1433_v55  ;;  %v1515_v21 = vsel %vm303_vm0, %v501_v25, %v502_v43 }
  0x3f   : >> { %v476_v19 = vmax.f32 %v473_v56, %v1440_v7  ;;  %v621_v22 = vrot.slane %v1477_v37, 1  ;;  %v622_v30 = vrot.slane %v1487_v41, 1  ;;  %v1524_v32 = vsel %vm333_vm1, %v544_v44, %v545_v51 }
  0x40   : >> { %v477_v27 = vmax.f32 %v474_v17, %v1443_v10  ;;  %v1521_v52 = vmax.f32 %v475_v18, %v1474_v31  ;;  %v1528_v15 = vsel %vm333_vm1, %v545_v51, %v1498_v53  ;;  %v1538_v39 = vsel %vm303_vm0, %v578_v5, %v1688_v11 }
  0x41   : >> { %v1531_v38 = vmax.f32 %v476_v19, %v1480_v16  ;;  %v1542_v42 = vrot.slane %v1687_v60, 1  ;;  %v1545_v44 = vunpack.c.h.bf16 %v1370_v61  ;;  %v1555_v56 = vunpack.c.h.bf16 %v1382_v6 }
  0x42   : >> { %v1548_v48 = vmax.f32 %v477_v27, %v1505_v14  ;;  %v487_v26 = vsub.f32 %v1361_v57, %v1521_v52  ;;  %v513_v51 = vsub.f32 %v1355_v50, %v1521_v52  ;;  %v531_v61 = vsub.f32 %v1386_v8, %v1521_v52 }
  0x43   : >> { %v488_v17 = vsub.f32 %v1373_v62, %v1531_v38  ;;  %v514_v18 = vsub.f32 %v1364_v58, %v1531_v38  ;;  %v1564_v19 = vsel %vm333_vm1, %v621_v22, %v622_v30  ;;  %v532_v6 = vsub.f32 %v1389_v9, %v1531_v38 }
  0x44   : >> { %v489_v57 = vsub.f32 %v1376_v63, %v1548_v48  ;;  %v490_v27 = vmul.f32 1.442695, %v487_v26  ;;  %v515_v50 = vsub.f32 %v1367_v59, %v1548_v48  ;;  %v516_v60 = vmul.f32 1.442695, %v513_v51 }
  0x45   : >> { %v492_v62 = vmul.f32 1.442695, %v488_v17  ;;  %v533_v58 = vsub.f32 %v1379_v4, %v1548_v48  ;;  %v1576_v8 = vsel %vm333_vm1, %v622_v30, %v1542_v42  ;;  %v518_v11 = vmul.f32 1.442695, %v514_v18 }
  0x46   : >> { %1081 = vpow2.f32 %v490_v27  ;;  %v494_v22 = vmul.f32 1.442695, %v489_v57  ;;  %v564_v63 = vsub.f32 %v1397_v23, %v1521_v52  ;;  %v520_v59 = vmul.f32 1.442695, %v515_v50 }
  0x47   : >> { %1083 = vpow2.f32 %v492_v62  ;;  %v565_v9 = vsub.f32 %v1404_v34, %v1531_v38  ;;  %v566_v26 = vsub.f32 %v1400_v20, %v1548_v48  ;;  %v534_v4 = vmul.f32 1.442695, %v531_v61 }
  0x48   : >> { %1085 = vpow2.f32 %v494_v22  ;;  %v536_v51 = vmul.f32 1.442695, %v532_v6  ;;  %v590_v30 = vsub.f32 %v1407_v35, %v1521_v52  ;;  %v538_v17 = vmul.f32 1.442695, %v533_v58 }
  0x49   : >> { %1087 = vpow2.f32 %v516_v60  ;;  %v591_v18 = vsub.f32 %v1416_v45, %v1531_v38  ;;  %v592_v23 = vsub.f32 %v1419_v46, %v1548_v48  ;;  %v567_v57 = vmul.f32 1.442695, %v564_v63 }
  0x4a   : >> { %1089 = vpow2.f32 %v518_v11  ;;  %v569_v34 = vmul.f32 1.442695, %v565_v9  ;;  %v608_v20 = vsub.f32 %v1422_v47, %v1521_v52  ;;  %v571_v61 = vmul.f32 1.442695, %v566_v26 }
  0x4b   : >> { %1091 = vpow2.f32 %v520_v59  ;;  %v609_v27 = vsub.f32 %v1430_v54, %v1531_v38  ;;  %v610_v35 = vsub.f32 %v1425_v49, %v1548_v48  ;;  %v593_v60 = vmul.f32 1.442695, %v590_v30 }
  0x4c   : >> { %1093 = vpow2.f32 %v534_v4  ;;  %v641_v45 = vsub.f32 %v1450_v13, %v1521_v52  ;;  %v642_v46 = vsub.f32 %v1471_v36, %v1531_v38  ;;  %v595_v11 = vmul.f32 1.442695, %v591_v18 }
  0x4d   : >> { %1095 = vpow2.f32 %v536_v51  ;;  %v597_v50 = vmul.f32 1.442695, %v592_v23  ;;  %v643_v47 = vsub.f32 %v1465_v29, %v1548_v48  ;;  %v611_v6 = vmul.f32 1.442695, %v608_v20 }
  0x4e   : >> { %1097 = vpow2.f32 %v538_v17  ;;  %v613_v54 = vmul.f32 1.442695, %v609_v27  ;;  %v615_v62 = vmul.f32 1.442695, %v610_v35  ;;  %v644_v49 = vmul.f32 1.442695, %v641_v45 }
  0x4f   : >> { %1099 = vpow2.f32 %v567_v57  ;;  %v667_v58 = vsub.f32 %v1433_v55, %v1521_v52  ;;  %v668_v13 = vsub.f32 %v1440_v7, %v1531_v38  ;;  %v646_v36 = vmul.f32 1.442695, %v642_v46 }
  0x50   : >> { %v1082_v22 = vpop.eup %1081  ;;  %1101 = vpow2.f32 %v569_v34  ;;  %v669_v63 = vsub.f32 %v1443_v10, %v1548_v48  ;;  %v685_v29 = vsub.f32 %v1474_v31, %v1521_v52  ;;  %v648_v26 = vmul.f32 1.442695, %v643_v47 }
  0x51   : >> { %v1084_v59 = vpop.eup %1083  ;;  %v507_v9 = vmul.f32 %v1082_v22, %v501_v25  ;;  %1103 = vpow2.f32 %v571_v61  ;;  %v686_v55 = vsub.f32 %v1480_v16, %v1531_v38  ;;  %v670_v51 = vmul.f32 1.442695, %v667_v58 }
  0x52   : >> { %v1086_v4 = vpop.eup %1085  ;;  %v508_v7 = vmul.f32 %v1084_v59, %v1515_v21  ;;  %1105 = vpow2.f32 %v593_v60  ;;  %v672_v30 = vmul.f32 1.442695, %v668_v13  ;;  %v674_v31 = vmul.f32 1.442695, %v669_v63 }
  0x53   : >> { %v1088_v17 = vpop.eup %1087  ;;  %v509_v10 = vmul.f32 %v1086_v4, %v502_v43  ;;  %1107 = vpow2.f32 %v595_v11  ;;  %v687_v25 = vsub.f32 %v1505_v14, %v1548_v48  ;;  %v688_v16 = vmul.f32 1.442695, %v685_v29 }
  0x54   : >> { %v1090_v52 = vpop.eup %1089  ;;  %v522_v18 = vadd.f32 %v1088_v17, %v1082_v22  ;;  %v525_v23 = vmul.f32 %v1088_v17, %v1459_v24  ;;  %1109 = vpow2.f32 %v597_v50  ;;  %v690_v34 = vmul.f32 1.442695, %v686_v55 }
  0x55   : >> { %v1092_v38 = vpop.eup %1091  ;;  %v523_v21 = vadd.f32 %v1090_v52, %v1084_v59  ;;  %v526_v57 = vmul.f32 %v1090_v52, %v1462_v28  ;;  %1111 = vpow2.f32 %v611_v6  ;;  %v692_v12 = vmul.f32 1.442695, %v687_v25 }
  0x56   : >> { %v1094_v20 = vpop.eup %1093  ;;  %v524_v61 = vadd.f32 %v1092_v38, %v1086_v4  ;;  %v527_v43 = vmul.f32 %v1092_v38, %v486_v33  ;;  %v528_v27 = vadd.f32 %v525_v23, %v507_v9  ;;  %1113 = vpow2.f32 %v613_v54  ;;  %v1011_v38 = vld [vmem:[%s1323_s30 + $0x68] sm:$0x1] }
  0x57   : >> { %v1096_v14 = vpop.eup %1095  ;;  %v529_v48 = vadd.f32 %v526_v57, %v508_v7  ;;  %v540_v35 = vadd.f32 %v1094_v20, %v522_v18  ;;  %v552_v24 = vmul.f32 %v1094_v20, %v1524_v32  ;;  %1115 = vpow2.f32 %v615_v62 }
  0x58   : >> { %v1098_v60 = vpop.eup %1097  ;;  %v530_v45 = vadd.f32 %v527_v43, %v509_v10  ;;  %v541_v46 = vadd.f32 %v1096_v14, %v523_v21  ;;  %v553_v28 = vmul.f32 %v1096_v14, %v1528_v15  ;;  %1117 = vpow2.f32 %v644_v49 }
  0x59   : >> { %v1100_v11 = vpop.eup %1099  ;;  %v542_v50 = vadd.f32 %v1098_v60, %v524_v61  ;;  %v554_v47 = vmul.f32 %v1098_v60, %v1498_v53  ;;  %1119 = vpow2.f32 %v646_v36  ;;  %v555_v6 = vadd.f32 %v552_v24, %v528_v27 }
  0x5a   : >> { %v1102_v33 = vpop.eup %1101  ;;  %v573_v54 = vadd.f32 %v1100_v11, %v540_v35  ;;  %v584_v58 = vmul.f32 %v1100_v11, %v578_v5  ;;  %1121 = vpow2.f32 %v648_v26  ;;  %v556_v62 = vadd.f32 %v553_v28, %v529_v48 }
  0x5b   : >> { %v1104_v32 = vpop.eup %1103  ;;  %v574_v13 = vadd.f32 %v1102_v33, %v541_v46  ;;  %v585_v22 = vmul.f32 %v1102_v33, %v1538_v39  ;;  %1123 = vpow2.f32 %v670_v51  ;;  %v557_v49 = vadd.f32 %v554_v47, %v530_v45 }
  0x5c   : >> { %v1106_v15 = vpop.eup %1105  ;;  %v575_v63 = vadd.f32 %v1104_v32, %v542_v50  ;;  %v1689_v53 = vrot.slane %v1487_v41, 7  ;;  %1125 = vpow2.f32 %v672_v30  ;;  %v655_v9 = vrot.slane %v1545_v44, 7 }
  0x5d   : >> { %v1108_v29 = vpop.eup %1107  ;;  %v599_v59 = vadd.f32 %v1106_v15, %v573_v54  ;;  %v656_v5 = vrot.slane %v1555_v56, 7  ;;  %1127 = vpow2.f32 %v674_v31  ;;  %v587_v55 = vadd.f32 %v584_v58, %v555_v6 }
  0x5e   : >> { %v586_v36 = vmul.f32 %v1104_v32, %v1689_v53  ;;  %v1110_v26 = vpop.eup %1109  ;;  %v600_v4 = vadd.f32 %v1108_v29, %v574_v13  ;;  %v602_v39 = vmul.f32 %v1106_v15, %v1477_v37  ;;  %1129 = vpow2.f32 %v688_v16 }
  0x5f   : >> { %v1112_v7 = vpop.eup %1111  ;;  %v588_v51 = vadd.f32 %v585_v22, %v556_v62  ;;  %v601_v17 = vadd.f32 %v1110_v26, %v575_v63  ;;  %v603_v10 = vmul.f32 %v1108_v29, %v1487_v41  ;;  %1131 = vpow2.f32 %v690_v34 }
  0x60   : >> { %v1114_v30 = vpop.eup %1113  ;;  %v589_v25 = vadd.f32 %v586_v36, %v557_v49  ;;  %v1690_v52 = vunpack.c.l.bf16 %v1485_v40  ;;  %v617_v23 = vadd.f32 %v1112_v7, %v599_v59  ;;  %1133 = vpow2.f32 %v692_v12 }
  0x61   : >> { %v1116_v31 = vpop.eup %1115  ;;  %v618_v21 = vadd.f32 %v1114_v30, %v600_v4  ;;  %v605_v20 = vadd.f32 %v602_v39, %v587_v55  ;;  %v629_v16 = vmul.f32 %v1112_v7, %v1564_v19  ;;  %v606_v43 = vadd.f32 %v603_v10, %v588_v51 }
  0x62   : >> { %v604_v18 = vmul.f32 %v1110_v26, %v1690_v52  ;;  %v1118_v57 = vpop.eup %1117  ;;  %v619_v37 = vadd.f32 %v1116_v31, %v601_v17  ;;  %v630_v41 = vmul.f32 %v1114_v30, %v1576_v8  ;;  %v640_v34 = vunpack.c.l.bf16 %v1011_v38 }
  0x63   : >> { %v1120_v61 = vpop.eup %1119  ;;  %v650_v27 = vadd.f32 %v1118_v57, %v617_v23  ;;  %v631_v40 = vmul.f32 %v1116_v31, %v1542_v42  ;;  %v657_v24 = vsel %vm303_vm0, %v655_v9, %v656_v5  ;;  %v698_v46 = vrot.slane %v1545_v44, 1 }
  0x64   : >> { %v1122_v14 = vpop.eup %1121  ;;  %v607_v48 = vadd.f32 %v604_v18, %v589_v25  ;;  %v651_v35 = vadd.f32 %v1120_v61, %v618_v21  ;;  %v632_v11 = vadd.f32 %v629_v16, %v605_v20  ;;  %v661_v19 = vmul.f32 %v1118_v57, %v655_v9 }
  0x65   : >> { %v1124_v60 = vpop.eup %1123  ;;  %v652_v45 = vadd.f32 %v1122_v14, %v619_v37  ;;  %v699_v47 = vrot.slane %v1555_v56, 1  ;;  %v633_v12 = vadd.f32 %v630_v41, %v606_v43  ;;  %v662_v33 = vmul.f32 %v1120_v61, %v657_v24 }
  0x66   : >> { %v1126_v28 = vpop.eup %1125  ;;  %v676_v50 = vadd.f32 %v1124_v60, %v650_v27  ;;  %v634_v58 = vadd.f32 %v631_v40, %v607_v48  ;;  %v663_v42 = vmul.f32 %v1122_v14, %v656_v5  ;;  %v701_v62 = vrot.slane %v640_v34, 1 }
  0x67   : >> { %v1128_v8 = vpop.eup %1127  ;;  %v677_v6 = vadd.f32 %v1126_v28, %v651_v35  ;;  %v664_v49 = vadd.f32 %v661_v19, %v632_v11  ;;  %v679_v63 = vmul.f32 %v1124_v60, %v1545_v44  ;;  %v700_v36 = vsel %vm333_vm1, %v698_v46, %v699_v47 }
  0x68   : >> { %v1130_v54 = vpop.eup %1129  ;;  %v678_v32 = vadd.f32 %v1128_v8, %v652_v45  ;;  %v665_v29 = vadd.f32 %v662_v33, %v633_v12  ;;  %v680_v59 = vmul.f32 %v1126_v28, %v1555_v56  ;;  %v666_v26 = vadd.f32 %v663_v42, %v634_v58 }
  0x69   : >> { %v1132_v13 = vpop.eup %1131  ;;  %v694_v22 = vadd.f32 %v1130_v54, %v676_v50  ;;  %v681_v5 = vmul.f32 %v1128_v8, %v640_v34  ;;  %v702_v55 = vsel %vm333_vm1, %v699_v47, %v701_v62  ;;  %v682_v4 = vadd.f32 %v679_v63, %v664_v49 }
  0x6a   : >> { %v1134_v15 = vpop.eup %1133  ;;  %v695_v53 = vadd.f32 %v1132_v13, %v677_v6  ;;  %v706_v39 = vmul.f32 %v1130_v54, %v700_v36  ;;  %v683_v7 = vadd.f32 %v680_v59, %v665_v29  ;;  %v707_v44 = vmul.f32 %v1132_v13, %v702_v55 }
  0x6b   : >> { %v696_v9 = vadd.f32 %v1134_v15, %v678_v32  ;;  %1135 = vrcp.f32 %v694_v22  ;;  %v684_v51 = vadd.f32 %v681_v5, %v666_v26  ;;  %v708_v17 = vmul.f32 %v1134_v15, %v701_v62 }
  0x6c   : >> { %1137 = vrcp.f32 %v695_v53  ;;  %v709_v10 = vadd.f32 %v706_v39, %v682_v4  ;;  %v710_v30 = vadd.f32 %v707_v44, %v683_v7 }
  0x6d   : >> { %1139 = vrcp.f32 %v696_v9  ;;  %v711_v25 = vadd.f32 %v708_v17, %v684_v51 }
  0x75   : >> { %v1136_v56 = vpop.eup %1135 }
  0x76   : >> { %v1138_v52 = vpop.eup %1137  ;;  %v713_v18 = vmul.f32 %v1136_v56, %v709_v10 }
  0x77   : >> { %v1140_v23 = vpop.eup %1139  ;;  %v715_v38 = vmul.f32 %v1138_v52, %v710_v30 }
  0x78   : >> { %v717_v31 = vmul.f32 %v1140_v23, %v711_v25  ;;  %720 = vst [vmem:[%s719_s8 - $0x1] sm:$0xfe] %v713_v18  ;;  %v726_v21 = vrot.slane %v713_v18, 1  ;;  %v741_v57 = vmul.f32 %v713_v18, %v713_v18 }
  0x79   : >> { %721 = vst [vmem:[%s719_s8 + $0x7] sm:$0xff] %v715_v38  ;;  %v727_v20 = vrot.slane %v715_v38, 1  ;;  %v742_v37 = vmul.f32 %v715_v38, %v715_v38 }
  0x7a   : >> { %722 = vst [vmem:[%s719_s8 + $0xf] sm:$0x1] %v717_v31  ;;  %v729_v16 = vrot.slane %v717_v31, 1  ;;  %v743_v61 = vmul.f32 %v717_v31, %v717_v31  ;;  %v747_v43 = vrot.slane %v741_v57, 1 }
  0x7b   : >> { %v728_v41 = vsel %vm333_vm1, %v726_v21, %v727_v20  ;;  %v748_v34 = vrot.slane %v742_v37, 1 }
  0x7c   : >> { %v730_v27 = vsel %vm333_vm1, %v727_v20, %v729_v16  ;;  %v750_v14 = vrot.slane %v743_v61, 1 }
  0x7d   : >> { %v733_v48 = vadd.f32 %v730_v27, %v728_v41  ;;  %v749_v40 = vsel %vm333_vm1, %v747_v43, %v748_v34 }
  0x7e   : >> { %v751_v35 = vsel %vm333_vm1, %v748_v34, %v750_v14 }
  0x7f   : >> { %v734_v24 = vrot.slane %v733_v48, 4  ;;  %v754_v60 = vadd.f32 %v751_v35, %v749_v40 }
  0x81   : >> { %v735_v45 = vadd.f32 %v734_v24, %v733_v48  ;;  %v755_v46 = vrot.slane %v754_v60, 4 }
  0x83   : >> { %v736_v28 = vrot.slane %v735_v45, 2  ;;  %v756_v11 = vadd.f32 %v755_v46, %v754_v60 }
  0x85   : >> { %v737_v19 = vadd.f32 %v736_v28, %v735_v45  ;;  %v757_v50 = vrot.slane %v756_v11, 2 }
  0x87   : >> { %v738_v47 = vrot.slane %v737_v19, 1  ;;  %v758_v8 = vadd.f32 %v757_v50, %v756_v11 }
  0x89   : >> { %v739_v12 = vadd.f32 %v738_v47, %v737_v19  ;;  %v759_v33 = vrot.slane %v758_v8, 1  ;;  %271 = sbr.rel (!%p269_p8) target bundleno = 25 (0x19), region = 93 }
  0x8b   : >> { %v740_v6 = vadd.f32 %v1199_v3, %v739_v12   ;;  %v760_v54 = vadd.f32 %v759_v33, %v758_v8 }
  0x8d   : >> { %v761_v58 = vadd.f32 %v1195_v2, %v760_v54   ;;  %v1692_v3 = vmov %v740_v6  ;;  %v763_v42 = vsel (%p269_p8), %vm303_vm0, %v740_v6, 0.0 }
  0x8e   : > { %764 = vst [vmem:[%s1292_s26] sm:$0xff] (%p269_p8), %v763_v42 }
  0x8f   : >> { %v1691_v2 = vmov %v761_v58  ;;  %v765_v32 = vsel (%p269_p8), %vm303_vm0, %v761_v58, 0.0 }
  0x90   : > { %766 = vst [vmem:[%s1297_s28] sm:$0xff] %v765_v32 }
  0x91 PF: > { %s15_s19 = sadd.s32 1, %s1191_s19   ;;  %s1693_s15 = smov %s1183_s17 }
  0x92   : > { %p12_p9 = scmp.ge.s32.totalorder %s15_s19, 6   ;;  %s1694_s16 = smov %s1187_s18 }
  0x93   : > { %s1695_s17 = smov %s1698_s20  ;;  %s1696_s18 = smov %s1702_s21 }
  0x94   :  { %14 = sbr.rel (!%p12_p9) target bundleno = 3 (0x3), region = 104 }

// kernel: sablock_forward.11
= control target key start
LH: loop header
LB: loop body
LE: loop exit
PB: predicated region body
PF: predicated region fallthrough
CT: control target
= control target key end

     0   :  { %9 = vsyncpa [#allocation3], 0  ;;  %s986_s0 = inlined_call_operand.vmem [shape: f32[512,128], index: 0, kind: input, shape index: {}]   ;;  %s987_s1 = inlined_call_operand.vmem [shape: f32[512,128], index: 1, kind: input, shape index: {}]   ;;  %s988_s2 = inlined_call_operand.vmem [shape: f32[1,128], index: 2, kind: input, shape index: {}]   ;;  %s989_s3 = inlined_call_operand.vmem [shape: f32[1,128], index: 3, kind: input, shape index: {}]   ;;  %s990_s4 = inlined_call_operand.hbm [shape: f32[512,128], index: 4, kind: output, shape index: {}]  }
   0x1   :  { %11 = vsyncpa [#allocation3 + $0x1], 0  ;;  %s697_s15 = smov 0   ;;  %s699_s16 = smov 0  }
   0x2   :  { %s701_s17 = smov 0   ;;  %s703_s18 = smov 0  }
   0x3 LB: > { %s718_s19 = sadd.s32 4294967295, %s667_s18   ;;  %s547_s20 = sadd.s32 4294967294, %s667_s18   ;;  %s667_s18 = sphi %s703_s18, %s996_s18   ;;  %s663_s17 = sphi %s701_s17, %s995_s17   ;;  %s659_s16 = sphi %s699_s16, %s994_s16   ;;  %s655_s15 = sphi %s697_s15, %s993_s15  }
   0x4   : > { %s722_s21 = sadd.s32 1, %s667_s18   ;;  %s118_s22 = sadd.s32 1, %s663_s17 }
   0x5   : > { %s115_s23 = ssub.s32 %s667_s18, %s722_s21  ;;  %p128_p0 = scmp.ne.s32.totalorder %s663_s17, %s659_s16 }
   0x6   : > { %p116_p1 = scmp.eq.s32.totalorder %s115_s23, 0  ;;  %p129_p2 = scmp.eq.s32.totalorder %s718_s19, 1 }
   0x7   : > { %p134_p3 = scmp.ne.s32.totalorder %s659_s16, %s655_s15  ;;  %p135_p4 = scmp.eq.s32.totalorder %s547_s20, 1 }
   0x8   : > { %s733_s24 = scalar_select %p116_p1, %s663_s17, %s118_s22  }
   0x9   : > { %p735_p5 = por %p129_p2, %p128_p0  ;;  %p739_p6 = por %p135_p4, %p134_p3 }
   0xa   : > { %p550_p7 = scmp.ge.s32.totalorder %s667_s18, 1  ;;  %p177_p8 = scmp.lt.s32.totalorder %s667_s18, 3 }
   0xc   : > { %p178_p9 = pnand %p550_p7, %p177_p8 }
   0xd   : > { %s552_s27 = sshll.u32 (!%p178_p9), %s718_s19, 5  ;;  %v749_v0 = vld [vmem:[%s988_s2] ss:$0 sm:$0xff] (!%p178_p9)  ;;  %s205_s11 = sand.u32 (!%p178_p9), 1, %s659_s16  }
   0xe   : > { %181 = sbr.rel (%p178_p9) target bundleno = 77 (0x4d), region = 36  ;;  %p209_p10 = scmp.lt.s32.totalorder (!%p178_p9), %s552_s27, 63  ;;  %v766_v2 = vld [vmem:[%s989_s3] ss:$0 sm:$0xff] (!%p178_p9) }
   0xf   : > { %s779_s14 = sshll.u32 (!%p178_p9), %s205_s11, 8  ;;  %s563_s22 = sshll.u32 (!%p178_p9), %s718_s19, 12 }
  0x10   : > { %s809_s20 = scalar_lea.vmem (!%p178_p9), [#allocation2], %s779_s14  ;;  %s936_s29 = scalar_lea.hbm (!%p178_p9), %s990_s4, %s563_s22 }
  0x11   : > { %s473_s23 = sshll.u32 (!%p178_p9), %s809_s20, 4  ;;  %s945_s19 = scalar_lea.sflag (!%p178_p9), [#allocation3], %s205_s11  ;;  %s938_s23 = int_to_ptr.vmem [resolvable:$true] %s473_s23 }
  0x12   : > { %s605_s30 = scalar_lea.vmem (!%p178_p9), %s938_s23, 4096  ;;  %s669_s5 = smov (!%p178_p9), [#allocation2]  }
  0x13   : > { %p606_p11 = scmp.ne.s32.totalorder (!%p178_p9), %s938_s23, %s605_s30  ;;  %s609_s6 = sshll.u32 (!%p178_p9), %s669_s5, 4  ;;  %s610_s6 = int_to_ptr.vmem [resolvable:$false] %s609_s6 }
  0x14   : > { %p612_p0 = scmp.lt.s32.totalorder (!%p178_p9), %s938_s23, %s610_s6 }
  0x15   : > { %s998_s27 = smov (!%p209_p10, %s552_s27), 63  ;;  %p607_p12 = pnand %p606_p11, %p735_p5 }
  0x16   : > { %s553_s28 = sshll.u32 %s998_s27, 3 }
  0x17   : > { %s754_s7 = scalar_lea.vmem %s986_s0, %s553_s28  ;;  %s759_s10 = scalar_lea.vmem %s987_s1, %s553_s28 }
  0x18   : > { %v221_v1 = vld [vmem:[%s754_s7] sm:$0xff]  ;;  %v222_v3 = vld [vmem:[%s754_s7 + $0x8] sm:$0xff]  ;;  %v223_v7 = vld [vmem:[%s754_s7 + $0x10] sm:$0xff]  ;;  %p608_p13 = pneg %p607_p12 }
  0x19   : > { %v260_v4 = vmul.f32 %v749_v0, %v221_v1  ;;  %v331_v5 = vld [vmem:[%s759_s10] sm:$0xff]  ;;  %v261_v6 = vmul.f32 %v749_v0, %v222_v3  ;;  %v332_v8 = vld [vmem:[%s759_s10 + $0x8] sm:$0xff]  ;;  %v262_v9 = vmul.f32 %v749_v0, %v223_v7  ;;  %v224_v10 = vld [vmem:[%s754_s7 + $0x18] sm:$0xff] }
  0x1a   : > { %v225_v11 = vld [vmem:[%s754_s7 + $0x20] sm:$0xff]  ;;  %v333_v14 = vld [vmem:[%s759_s10 + $0x10] sm:$0xff]  ;;  %v263_v15 = vmul.f32 %v749_v0, %v224_v10  ;;  %v334_v16 = vld [vmem:[%s759_s10 + $0x18] sm:$0xff] }
  0x1b   : > { %v299_v12 = vadd.f32 %v766_v2, %v260_v4  ;;  %v300_v13 = vadd.f32 %v766_v2, %v261_v6  ;;  %v264_v17 = vmul.f32 %v749_v0, %v225_v11  ;;  %v226_v18 = vld [vmem:[%s754_s7 + $0x28] sm:$0xff]  ;;  %v301_v19 = vadd.f32 %v766_v2, %v262_v9  ;;  %v335_v20 = vld [vmem:[%s759_s10 + $0x20] sm:$0xff]  ;;  %v227_v22 = vld [vmem:[%s754_s7 + $0x30] sm:$0xff] }
  0x1c   : > { %v265_v21 = vmul.f32 %v749_v0, %v226_v18  ;;  %v228_v23 = vld [vmem:[%s754_s7 + $0x38] sm:$0xff]  ;;  %v302_v26 = vadd.f32 %v766_v2, %v263_v15  ;;  %v336_v28 = vld [vmem:[%s759_s10 + $0x28] sm:$0xff]  ;;  %v266_v31 = vmul.f32 %v749_v0, %v227_v22  ;;  %v229_v33 = vld [vmem:[%s754_s7 + $0x40] sm:$0xff] }
  0x1d   : > { %v363_v24 = vadd.f32 %v331_v5, %v299_v12  ;;  %v364_v25 = vadd.f32 %v332_v8, %v300_v13  ;;  %v303_v27 = vadd.f32 %v766_v2, %v264_v17  ;;  %v365_v29 = vadd.f32 %v333_v14, %v301_v19  ;;  %v230_v34 = vld [vmem:[%s754_s7 + $0x48] sm:$0xff]  ;;  %v337_v39 = vld [vmem:[%s759_s10 + $0x30] sm:$0xff]  ;;  %v338_v40 = vld [vmem:[%s759_s10 + $0x38] sm:$0xff] }
  0x1e   : > { %v304_v30 = vadd.f32 %v766_v2, %v265_v21  ;;  %v267_v32 = vmul.f32 %v749_v0, %v228_v23  ;;  %v366_v37 = vadd.f32 %v334_v16, %v302_v26  ;;  %v231_v41 = vld [vmem:[%s754_s7 + $0x50] sm:$0xff]  ;;  %v305_v44 = vadd.f32 %v766_v2, %v266_v31  ;;  %v232_v46 = vld [vmem:[%s754_s7 + $0x58] sm:$0xff]  ;;  %v233_v47 = vld [vmem:[%s754_s7 + $0x60] sm:$0xff] }
  0x1f   : > { %v395_v35 = vmax.f32 %v363_v24, 0.0  ;;  %v396_v36 = vmax.f32 %v364_v25, 0.0  ;;  %v367_v38 = vadd.f32 %v335_v20, %v303_v27  ;;  %v397_v42 = vmax.f32 %v365_v29, 0.0  ;;  %v234_v52 = vld [vmem:[%s754_s7 + $0x68] sm:$0xff]  ;;  %v339_v56 = vld [vmem:[%s759_s10 + $0x40] sm:$0xff]  ;;  %v341_v61 = vld [vmem:[%s759_s10 + $0x50] sm:$0xff] }
  0x20   : > { %v368_v43 = vadd.f32 %v336_v28, %v304_v30  ;;  %v306_v45 = vadd.f32 %v766_v2, %v267_v32  ;;  %v398_v48 = vmax.f32 %v366_v37, 0.0  ;;  %v268_v50 = vmul.f32 %v749_v0, %v229_v33  ;;  %v340_v57 = vld [vmem:[%s759_s10 + $0x48] sm:$0xff]  ;;  %v235_v1 = vld [vmem:[%s754_s7 + $0x70] sm:$0xff]  ;;  %v236_v3 = vld [vmem:[%s754_s7 + $0x78] sm:$0xff] }
  0x21   : > { %427 = vst [vmem:[%s809_s20] sm:$0xff] %v395_v35  ;;  %428 = vst [vmem:[%s809_s20 + $0x8] sm:$0xff] %v396_v36  ;;  %v399_v49 = vmax.f32 %v367_v38, 0.0  ;;  %v269_v51 = vmul.f32 %v749_v0, %v230_v34  ;;  %v369_v54 = vadd.f32 %v337_v39, %v305_v44  ;;  %v270_v58 = vmul.f32 %v749_v0, %v231_v41  ;;  %v342_v7 = vld [vmem:[%s759_s10 + $0x58] sm:$0xff]  ;;  %v343_v8 = vld [vmem:[%s759_s10 + $0x60] sm:$0xff] }
  0x22   : > { %429 = vst [vmem:[%s809_s20 + $0x10] sm:$0xff] %v397_v42  ;;  %v400_v53 = vmax.f32 %v368_v43, 0.0  ;;  %v370_v55 = vadd.f32 %v338_v40, %v306_v45  ;;  %430 = vst [vmem:[%s809_s20 + $0x18] sm:$0xff] %v398_v48  ;;  %v307_v59 = vadd.f32 %v766_v2, %v268_v50  ;;  %v271_v62 = vmul.f32 %v749_v0, %v232_v46  ;;  %v344_v14 = vld [vmem:[%s759_s10 + $0x68] sm:$0xff]  ;;  %v237_v19 = vld [vmem:[%s754_s7 + $0x80] sm:$0xff] }
  0x23   : > { %431 = vst [vmem:[%s809_s20 + $0x20] sm:$0xff] %v399_v49  ;;  %v308_v60 = vadd.f32 %v766_v2, %v269_v51  ;;  %v272_v63 = vmul.f32 %v749_v0, %v233_v47  ;;  %v401_v4 = vmax.f32 %v369_v54, 0.0  ;;  %v309_v6 = vadd.f32 %v766_v2, %v270_v58  ;;  %v238_v20 = vld [vmem:[%s754_s7 + $0x88] sm:$0xff]  ;;  %v345_v25 = vld [vmem:[%s759_s10 + $0x70] sm:$0xff]  ;;  %v346_v26 = vld [vmem:[%s759_s10 + $0x78] sm:$0xff] }
  0x24   : > { %432 = vst [vmem:[%s809_s20 + $0x28] sm:$0xff] %v400_v53  ;;  %v402_v5 = vmax.f32 %v370_v55, 0.0  ;;  %v273_v9 = vmul.f32 %v749_v0, %v234_v52  ;;  %v371_v10 = vadd.f32 %v339_v56, %v307_v59  ;;  %v310_v12 = vadd.f32 %v766_v2, %v271_v62  ;;  %v239_v27 = vld [vmem:[%s754_s7 + $0x90] sm:$0xff]  ;;  %v240_v32 = vld [vmem:[%s754_s7 + $0x98] sm:$0xff]  ;;  %v241_v33 = vld [vmem:[%s754_s7 + $0xa0] sm:$0xff] }
  0x25   : > { %v372_v11 = vadd.f32 %v340_v57, %v308_v60  ;;  %v311_v13 = vadd.f32 %v766_v2, %v272_v63  ;;  %433 = vst [vmem:[%s809_s20 + $0x30] sm:$0xff] %v401_v4  ;;  %v373_v15 = vadd.f32 %v341_v61, %v309_v6  ;;  %v274_v17 = vmul.f32 %v749_v0, %v235_v1  ;;  %v242_v38 = vld [vmem:[%s754_s7 + $0xa8] sm:$0xff]  ;;  %v347_v42 = vld [vmem:[%s759_s10 + $0x80] sm:$0xff]  ;;  %v349_v47 = vld [vmem:[%s759_s10 + $0x90] sm:$0xff] }
  0x26   : > { %434 = vst [vmem:[%s809_s20 + $0x38] sm:$0xff] %v402_v5  ;;  %v312_v16 = vadd.f32 %v766_v2, %v273_v9  ;;  %v275_v18 = vmul.f32 %v749_v0, %v236_v3  ;;  %v403_v21 = vmax.f32 %v371_v10, 0.0  ;;  %v374_v23 = vadd.f32 %v342_v7, %v310_v12  ;;  %v348_v43 = vld [vmem:[%s759_s10 + $0x88] sm:$0xff]  ;;  %v243_v50 = vld [vmem:[%s754_s7 + $0xb0] sm:$0xff]  ;;  %v244_v51 = vld [vmem:[%s754_s7 + $0xb8] sm:$0xff] }
  0x27   : > { %v404_v22 = vmax.f32 %v372_v11, 0.0  ;;  %v375_v24 = vadd.f32 %v343_v8, %v311_v13  ;;  %v405_v28 = vmax.f32 %v373_v15, 0.0  ;;  %v313_v30 = vadd.f32 %v766_v2, %v274_v17  ;;  %v350_v55 = vld [vmem:[%s759_s10 + $0x98] sm:$0xff]  ;;  %v351_v56 = vld [vmem:[%s759_s10 + $0xa0] sm:$0xff]  ;;  %v352_v62 = vld [vmem:[%s759_s10 + $0xa8] sm:$0xff] }
  0x28   : > { %v376_v29 = vadd.f32 %v344_v14, %v312_v16  ;;  %v314_v31 = vadd.f32 %v766_v2, %v275_v18  ;;  %435 = vst [vmem:[%s809_s20 + $0x40] sm:$0xff] %v403_v21  ;;  %v406_v34 = vmax.f32 %v374_v23, 0.0  ;;  %v276_v36 = vmul.f32 %v749_v0, %v237_v19  ;;  %v245_v5 = vld [vmem:[%s754_s7 + $0xc0] sm:$0xff]  ;;  %v246_v6 = vld [vmem:[%s754_s7 + $0xc8] sm:$0xff]  ;;  %v353_v11 = vld [vmem:[%s759_s10 + $0xb0] sm:$0xff] }
  0x29   : > { %436 = vst [vmem:[%s809_s20 + $0x48] sm:$0xff] %v404_v22  ;;  %v407_v35 = vmax.f32 %v375_v24, 0.0  ;;  %v277_v37 = vmul.f32 %v749_v0, %v238_v20  ;;  %437 = vst [vmem:[%s809_s20 + $0x50] sm:$0xff] %v405_v28  ;;  %v377_v40 = vadd.f32 %v345_v25, %v313_v30  ;;  %v278_v44 = vmul.f32 %v749_v0, %v239_v27  ;;  %v354_v12 = vld [vmem:[%s759_s10 + $0xb8] sm:$0xff]  ;;  %v247_v13 = vld [vmem:[%s754_s7 + $0xd0] sm:$0xff] }
  0x2a   : > { %v408_v39 = vmax.f32 %v376_v29, 0.0  ;;  %v378_v41 = vadd.f32 %v346_v26, %v314_v31  ;;  %438 = vst [vmem:[%s809_s20 + $0x58] sm:$0xff] %v406_v34  ;;  %v315_v45 = vadd.f32 %v766_v2, %v276_v36  ;;  %v279_v48 = vmul.f32 %v749_v0, %v240_v32  ;;  %v248_v18 = vld [vmem:[%s754_s7 + $0xd8] sm:$0xff]  ;;  %v249_v19 = vld [vmem:[%s754_s7 + $0xe0] sm:$0xff]  ;;  %v250_v24 = vld [vmem:[%s754_s7 + $0xe8] sm:$0xff] }
  0x2b   : > { %439 = vst [vmem:[%s809_s20 + $0x60] sm:$0xff] %v407_v35  ;;  %v316_v46 = vadd.f32 %v766_v2, %v277_v37  ;;  %v280_v49 = vmul.f32 %v749_v0, %v241_v33  ;;  %v409_v52 = vmax.f32 %v377_v40, 0.0  ;;  %v317_v54 = vadd.f32 %v766_v2, %v278_v44  ;;  %v355_v28 = vld [vmem:[%s759_s10 + $0xc0] sm:$0xff]  ;;  %v356_v29 = vld [vmem:[%s759_s10 + $0xc8] sm:$0xff]  ;;  %v357_v33 = vld [vmem:[%s759_s10 + $0xd0] sm:$0xff] }
  0x2c   : > { %440 = vst [vmem:[%s809_s20 + $0x68] sm:$0xff] %v408_v39  ;;  %v410_v53 = vmax.f32 %v378_v41, 0.0  ;;  %v281_v57 = vmul.f32 %v749_v0, %v242_v38  ;;  %v379_v58 = vadd.f32 %v347_v42, %v315_v45  ;;  %v318_v60 = vadd.f32 %v766_v2, %v279_v48  ;;  %v251_v36 = vld [vmem:[%s754_s7 + $0xf0] sm:$0xff]  ;;  %v252_v37 = vld [vmem:[%s754_s7 + $0xf8] sm:$0xff]  ;;  %v359_v42 = vld [vmem:[%s759_s10 + $0xe0] sm:$0xff]  ;;  %s611_s7 = scalar_lea.vmem %s610_s6, 8192 }
  0x2d   : > { %v380_v59 = vadd.f32 %v348_v43, %v316_v46  ;;  %v319_v61 = vadd.f32 %v766_v2, %v280_v49  ;;  %441 = vst [vmem:[%s809_s20 + $0x70] sm:$0xff] %v409_v52  ;;  %v381_v63 = vadd.f32 %v349_v47, %v317_v54  ;;  %v282_v3 = vmul.f32 %v749_v0, %v243_v50  ;;  %v358_v41 = vld [vmem:[%s759_s10 + $0xd8] sm:$0xff]  ;;  %v360_v48 = vld [vmem:[%s759_s10 + $0xe8] sm:$0xff]  ;;  %p613_p1 = scmp.lt.s32.totalorder %s611_s7, %s605_s30 }
  0x2e   : > { %442 = vst [vmem:[%s809_s20 + $0x78] sm:$0xff] %v410_v53  ;;  %v320_v1 = vadd.f32 %v766_v2, %v281_v57  ;;  %v283_v4 = vmul.f32 %v749_v0, %v244_v51  ;;  %v411_v7 = vmax.f32 %v379_v58, 0.0  ;;  %v382_v9 = vadd.f32 %v350_v55, %v318_v60  ;;  %v361_v57 = vld [vmem:[%s759_s10 + $0xf0] sm:$0xff]  ;;  %v362_v58 = vld [vmem:[%s759_s10 + $0xf8] sm:$0xff] }
  0x2f   : > { %v412_v8 = vmax.f32 %v380_v59, 0.0  ;;  %v383_v10 = vadd.f32 %v351_v56, %v319_v61  ;;  %v413_v14 = vmax.f32 %v381_v63, 0.0  ;;  %v321_v16 = vadd.f32 %v766_v2, %v282_v3  ;;  %p614_p2 = por %p613_p1, %p612_p0 }
  0x30   : > { %v384_v15 = vadd.f32 %v352_v62, %v320_v1  ;;  %v322_v17 = vadd.f32 %v766_v2, %v283_v4  ;;  %443 = vst [vmem:[%s809_s20 + $0x80] sm:$0xff] %v411_v7  ;;  %v414_v20 = vmax.f32 %v382_v9, 0.0  ;;  %v284_v22 = vmul.f32 %v749_v0, %v245_v5 }
  0x31   : > { %444 = vst [vmem:[%s809_s20 + $0x88] sm:$0xff] %v412_v8  ;;  %v415_v21 = vmax.f32 %v383_v10, 0.0  ;;  %v285_v23 = vmul.f32 %v749_v0, %v246_v6  ;;  %445 = vst [vmem:[%s809_s20 + $0x90] sm:$0xff] %v413_v14  ;;  %v385_v26 = vadd.f32 %v353_v11, %v321_v16  ;;  %v286_v30 = vmul.f32 %v749_v0, %v247_v13  ;;  %p615_p3 = pnand %p614_p2, %p608_p13 }
  0x32   : > { %v416_v25 = vmax.f32 %v384_v15, 0.0  ;;  %v386_v27 = vadd.f32 %v354_v12, %v322_v17  ;;  %446 = vst [vmem:[%s809_s20 + $0x98] sm:$0xff] %v414_v20  ;;  %v323_v31 = vadd.f32 %v766_v2, %v284_v22  ;;  %v287_v34 = vmul.f32 %v749_v0, %v248_v18 }
  0x33   : > { %447 = vst [vmem:[%s809_s20 + $0xa0] sm:$0xff] %v415_v21  ;;  %v324_v32 = vadd.f32 %v766_v2, %v285_v23  ;;  %v288_v35 = vmul.f32 %v749_v0, %v249_v19  ;;  %v417_v38 = vmax.f32 %v385_v26, 0.0  ;;  %v325_v40 = vadd.f32 %v766_v2, %v286_v30 }
  0x34   : > { %448 = vst [vmem:[%s809_s20 + $0xa8] sm:$0xff] %v416_v25  ;;  %v418_v39 = vmax.f32 %v386_v27, 0.0  ;;  %v289_v43 = vmul.f32 %v749_v0, %v250_v24  ;;  %v387_v44 = vadd.f32 %v355_v28, %v323_v31  ;;  %v326_v46 = vadd.f32 %v766_v2, %v287_v34 }
  0x35   : > { %v388_v45 = vadd.f32 %v356_v29, %v324_v32  ;;  %v327_v47 = vadd.f32 %v766_v2, %v288_v35  ;;  %449 = vst [vmem:[%s809_s20 + $0xb0] sm:$0xff] %v417_v38  ;;  %v389_v49 = vadd.f32 %v357_v33, %v325_v40  ;;  %v290_v51 = vmul.f32 %v749_v0, %v251_v36 }
  0x36   : > { %450 = vst [vmem:[%s809_s20 + $0xb8] sm:$0xff] %v418_v39  ;;  %v328_v50 = vadd.f32 %v766_v2, %v289_v43  ;;  %v291_v52 = vmul.f32 %v749_v0, %v252_v37  ;;  %v419_v53 = vmax.f32 %v387_v44, 0.0  ;;  %v390_v55 = vadd.f32 %v358_v41, %v326_v46 }
  0x37   : > { %v420_v54 = vmax.f32 %v388_v45, 0.0  ;;  %v391_v56 = vadd.f32 %v359_v42, %v327_v47  ;;  %v421_v59 = vmax.f32 %v389_v49, 0.0  ;;  %v329_v61 = vadd.f32 %v766_v2, %v290_v51 }
  0x38   : > { %v392_v60 = vadd.f32 %v360_v48, %v328_v50  ;;  %v330_v62 = vadd.f32 %v766_v2, %v291_v52  ;;  %451 = vst [vmem:[%s809_s20 + $0xc0] sm:$0xff] %v419_v53  ;;  %v422_v0 = vmax.f32 %v390_v55, 0.0 }
  0x39   : > { %452 = vst [vmem:[%s809_s20 + $0xc8] sm:$0xff] %v420_v54  ;;  %v423_v63 = vmax.f32 %v391_v56, 0.0  ;;  %453 = vst [vmem:[%s809_s20 + $0xd0] sm:$0xff] %v421_v59  ;;  %v393_v3 = vadd.f32 %v361_v57, %v329_v61 }
  0x3a   : > { %v424_v1 = vmax.f32 %v392_v60, 0.0  ;;  %v394_v4 = vadd.f32 %v362_v58, %v330_v62  ;;  %454 = vst [vmem:[%s809_s20 + $0xd8] sm:$0xff] %v422_v0 }
  0x3b   : > { %455 = vst [vmem:[%s809_s20 + $0xe0] sm:$0xff] %v423_v63  ;;  %v425_v2 = vmax.f32 %v393_v3, 0.0 }
  0x3c   : > { %456 = vst [vmem:[%s809_s20 + $0xe8] sm:$0xff] %v424_v1  ;;  %v426_v5 = vmax.f32 %v394_v4, 0.0 }
  0x3d   : > { %457 = vst [vmem:[%s809_s20 + $0xf0] sm:$0xff] %v425_v2 }
  0x3e   : > { %458 = vst [vmem:[%s809_s20 + $0xf8] sm:$0xff] %v426_v5 }
  0x3f   : > { %618 = shalt.err (!%p615_p3)
}
  0x40   : > { %s619_s8 = scalar_lea.hbm %s936_s29, 4096  ;;  %s623_s11 = scalar_lea.hbm %s990_s4, 8192 }
  0x41   : > { %p620_p4 = scmp.ne.s32.totalorder %s936_s29, %s619_s8  ;;  %p624_p9 = scmp.lt.u32.totalorder %s936_s29, %s990_s4 }
  0x42   : > { %p625_p10 = scmp.lt.u32.totalorder %s623_s11, %s619_s8  ;;  %p627_p12 = scmp.lt.u32.totalorder %s619_s8, %s936_s29 }
  0x43   : > { %p621_p7 = pnand %p620_p4, %p735_p5 }
  0x44   : > { %p626_p11 = por %p625_p10, %p624_p9 }
  0x45   : > { %p622_p8 = pneg %p621_p7 }
  0x46   : > { %p628_p13 = por %p627_p12, %p626_p11 }
  0x48   : > { %p629_p0 = pnand %p628_p13, %p622_p8 }
  0x4a   : > { %632 = shalt.err (!%p629_p0)
}
  0x4b   : > { %s670_s14 = smov 128   ;;  %s671_s20 = smov 8  }
  0x4c   : > { %564 = dma.vmem_to_hbm [thread:$0]  (%p735_p5), %s938_s23, 4096, %s936_s29, %s945_s19, %s670_s14, %s670_s14, %s671_s20  }
  0x4d PF: > { %p570_p1 = scmp.ge.s32.totalorder %s667_s18, 2  ;;  %s488_s22 = sand.u32 1, %s655_s15  }
  0x4e   : > { %s489_s27 = scalar_lea.sflag [#allocation3], %s488_s22 }
  0x4f   : > { %p567_p2 = pnand %p570_p1, %p739_p6 }
  0x51   : > { %650 = dma.done.wait (!%p567_p2), %s489_s27, 4096  }
  0x52   : > { %652 = vsyncadd (!%p567_p2), %s489_s27, 4294963200  ;;  %p14_p3 = scmp.ge.s32.totalorder %s722_s21, 4   ;;  %s993_s15 = smov %s659_s16 }
  0x53   : > { %s994_s16 = smov %s663_s17  ;;  %s995_s17 = smov %s733_s24 }
  0x54   : > { %s996_s18 = smov %s722_s21  ;;  %16 = sbr.rel (!%p14_p3) target bundleno = 3 (0x3), region = 74 }
  0x5b   :  { %494 = vsyncpa [#allocation3], 1 }
  0x5c   :  { %496 = vsyncpa [#allocation3 + $0x1], 1 }

</bundles_post_ra>
